<compile_context>
chip_gen: v6e
topology: v6e:2x2x1
jax: 0.10.0
libtpu: 0.0.40
codegen_flags: <defaults>
</compile_context>

<pallas_src>
import functools

import jax
import jax.numpy as jnp
from jax import lax
from jax.experimental import pallas as pl
from jax.experimental.pallas import tpu as pltpu


# ------------------------------- kernel ------------------------------------ #

def _osblock_kernel(*refs, H, W, mid, has_down):
    if has_down:
        (x_ref, w1_ref, b1_ref,
         wc1_ref, dw1_ref, bb1_ref,
         wc2_ref, dw2_ref, bb2_ref,
         wc3_ref, dw3_ref, bb3_ref,
         wc4_ref, dw4_ref, bb4_ref,
         gw1_ref, gb1_ref, gw2_ref, gb2_ref,
         w3_ref, b3_ref, wd_ref, bd_ref,
         o_ref) = refs
    else:
        (x_ref, w1_ref, b1_ref,
         wc1_ref, dw1_ref, bb1_ref,
         wc2_ref, dw2_ref, bb2_ref,
         wc3_ref, dw3_ref, bb3_ref,
         wc4_ref, dw4_ref, bb4_ref,
         gw1_ref, gb1_ref, gw2_ref, gb2_ref,
         w3_ref, b3_ref,
         o_ref) = refs
        wd_ref = bd_ref = None

    HW = H * W
    inv_hw = 1.0 / float(HW)

    x_in = x_ref[0]                                          # (Cin, HW) f32

    def matmul(w_ref, a_f32):
        # (Cout, Cin) bf16 weight  @  (Cin, HW) activation, f32 accumulation.
        return jnp.dot(w_ref[...], a_f32.astype(jnp.bfloat16),
                       preferred_element_type=jnp.float32)

    # ---- conv1: 1x1 conv + folded-BN + ReLU -------------------------------- #
    x1 = jnp.maximum(matmul(w1_ref, x_in) + b1_ref[...], 0.0)   # (mid, HW)

    # Column-edge masks on the flattened-HW (lane) axis, shared by all stages.
    col = lax.broadcasted_iota(jnp.int32, (1, HW), 1) % W
    mask_l = (col != 0).astype(jnp.float32)        # valid when reading x-1
    mask_r = (col != W - 1).astype(jnp.float32)    # valid when reading x+1

    def shift_flat(t, s):
        # tap[c, hw] = t[c, hw + s], zero padded on the flattened HW axis.
        if s == 0:
            return t
        cw = t.shape[0]
        z = jnp.zeros((cw, abs(s)), t.dtype)
        if s > 0:
            return jnp.concatenate([t[:, s:], z], axis=1)
        return jnp.concatenate([z, t[:, :s]], axis=1)

    # Fused multi-branch LightConv stage: 1x1 linear (MXU) + depthwise 3x3 +
    # folded-BN + ReLU (VPU).  t_in: (cin_stage, HW) -> (cw, HW).
    def light_stage(t_in, wpw_ref, wdw_ref, bias_ref):
        t = matmul(wpw_ref, t_in)                              # (cw, HW) f32
        wdw = wdw_ref[...]                                     # (cw, 9)
        # Horizontal (dx) shifts first with column masks; vertical (dy) shifts
        # are +/- W on the flat axis and are handled by zero padding.
        u = {-1: shift_flat(t, -1) * mask_l,
             0: t,
             1: shift_flat(t, 1) * mask_r}
        acc = None
        for dy in (-1, 0, 1):
            for dx in (-1, 0, 1):
                tap = shift_flat(u[dx], dy * W)
                k = (dy + 1) * 3 + (dx + 1)
                term = tap * wdw[:, k:k + 1]
                acc = term if acc is None else acc + term
        return jnp.maximum(acc + bias_ref[...], 0.0)

    # Stage 1: entry LightConv of all four branches (shared input x1),
    # concatenated along the channel/sublane axis -> [a | b | c | d].
    y1 = light_stage(x1, wc1_ref, dw1_ref, bb1_ref)            # (4*mid, HW)
    x2a = y1[0:mid, :]
    # Stage 2: second LightConv of branches b, c, d (block-diagonal 1x1).
    y2 = light_stage(y1[mid:4 * mid, :], wc2_ref, dw2_ref, bb2_ref)   # (3*mid,)
    x2b = y2[0:mid, :]
    # Stage 3: third LightConv of branches c, d.
    y3 = light_stage(y2[mid:3 * mid, :], wc3_ref, dw3_ref, bb3_ref)   # (2*mid,)
    x2c = y3[0:mid, :]
    # Stage 4: fourth LightConv of branch d.
    x2d = light_stage(y3[mid:2 * mid, :], wc4_ref, dw4_ref, bb4_ref)  # (mid,)

    # ---- ChannelGate (shared weights) applied to the 4 branches, summed ---- #
    pooled = jnp.concatenate(
        [jnp.sum(b, axis=1, keepdims=True) * inv_hw
         for b in (x2a, x2b, x2c, x2d)], axis=1)               # (mid, 4)
    h = jnp.maximum(
        jnp.dot(gw1_ref[...], pooled, preferred_element_type=jnp.float32)
        + gb1_ref[...], 0.0)                                   # (hid, 4)
    z = (jnp.dot(gw2_ref[...], h, preferred_element_type=jnp.float32)
         + gb2_ref[...])                                       # (mid, 4)
    g = 1.0 / (1.0 + jnp.exp(-z))                              # sigmoid
    x2 = (x2a * g[:, 0:1] + x2b * g[:, 1:2]
          + x2c * g[:, 2:3] + x2d * g[:, 3:4])                 # (mid, HW)

    # ---- conv3 (1x1 + folded-BN) + residual (+downsample) + ReLU ----------- #
    x3 = matmul(w3_ref, x2) + b3_ref[...]                      # (Cout, HW)
    if has_down:
        identity = matmul(wd_ref, x_in) + bd_ref[...]
    else:
        identity = x_in
    # TODO(synk): InstanceNorm2d (IN=True) path not implemented; default IN=False.
    o_ref[0] = jnp.maximum(x3 + identity, 0.0)


# ------------------------------- wrapper ------------------------------------ #

def os_block_forward(x_nchw, params):
    N, Cin, H, W = x_nchw.shape
    mid = params["conv1"]["w"].shape[1]
    Cout = params["conv3"]["w"].shape[1]
    HW = H * W
    has_down = "down" in params

    # NCHW -> (N, C, H*W): channels on sublanes, flattened image on lanes.
    x = x_nchw.astype(jnp.float32).reshape(N, Cin, HW)

    def fold_pw_t(w, bn):
        # conv1x1 (stored (Cin, Cout)) followed by BN: transpose to (Cout, Cin),
        # fold the BN scale into the weight rows, cast to bf16 for the MXU.
        s, b = bn
        return ((w.T * s[:, None]).astype(jnp.bfloat16),
                b.reshape(-1, 1).astype(jnp.float32))

    L = params["lights"]

    def dw_mat(idxs):
        # Depthwise taps as (cw, 9): channels on sublanes, 9 taps on lanes,
        # BN scale folded in.
        return jnp.concatenate(
            [(L[i]["dw_w"] * L[i]["bn"][0]).reshape(9, mid).T for i in idxs],
            axis=0).astype(jnp.float32)

    def bias_col(idxs):
        return jnp.concatenate(
            [L[i]["bn"][1] for i in idxs]).reshape(-1, 1).astype(jnp.float32)

    def stage_entry(idxs):
        # Branch-entry LightConvs share input x1 -> stack transposed 1x1 weights.
        wpw = jnp.concatenate([L[i]["pw_w"].T for i in idxs],
                              axis=0).astype(jnp.bfloat16)          # (4m, m)
        return wpw, dw_mat(idxs), bias_col(idxs)

    def stage_diag(idxs):
        # Later LightConvs of different branches -> block-diagonal 1x1 weight.
        k = len(idxs)
        wpw = jnp.zeros((k * mid, k * mid), jnp.float32)
        for j, i in enumerate(idxs):
            wpw = wpw.at[j * mid:(j + 1) * mid,
                         j * mid:(j + 1) * mid].set(L[i]["pw_w"].T)
        return wpw.astype(jnp.bfloat16), dw_mat(idxs), bias_col(idxs)

    w1, b1 = fold_pw_t(params["conv1"]["w"], params["conv1"]["bn"])
    s1 = stage_entry((0, 1, 3, 6))          # a, b, c, d first LightConv
    s2 = stage_diag((2, 4, 7))              # b, c, d second LightConv
    s3 = stage_diag((5, 8))                 # c, d third LightConv
    s4 = stage_diag((9,))                   # d fourth LightConv
    g = params["gate"]
    gw1, gb1 = g["w1"].T, g["b1"].reshape(-1, 1)
    gw2, gb2 = g["w2"].T, g["b2"].reshape(-1, 1)
    w3, b3 = fold_pw_t(params["conv3"]["w"], params["conv3"]["bn"])

    args = [x, w1, b1, *s1, *s2, *s3, *s4, gw1, gb1, gw2, gb2, w3, b3]
    if has_down:
        wd, bd = fold_pw_t(params["down"]["w"], params["down"]["bn"])
        args += [wd, bd]

    def full_spec(a):
        nd = a.ndim
        return pl.BlockSpec(a.shape, lambda n, _nd=nd: (0,) * _nd)

    in_specs = [pl.BlockSpec((1, Cin, HW), lambda n: (n, 0, 0))]
    in_specs += [full_spec(a) for a in args[1:]]

    kernel = functools.partial(_osblock_kernel, H=H, W=W, mid=mid,
                               has_down=has_down)

    out = pl.pallas_call(
        kernel,
        out_shape=jax.ShapeDtypeStruct((N, Cout, HW), jnp.float32),
        grid_spec=pltpu.PrefetchScalarGridSpec(
            num_scalar_prefetch=0,
            grid=(N,),
            in_specs=in_specs,
            out_specs=pl.BlockSpec((1, Cout, HW), lambda n: (n, 0, 0))),
        compiler_params=pltpu.CompilerParams(
            dimension_semantics=("parallel",)),
    )(*args)

    return out.reshape(N, Cout, H, W)                         # already NCHW


# ------------------------------ parameters ---------------------------------- #

def init_params(key, in_channels, out_channels,
                bottleneck_reduction=4, gate_reduction=16):
    mid = out_channels // bottleneck_reduction
    hid = mid // gate_reduction
    assert hid >= 1, "out_channels must be >= 64 so the gate hidden dim is >= 1"
    keys = iter(jax.random.split(key, 64))

    def wmat(shape, fan_in):
        return jax.random.normal(next(keys), shape, jnp.float32) / jnp.sqrt(fan_in)

    def bn(c):  # folded eval-mode BatchNorm: y = x*scale + bias
        s = 0.5 + jax.random.uniform(next(keys), (c,), jnp.float32)
        b = 0.1 * jax.random.normal(next(keys), (c,), jnp.float32)
        return s, b

    params = {"conv1": dict(w=wmat((in_channels, mid), in_channels), bn=bn(mid))}
    # 10 LightConv3x3 blocks: conv2a (1), conv2b (2), conv2c (3), conv2d (4)
    params["lights"] = [
        dict(pw_w=wmat((mid, mid), mid), dw_w=wmat((3, 3, mid), 9.0), bn=bn(mid))
        for _ in range(10)
    ]
    params["gate"] = dict(
        w1=wmat((mid, hid), mid),
        b1=0.1 * jax.random.normal(next(keys), (hid,), jnp.float32),
        w2=wmat((hid, mid), hid),
        b2=0.1 * jax.random.normal(next(keys), (mid,), jnp.float32),
    )
    params["conv3"] = dict(w=wmat((mid, out_channels), mid), bn=bn(out_channels))
    if in_channels != out_channels:
        params["down"] = dict(w=wmat((in_channels, out_channels), in_channels),
                              bn=bn(out_channels))
    return params


# --------------------------- pure-JAX reference ------------------------------ #

def _ref_forward(x_nchw, params):
    x = jnp.transpose(x_nchw, (0, 2, 3, 1)).astype(jnp.float32)
    N, H, W, _ = x.shape

    def pw(t, w, scale=None, bias=None, relu=False):
        w_eff = w if scale is None else w * scale[None, :]
        y = jnp.einsum("nhwc,cd->nhwd", t.astype(jnp.bfloat16),
                       w_eff.astype(jnp.bfloat16),
                       preferred_element_type=jnp.float32)
        if bias is not None:
            y = y + bias
        return jnp.maximum(y, 0.0) if relu else y

    def dw(t, w3, scale, bias):
        wf = w3 * scale                       # (3, 3, C) with BN scale folded
        xp = jnp.pad(t, ((0, 0), (1, 1), (1, 1), (0, 0)))
        acc = None
        for dy in range(3):
            for dx in range(3):
                term = xp[:, dy:dy + H, dx:dx + W, :] * wf[dy, dx]
                acc = term if acc is None else acc + term
        return jnp.maximum(acc + bias, 0.0)

    def light(t, p):
        return dw(pw(t, p["pw_w"]), p["dw_w"], p["bn"][0], p["bn"][1])

    def gate(t, g):
        p = jnp.mean(t, axis=(1, 2))
        h = jnp.maximum(p @ g["w1"] + g["b1"], 0.0)
        gt = jax.nn.sigmoid(h @ g["w2"] + g["b2"])
        return t * gt[:, None, None, :]

    c1 = params["conv1"]
    x1 = pw(x, c1["w"], c1["bn"][0], c1["bn"][1], relu=True)
    L = params["lights"]
    x2a = light(x1, L[0])
    x2b = light(light(x1, L[1]), L[2])
    x2c = light(light(light(x1, L[3]), L[4]), L[5])
    x2d = light(light(light(light(x1, L[6]), L[7]), L[8]), L[9])
    g = params["gate"]
    x2 = gate(x2a, g) + gate(x2b, g) + gate(x2c, g) + gate(x2d, g)
    c3 = params["conv3"]
    x3 = pw(x2, c3["w"], c3["bn"][0], c3["bn"][1])
    identity = x
    if "down" in params:
        d = params["down"]
        identity = pw(x, d["w"], d["bn"][0], d["bn"][1])
    out = jnp.maximum(x3 + identity, 0.0)
    return jnp.transpose(out, (0, 3, 1, 2))


# ---------------------------------- main ------------------------------------- #

if __name__ == "__main__":
    key = jax.random.PRNGKey(0)
    kx, kp = jax.random.split(key)

    # out_channels >= 64 so that mid_channels // 16 >= 1 inside ChannelGate;
    # in_channels != out_channels exercises the downsample path.
    N, C_IN, C_OUT, H, W = 2, 32, 64, 16, 16
    x = jax.random.normal(kx, (N, C_IN, H, W), jnp.float32)       # NCHW input
    params = init_params(kp, C_IN, C_OUT)

    out = jax.jit(os_block_forward)(x, params)
    jax.block_until_ready(out)

    ref = _ref_forward(x, params)
    assert out.shape == (N, C_OUT, H, W)
    max_err = float(jnp.max(jnp.abs(out - ref)))
    assert max_err < 2e-2, max_err

    print("KERNEL_OK")
</pallas_src>

<mosaic_0001>
module attributes {stable_mosaic.version = 11 : i64} {
  func.func @_osblock_kernel(%arg0: i32, %arg1: memref<1x32x256xf32, #tpu.memory_space<vmem>>, %arg2: memref<16x32xbf16, #tpu.memory_space<vmem>>, %arg3: memref<16x1xf32, #tpu.memory_space<vmem>>, %arg4: memref<64x16xbf16, #tpu.memory_space<vmem>>, %arg5: memref<64x9xf32, #tpu.memory_space<vmem>>, %arg6: memref<64x1xf32, #tpu.memory_space<vmem>>, %arg7: memref<48x48xbf16, #tpu.memory_space<vmem>>, %arg8: memref<48x9xf32, #tpu.memory_space<vmem>>, %arg9: memref<48x1xf32, #tpu.memory_space<vmem>>, %arg10: memref<32x32xbf16, #tpu.memory_space<vmem>>, %arg11: memref<32x9xf32, #tpu.memory_space<vmem>>, %arg12: memref<32x1xf32, #tpu.memory_space<vmem>>, %arg13: memref<16x16xbf16, #tpu.memory_space<vmem>>, %arg14: memref<16x9xf32, #tpu.memory_space<vmem>>, %arg15: memref<16x1xf32, #tpu.memory_space<vmem>>, %arg16: memref<1x16xf32, #tpu.memory_space<vmem>>, %arg17: memref<1x1xf32, #tpu.memory_space<vmem>>, %arg18: memref<16x1xf32, #tpu.memory_space<vmem>>, %arg19: memref<16x1xf32, #tpu.memory_space<vmem>>, %arg20: memref<64x16xbf16, #tpu.memory_space<vmem>>, %arg21: memref<64x1xf32, #tpu.memory_space<vmem>>, %arg22: memref<64x32xbf16, #tpu.memory_space<vmem>>, %arg23: memref<64x1xf32, #tpu.memory_space<vmem>>, %arg24: memref<1x64x256xf32, #tpu.memory_space<vmem>>) attributes {dimension_semantics = [#tpu.dimension_semantics<parallel>], iteration_bounds = array<i64: 2>, scalar_prefetch = 0 : i64, scratch_operands = 0 : i64, tpu.core_type = #tpu.core_type<tc>, window_params = [{transform_indices = @transform_0, window_bounds = array<i64: 1, 32, 256>}, {pipeline_mode = #tpu.pipeline_mode<synchronous>, transform_indices = @transform_1, window_bounds = array<i64: 16, 32>}, {pipeline_mode = #tpu.pipeline_mode<synchronous>, transform_indices = @transform_2, window_bounds = array<i64: 16, 1>}, {pipeline_mode = #tpu.pipeline_mode<synchronous>, transform_indices = @transform_3, window_bounds = array<i64: 64, 16>}, {pipeline_mode = #tpu.pipeline_mode<synchronous>, transform_indices = @transform_4, window_bounds = array<i64: 64, 9>}, {pipeline_mode = #tpu.pipeline_mode<synchronous>, transform_indices = @transform_5, window_bounds = array<i64: 64, 1>}, {pipeline_mode = #tpu.pipeline_mode<synchronous>, transform_indices = @transform_6, window_bounds = array<i64: 48, 48>}, {pipeline_mode = #tpu.pipeline_mode<synchronous>, transform_indices = @transform_7, window_bounds = array<i64: 48, 9>}, {pipeline_mode = #tpu.pipeline_mode<synchronous>, transform_indices = @transform_8, window_bounds = array<i64: 48, 1>}, {pipeline_mode = #tpu.pipeline_mode<synchronous>, transform_indices = @transform_9, window_bounds = array<i64: 32, 32>}, {pipeline_mode = #tpu.pipeline_mode<synchronous>, transform_indices = @transform_10, window_bounds = array<i64: 32, 9>}, {pipeline_mode = #tpu.pipeline_mode<synchronous>, transform_indices = @transform_11, window_bounds = array<i64: 32, 1>}, {pipeline_mode = #tpu.pipeline_mode<synchronous>, transform_indices = @transform_12, window_bounds = array<i64: 16, 16>}, {pipeline_mode = #tpu.pipeline_mode<synchronous>, transform_indices = @transform_13, window_bounds = array<i64: 16, 9>}, {pipeline_mode = #tpu.pipeline_mode<synchronous>, transform_indices = @transform_14, window_bounds = array<i64: 16, 1>}, {pipeline_mode = #tpu.pipeline_mode<synchronous>, transform_indices = @transform_15, window_bounds = array<i64: 1, 16>}, {pipeline_mode = #tpu.pipeline_mode<synchronous>, transform_indices = @transform_16, window_bounds = array<i64: 1, 1>}, {pipeline_mode = #tpu.pipeline_mode<synchronous>, transform_indices = @transform_17, window_bounds = array<i64: 16, 1>}, {pipeline_mode = #tpu.pipeline_mode<synchronous>, transform_indices = @transform_18, window_bounds = array<i64: 16, 1>}, {pipeline_mode = #tpu.pipeline_mode<synchronous>, transform_indices = @transform_19, window_bounds = array<i64: 64, 16>}, {pipeline_mode = #tpu.pipeline_mode<synchronous>, transform_indices = @transform_20, window_bounds = array<i64: 64, 1>}, {pipeline_mode = #tpu.pipeline_mode<synchronous>, transform_indices = @transform_21, window_bounds = array<i64: 64, 32>}, {pipeline_mode = #tpu.pipeline_mode<synchronous>, transform_indices = @transform_22, window_bounds = array<i64: 64, 1>}, {transform_indices = @transform_23, window_bounds = array<i64: 1, 64, 256>}]} {
    %c0 = arith.constant 0 : index
    %c0_0 = arith.constant 0 : index
    %c0_1 = arith.constant 0 : index
    %0 = vector.load %arg1[%c0, %c0_0, %c0_1] : memref<1x32x256xf32, #tpu.memory_space<vmem>>, vector<1x32x256xf32>
    %1 = vector.shape_cast %0 : vector<1x32x256xf32> to vector<32x256xf32>
    %c0_2 = arith.constant 0 : index
    %c0_3 = arith.constant 0 : index
    %2 = vector.load %arg2[%c0_2, %c0_3] : memref<16x32xbf16, #tpu.memory_space<vmem>>, vector<16x32xbf16>
    %3 = arith.truncf %1 : vector<32x256xf32> to vector<32x256xbf16>
    %cst = arith.constant dense<0.000000e+00> : vector<16x256xf32>
    %4 = tpu.matmul %2, %3, %cst {dimension_numbers = #tpu.dot_dimension_numbers<[1], [0], [0], [1], [0, 0, 1, 1], [], []>} : vector<16x32xbf16>, vector<32x256xbf16>, vector<16x256xf32> -> vector<16x256xf32>
    %c0_4 = arith.constant 0 : index
    %c0_5 = arith.constant 0 : index
    %5 = vector.load %arg3[%c0_4, %c0_5] : memref<16x1xf32, #tpu.memory_space<vmem>>, vector<16x1xf32>
    %6 = vector.broadcast %5 : vector<16x1xf32> to vector<16x256xf32>
    %7 = arith.addf %4, %6 : vector<16x256xf32>
    %cst_6 = arith.constant 0.000000e+00 : f32
    %8 = vector.broadcast %cst_6 : f32 to vector<16x256xf32>
    %9 = arith.maximumf %7, %8 : vector<16x256xf32>
    %10 = tpu.iota {dimensions = array<i32: 1>} : vector<1x256xi32>
    %c16_i32 = arith.constant 16 : i32
    %c0_i32 = arith.constant 0 : i32
    %11 = arith.cmpi eq, %c16_i32, %c0_i32 : i32
    %c1_i32 = arith.constant 1 : i32
    %12 = arith.select %11, %c1_i32, %c16_i32 : i32
    %13 = vector.broadcast %12 : i32 to vector<1x256xi32>
    %14 = arith.remsi %10, %13 : vector<1x256xi32>
    %c0_i32_7 = arith.constant 0 : i32
    %15 = vector.broadcast %c0_i32_7 : i32 to vector<1x256xi32>
    %16 = arith.cmpi ne, %14, %15 : vector<1x256xi32>
    %c0_i32_8 = arith.constant 0 : i32
    %17 = vector.broadcast %c0_i32_8 : i32 to vector<1x256xi32>
    %18 = arith.cmpi slt, %14, %17 : vector<1x256xi32>
    %c0_i32_9 = arith.constant 0 : i32
    %19 = arith.cmpi slt, %12, %c0_i32_9 : i32
    %20 = vector.broadcast %19 : i1 to vector<1x256xi1>
    %21 = vector.broadcast %20 : vector<1x256xi1> to vector<1x256xi1>
    %22 = arith.xori %18, %21 : vector<1x256xi1>
    %23 = arith.andi %22, %16 : vector<1x256xi1>
    %24 = vector.broadcast %12 : i32 to vector<1x256xi32>
    %25 = arith.addi %14, %24 : vector<1x256xi32>
    %26 = arith.select %23, %25, %14 : vector<1x256xi1>, vector<1x256xi32>
    %c0_i32_10 = arith.constant 0 : i32
    %27 = vector.broadcast %c0_i32_10 : i32 to vector<1x256xi32>
    %28 = arith.cmpi ne, %26, %27 : vector<1x256xi32>
    %29 = arith.extui %28 : vector<1x256xi1> to vector<1x256xi32>
    %30 = arith.sitofp %29 : vector<1x256xi32> to vector<1x256xf32>
    %c15_i32 = arith.constant 15 : i32
    %31 = vector.broadcast %c15_i32 : i32 to vector<1x256xi32>
    %32 = arith.cmpi ne, %26, %31 : vector<1x256xi32>
    %33 = arith.extui %32 : vector<1x256xi1> to vector<1x256xi32>
    %34 = arith.sitofp %33 : vector<1x256xi32> to vector<1x256xf32>
    %c0_11 = arith.constant 0 : index
    %c0_12 = arith.constant 0 : index
    %35 = vector.load %arg4[%c0_11, %c0_12] : memref<64x16xbf16, #tpu.memory_space<vmem>>, vector<64x16xbf16>
    %36 = arith.truncf %9 : vector<16x256xf32> to vector<16x256xbf16>
    %cst_13 = arith.constant dense<0.000000e+00> : vector<64x256xf32>
    %37 = tpu.matmul %35, %36, %cst_13 {dimension_numbers = #tpu.dot_dimension_numbers<[1], [0], [0], [1], [0, 0, 1, 1], [], []>} : vector<64x16xbf16>, vector<16x256xbf16>, vector<64x256xf32> -> vector<64x256xf32>
    %c0_14 = arith.constant 0 : index
    %c0_15 = arith.constant 0 : index
    %38 = vector.load %arg5[%c0_14, %c0_15] : memref<64x9xf32, #tpu.memory_space<vmem>>, vector<64x9xf32>
    %cst_16 = arith.constant 0.000000e+00 : f32
    %39 = vector.broadcast %cst_16 : f32 to vector<64x1xf32>
    %40 = vector.extract_strided_slice %37 {offsets = [0, 0], sizes = [64, 255], strides = [1, 1]} : vector<64x256xf32> to vector<64x255xf32>
    %41 = tpu.concatenate %39, %40 in 1 : vector<64x1xf32>, vector<64x255xf32> -> vector<64x256xf32>
    %42 = vector.broadcast %30 : vector<1x256xf32> to vector<64x256xf32>
    %43 = arith.mulf %41, %42 : vector<64x256xf32>
    %cst_17 = arith.constant 0.000000e+00 : f32
    %44 = vector.broadcast %cst_17 : f32 to vector<64x1xf32>
    %45 = vector.extract_strided_slice %37 {offsets = [0, 1], sizes = [64, 255], strides = [1, 1]} : vector<64x256xf32> to vector<64x255xf32>
    %46 = tpu.concatenate %45, %44 in 1 : vector<64x255xf32>, vector<64x1xf32> -> vector<64x256xf32>
    %47 = vector.broadcast %34 : vector<1x256xf32> to vector<64x256xf32>
    %48 = arith.mulf %46, %47 : vector<64x256xf32>
    %cst_18 = arith.constant 0.000000e+00 : f32
    %49 = vector.broadcast %cst_18 : f32 to vector<64x16xf32>
    %50 = vector.extract_strided_slice %43 {offsets = [0, 0], sizes = [64, 240], strides = [1, 1]} : vector<64x256xf32> to vector<64x240xf32>
    %51 = tpu.concatenate %49, %50 in 1 : vector<64x16xf32>, vector<64x240xf32> -> vector<64x256xf32>
    %52 = vector.extract_strided_slice %38 {offsets = [0, 0], sizes = [64, 1], strides = [1, 1]} : vector<64x9xf32> to vector<64x1xf32>
    %53 = vector.broadcast %52 : vector<64x1xf32> to vector<64x256xf32>
    %54 = arith.mulf %51, %53 : vector<64x256xf32>
    %cst_19 = arith.constant 0.000000e+00 : f32
    %55 = vector.broadcast %cst_19 : f32 to vector<64x16xf32>
    %56 = vector.extract_strided_slice %37 {offsets = [0, 0], sizes = [64, 240], strides = [1, 1]} : vector<64x256xf32> to vector<64x240xf32>
    %57 = tpu.concatenate %55, %56 in 1 : vector<64x16xf32>, vector<64x240xf32> -> vector<64x256xf32>
    %58 = vector.extract_strided_slice %38 {offsets = [0, 1], sizes = [64, 1], strides = [1, 1]} : vector<64x9xf32> to vector<64x1xf32>
    %59 = vector.broadcast %58 : vector<64x1xf32> to vector<64x256xf32>
    %60 = arith.mulf %57, %59 : vector<64x256xf32>
    %61 = arith.addf %54, %60 : vector<64x256xf32>
    %cst_20 = arith.constant 0.000000e+00 : f32
    %62 = vector.broadcast %cst_20 : f32 to vector<64x16xf32>
    %63 = vector.extract_strided_slice %48 {offsets = [0, 0], sizes = [64, 240], strides = [1, 1]} : vector<64x256xf32> to vector<64x240xf32>
    %64 = tpu.concatenate %62, %63 in 1 : vector<64x16xf32>, vector<64x240xf32> -> vector<64x256xf32>
    %65 = vector.extract_strided_slice %38 {offsets = [0, 2], sizes = [64, 1], strides = [1, 1]} : vector<64x9xf32> to vector<64x1xf32>
    %66 = vector.broadcast %65 : vector<64x1xf32> to vector<64x256xf32>
    %67 = arith.mulf %64, %66 : vector<64x256xf32>
    %68 = arith.addf %61, %67 : vector<64x256xf32>
    %69 = vector.extract_strided_slice %38 {offsets = [0, 3], sizes = [64, 1], strides = [1, 1]} : vector<64x9xf32> to vector<64x1xf32>
    %70 = vector.broadcast %69 : vector<64x1xf32> to vector<64x256xf32>
    %71 = arith.mulf %43, %70 : vector<64x256xf32>
    %72 = arith.addf %68, %71 : vector<64x256xf32>
    %73 = vector.extract_strided_slice %38 {offsets = [0, 4], sizes = [64, 1], strides = [1, 1]} : vector<64x9xf32> to vector<64x1xf32>
    %74 = vector.broadcast %73 : vector<64x1xf32> to vector<64x256xf32>
    %75 = arith.mulf %37, %74 : vector<64x256xf32>
    %76 = arith.addf %72, %75 : vector<64x256xf32>
    %77 = vector.extract_strided_slice %38 {offsets = [0, 5], sizes = [64, 1], strides = [1, 1]} : vector<64x9xf32> to vector<64x1xf32>
    %78 = vector.broadcast %77 : vector<64x1xf32> to vector<64x256xf32>
    %79 = arith.mulf %48, %78 : vector<64x256xf32>
    %80 = arith.addf %76, %79 : vector<64x256xf32>
    %cst_21 = arith.constant 0.000000e+00 : f32
    %81 = vector.broadcast %cst_21 : f32 to vector<64x16xf32>
    %82 = vector.extract_strided_slice %43 {offsets = [0, 16], sizes = [64, 240], strides = [1, 1]} : vector<64x256xf32> to vector<64x240xf32>
    %83 = tpu.concatenate %82, %81 in 1 : vector<64x240xf32>, vector<64x16xf32> -> vector<64x256xf32>
    %84 = vector.extract_strided_slice %38 {offsets = [0, 6], sizes = [64, 1], strides = [1, 1]} : vector<64x9xf32> to vector<64x1xf32>
    %85 = vector.broadcast %84 : vector<64x1xf32> to vector<64x256xf32>
    %86 = arith.mulf %83, %85 : vector<64x256xf32>
    %87 = arith.addf %80, %86 : vector<64x256xf32>
    %cst_22 = arith.constant 0.000000e+00 : f32
    %88 = vector.broadcast %cst_22 : f32 to vector<64x16xf32>
    %89 = vector.extract_strided_slice %37 {offsets = [0, 16], sizes = [64, 240], strides = [1, 1]} : vector<64x256xf32> to vector<64x240xf32>
    %90 = tpu.concatenate %89, %88 in 1 : vector<64x240xf32>, vector<64x16xf32> -> vector<64x256xf32>
    %91 = vector.extract_strided_slice %38 {offsets = [0, 7], sizes = [64, 1], strides = [1, 1]} : vector<64x9xf32> to vector<64x1xf32>
    %92 = vector.broadcast %91 : vector<64x1xf32> to vector<64x256xf32>
    %93 = arith.mulf %90, %92 : vector<64x256xf32>
    %94 = arith.addf %87, %93 : vector<64x256xf32>
    %cst_23 = arith.constant 0.000000e+00 : f32
    %95 = vector.broadcast %cst_23 : f32 to vector<64x16xf32>
    %96 = vector.extract_strided_slice %48 {offsets = [0, 16], sizes = [64, 240], strides = [1, 1]} : vector<64x256xf32> to vector<64x240xf32>
    %97 = tpu.concatenate %96, %95 in 1 : vector<64x240xf32>, vector<64x16xf32> -> vector<64x256xf32>
    %98 = vector.extract_strided_slice %38 {offsets = [0, 8], sizes = [64, 1], strides = [1, 1]} : vector<64x9xf32> to vector<64x1xf32>
    %99 = vector.broadcast %98 : vector<64x1xf32> to vector<64x256xf32>
    %100 = arith.mulf %97, %99 : vector<64x256xf32>
    %101 = arith.addf %94, %100 : vector<64x256xf32>
    %c0_24 = arith.constant 0 : index
    %c0_25 = arith.constant 0 : index
    %102 = vector.load %arg6[%c0_24, %c0_25] : memref<64x1xf32, #tpu.memory_space<vmem>>, vector<64x1xf32>
    %103 = vector.broadcast %102 : vector<64x1xf32> to vector<64x256xf32>
    %104 = arith.addf %101, %103 : vector<64x256xf32>
    %cst_26 = arith.constant 0.000000e+00 : f32
    %105 = vector.broadcast %cst_26 : f32 to vector<64x256xf32>
    %106 = arith.maximumf %104, %105 : vector<64x256xf32>
    %107 = vector.extract_strided_slice %106 {offsets = [0, 0], sizes = [16, 256], strides = [1, 1]} : vector<64x256xf32> to vector<16x256xf32>
    %108 = vector.extract_strided_slice %106 {offsets = [16, 0], sizes = [48, 256], strides = [1, 1]} : vector<64x256xf32> to vector<48x256xf32>
    %c0_27 = arith.constant 0 : index
    %c0_28 = arith.constant 0 : index
    %109 = vector.load %arg7[%c0_27, %c0_28] : memref<48x48xbf16, #tpu.memory_space<vmem>>, vector<48x48xbf16>
    %110 = arith.truncf %108 : vector<48x256xf32> to vector<48x256xbf16>
    %cst_29 = arith.constant dense<0.000000e+00> : vector<48x256xf32>
    %111 = tpu.matmul %109, %110, %cst_29 {dimension_numbers = #tpu.dot_dimension_numbers<[1], [0], [0], [1], [0, 0, 1, 1], [], []>} : vector<48x48xbf16>, vector<48x256xbf16>, vector<48x256xf32> -> vector<48x256xf32>
    %c0_30 = arith.constant 0 : index
    %c0_31 = arith.constant 0 : index
    %112 = vector.load %arg8[%c0_30, %c0_31] : memref<48x9xf32, #tpu.memory_space<vmem>>, vector<48x9xf32>
    %cst_32 = arith.constant 0.000000e+00 : f32
    %113 = vector.broadcast %cst_32 : f32 to vector<48x1xf32>
    %114 = vector.extract_strided_slice %111 {offsets = [0, 0], sizes = [48, 255], strides = [1, 1]} : vector<48x256xf32> to vector<48x255xf32>
    %115 = tpu.concatenate %113, %114 in 1 : vector<48x1xf32>, vector<48x255xf32> -> vector<48x256xf32>
    %116 = vector.broadcast %30 : vector<1x256xf32> to vector<48x256xf32>
    %117 = arith.mulf %115, %116 : vector<48x256xf32>
    %cst_33 = arith.constant 0.000000e+00 : f32
    %118 = vector.broadcast %cst_33 : f32 to vector<48x1xf32>
    %119 = vector.extract_strided_slice %111 {offsets = [0, 1], sizes = [48, 255], strides = [1, 1]} : vector<48x256xf32> to vector<48x255xf32>
    %120 = tpu.concatenate %119, %118 in 1 : vector<48x255xf32>, vector<48x1xf32> -> vector<48x256xf32>
    %121 = vector.broadcast %34 : vector<1x256xf32> to vector<48x256xf32>
    %122 = arith.mulf %120, %121 : vector<48x256xf32>
    %cst_34 = arith.constant 0.000000e+00 : f32
    %123 = vector.broadcast %cst_34 : f32 to vector<48x16xf32>
    %124 = vector.extract_strided_slice %117 {offsets = [0, 0], sizes = [48, 240], strides = [1, 1]} : vector<48x256xf32> to vector<48x240xf32>
    %125 = tpu.concatenate %123, %124 in 1 : vector<48x16xf32>, vector<48x240xf32> -> vector<48x256xf32>
    %126 = vector.extract_strided_slice %112 {offsets = [0, 0], sizes = [48, 1], strides = [1, 1]} : vector<48x9xf32> to vector<48x1xf32>
    %127 = vector.broadcast %126 : vector<48x1xf32> to vector<48x256xf32>
    %128 = arith.mulf %125, %127 : vector<48x256xf32>
    %cst_35 = arith.constant 0.000000e+00 : f32
    %129 = vector.broadcast %cst_35 : f32 to vector<48x16xf32>
    %130 = vector.extract_strided_slice %111 {offsets = [0, 0], sizes = [48, 240], strides = [1, 1]} : vector<48x256xf32> to vector<48x240xf32>
    %131 = tpu.concatenate %129, %130 in 1 : vector<48x16xf32>, vector<48x240xf32> -> vector<48x256xf32>
    %132 = vector.extract_strided_slice %112 {offsets = [0, 1], sizes = [48, 1], strides = [1, 1]} : vector<48x9xf32> to vector<48x1xf32>
    %133 = vector.broadcast %132 : vector<48x1xf32> to vector<48x256xf32>
    %134 = arith.mulf %131, %133 : vector<48x256xf32>
    %135 = arith.addf %128, %134 : vector<48x256xf32>
    %cst_36 = arith.constant 0.000000e+00 : f32
    %136 = vector.broadcast %cst_36 : f32 to vector<48x16xf32>
    %137 = vector.extract_strided_slice %122 {offsets = [0, 0], sizes = [48, 240], strides = [1, 1]} : vector<48x256xf32> to vector<48x240xf32>
    %138 = tpu.concatenate %136, %137 in 1 : vector<48x16xf32>, vector<48x240xf32> -> vector<48x256xf32>
    %139 = vector.extract_strided_slice %112 {offsets = [0, 2], sizes = [48, 1], strides = [1, 1]} : vector<48x9xf32> to vector<48x1xf32>
    %140 = vector.broadcast %139 : vector<48x1xf32> to vector<48x256xf32>
    %141 = arith.mulf %138, %140 : vector<48x256xf32>
    %142 = arith.addf %135, %141 : vector<48x256xf32>
    %143 = vector.extract_strided_slice %112 {offsets = [0, 3], sizes = [48, 1], strides = [1, 1]} : vector<48x9xf32> to vector<48x1xf32>
    %144 = vector.broadcast %143 : vector<48x1xf32> to vector<48x256xf32>
    %145 = arith.mulf %117, %144 : vector<48x256xf32>
    %146 = arith.addf %142, %145 : vector<48x256xf32>
    %147 = vector.extract_strided_slice %112 {offsets = [0, 4], sizes = [48, 1], strides = [1, 1]} : vector<48x9xf32> to vector<48x1xf32>
    %148 = vector.broadcast %147 : vector<48x1xf32> to vector<48x256xf32>
    %149 = arith.mulf %111, %148 : vector<48x256xf32>
    %150 = arith.addf %146, %149 : vector<48x256xf32>
    %151 = vector.extract_strided_slice %112 {offsets = [0, 5], sizes = [48, 1], strides = [1, 1]} : vector<48x9xf32> to vector<48x1xf32>
    %152 = vector.broadcast %151 : vector<48x1xf32> to vector<48x256xf32>
    %153 = arith.mulf %122, %152 : vector<48x256xf32>
    %154 = arith.addf %150, %153 : vector<48x256xf32>
    %cst_37 = arith.constant 0.000000e+00 : f32
    %155 = vector.broadcast %cst_37 : f32 to vector<48x16xf32>
    %156 = vector.extract_strided_slice %117 {offsets = [0, 16], sizes = [48, 240], strides = [1, 1]} : vector<48x256xf32> to vector<48x240xf32>
    %157 = tpu.concatenate %156, %155 in 1 : vector<48x240xf32>, vector<48x16xf32> -> vector<48x256xf32>
    %158 = vector.extract_strided_slice %112 {offsets = [0, 6], sizes = [48, 1], strides = [1, 1]} : vector<48x9xf32> to vector<48x1xf32>
    %159 = vector.broadcast %158 : vector<48x1xf32> to vector<48x256xf32>
    %160 = arith.mulf %157, %159 : vector<48x256xf32>
    %161 = arith.addf %154, %160 : vector<48x256xf32>
    %cst_38 = arith.constant 0.000000e+00 : f32
    %162 = vector.broadcast %cst_38 : f32 to vector<48x16xf32>
    %163 = vector.extract_strided_slice %111 {offsets = [0, 16], sizes = [48, 240], strides = [1, 1]} : vector<48x256xf32> to vector<48x240xf32>
    %164 = tpu.concatenate %163, %162 in 1 : vector<48x240xf32>, vector<48x16xf32> -> vector<48x256xf32>
    %165 = vector.extract_strided_slice %112 {offsets = [0, 7], sizes = [48, 1], strides = [1, 1]} : vector<48x9xf32> to vector<48x1xf32>
    %166 = vector.broadcast %165 : vector<48x1xf32> to vector<48x256xf32>
    %167 = arith.mulf %164, %166 : vector<48x256xf32>
    %168 = arith.addf %161, %167 : vector<48x256xf32>
    %cst_39 = arith.constant 0.000000e+00 : f32
    %169 = vector.broadcast %cst_39 : f32 to vector<48x16xf32>
    %170 = vector.extract_strided_slice %122 {offsets = [0, 16], sizes = [48, 240], strides = [1, 1]} : vector<48x256xf32> to vector<48x240xf32>
    %171 = tpu.concatenate %170, %169 in 1 : vector<48x240xf32>, vector<48x16xf32> -> vector<48x256xf32>
    %172 = vector.extract_strided_slice %112 {offsets = [0, 8], sizes = [48, 1], strides = [1, 1]} : vector<48x9xf32> to vector<48x1xf32>
    %173 = vector.broadcast %172 : vector<48x1xf32> to vector<48x256xf32>
    %174 = arith.mulf %171, %173 : vector<48x256xf32>
    %175 = arith.addf %168, %174 : vector<48x256xf32>
    %c0_40 = arith.constant 0 : index
    %c0_41 = arith.constant 0 : index
    %176 = vector.load %arg9[%c0_40, %c0_41] : memref<48x1xf32, #tpu.memory_space<vmem>>, vector<48x1xf32>
    %177 = vector.broadcast %176 : vector<48x1xf32> to vector<48x256xf32>
    %178 = arith.addf %175, %177 : vector<48x256xf32>
    %cst_42 = arith.constant 0.000000e+00 : f32
    %179 = vector.broadcast %cst_42 : f32 to vector<48x256xf32>
    %180 = arith.maximumf %178, %179 : vector<48x256xf32>
    %181 = vector.extract_strided_slice %180 {offsets = [0, 0], sizes = [16, 256], strides = [1, 1]} : vector<48x256xf32> to vector<16x256xf32>
    %182 = vector.extract_strided_slice %180 {offsets = [16, 0], sizes = [32, 256], strides = [1, 1]} : vector<48x256xf32> to vector<32x256xf32>
    %c0_43 = arith.constant 0 : index
    %c0_44 = arith.constant 0 : index
    %183 = vector.load %arg10[%c0_43, %c0_44] : memref<32x32xbf16, #tpu.memory_space<vmem>>, vector<32x32xbf16>
    %184 = arith.truncf %182 : vector<32x256xf32> to vector<32x256xbf16>
    %cst_45 = arith.constant dense<0.000000e+00> : vector<32x256xf32>
    %185 = tpu.matmul %183, %184, %cst_45 {dimension_numbers = #tpu.dot_dimension_numbers<[1], [0], [0], [1], [0, 0, 1, 1], [], []>} : vector<32x32xbf16>, vector<32x256xbf16>, vector<32x256xf32> -> vector<32x256xf32>
    %c0_46 = arith.constant 0 : index
    %c0_47 = arith.constant 0 : index
    %186 = vector.load %arg11[%c0_46, %c0_47] : memref<32x9xf32, #tpu.memory_space<vmem>>, vector<32x9xf32>
    %cst_48 = arith.constant 0.000000e+00 : f32
    %187 = vector.broadcast %cst_48 : f32 to vector<32x1xf32>
    %188 = vector.extract_strided_slice %185 {offsets = [0, 0], sizes = [32, 255], strides = [1, 1]} : vector<32x256xf32> to vector<32x255xf32>
    %189 = tpu.concatenate %187, %188 in 1 : vector<32x1xf32>, vector<32x255xf32> -> vector<32x256xf32>
    %190 = vector.broadcast %30 : vector<1x256xf32> to vector<32x256xf32>
    %191 = arith.mulf %189, %190 : vector<32x256xf32>
    %cst_49 = arith.constant 0.000000e+00 : f32
    %192 = vector.broadcast %cst_49 : f32 to vector<32x1xf32>
    %193 = vector.extract_strided_slice %185 {offsets = [0, 1], sizes = [32, 255], strides = [1, 1]} : vector<32x256xf32> to vector<32x255xf32>
    %194 = tpu.concatenate %193, %192 in 1 : vector<32x255xf32>, vector<32x1xf32> -> vector<32x256xf32>
    %195 = vector.broadcast %34 : vector<1x256xf32> to vector<32x256xf32>
    %196 = arith.mulf %194, %195 : vector<32x256xf32>
    %cst_50 = arith.constant 0.000000e+00 : f32
    %197 = vector.broadcast %cst_50 : f32 to vector<32x16xf32>
    %198 = vector.extract_strided_slice %191 {offsets = [0, 0], sizes = [32, 240], strides = [1, 1]} : vector<32x256xf32> to vector<32x240xf32>
    %199 = tpu.concatenate %197, %198 in 1 : vector<32x16xf32>, vector<32x240xf32> -> vector<32x256xf32>
    %200 = vector.extract_strided_slice %186 {offsets = [0, 0], sizes = [32, 1], strides = [1, 1]} : vector<32x9xf32> to vector<32x1xf32>
    %201 = vector.broadcast %200 : vector<32x1xf32> to vector<32x256xf32>
    %202 = arith.mulf %199, %201 : vector<32x256xf32>
    %cst_51 = arith.constant 0.000000e+00 : f32
    %203 = vector.broadcast %cst_51 : f32 to vector<32x16xf32>
    %204 = vector.extract_strided_slice %185 {offsets = [0, 0], sizes = [32, 240], strides = [1, 1]} : vector<32x256xf32> to vector<32x240xf32>
    %205 = tpu.concatenate %203, %204 in 1 : vector<32x16xf32>, vector<32x240xf32> -> vector<32x256xf32>
    %206 = vector.extract_strided_slice %186 {offsets = [0, 1], sizes = [32, 1], strides = [1, 1]} : vector<32x9xf32> to vector<32x1xf32>
    %207 = vector.broadcast %206 : vector<32x1xf32> to vector<32x256xf32>
    %208 = arith.mulf %205, %207 : vector<32x256xf32>
    %209 = arith.addf %202, %208 : vector<32x256xf32>
    %cst_52 = arith.constant 0.000000e+00 : f32
    %210 = vector.broadcast %cst_52 : f32 to vector<32x16xf32>
    %211 = vector.extract_strided_slice %196 {offsets = [0, 0], sizes = [32, 240], strides = [1, 1]} : vector<32x256xf32> to vector<32x240xf32>
    %212 = tpu.concatenate %210, %211 in 1 : vector<32x16xf32>, vector<32x240xf32> -> vector<32x256xf32>
    %213 = vector.extract_strided_slice %186 {offsets = [0, 2], sizes = [32, 1], strides = [1, 1]} : vector<32x9xf32> to vector<32x1xf32>
    %214 = vector.broadcast %213 : vector<32x1xf32> to vector<32x256xf32>
    %215 = arith.mulf %212, %214 : vector<32x256xf32>
    %216 = arith.addf %209, %215 : vector<32x256xf32>
    %217 = vector.extract_strided_slice %186 {offsets = [0, 3], sizes = [32, 1], strides = [1, 1]} : vector<32x9xf32> to vector<32x1xf32>
    %218 = vector.broadcast %217 : vector<32x1xf32> to vector<32x256xf32>
    %219 = arith.mulf %191, %218 : vector<32x256xf32>
    %220 = arith.addf %216, %219 : vector<32x256xf32>
    %221 = vector.extract_strided_slice %186 {offsets = [0, 4], sizes = [32, 1], strides = [1, 1]} : vector<32x9xf32> to vector<32x1xf32>
    %222 = vector.broadcast %221 : vector<32x1xf32> to vector<32x256xf32>
    %223 = arith.mulf %185, %222 : vector<32x256xf32>
    %224 = arith.addf %220, %223 : vector<32x256xf32>
    %225 = vector.extract_strided_slice %186 {offsets = [0, 5], sizes = [32, 1], strides = [1, 1]} : vector<32x9xf32> to vector<32x1xf32>
    %226 = vector.broadcast %225 : vector<32x1xf32> to vector<32x256xf32>
    %227 = arith.mulf %196, %226 : vector<32x256xf32>
    %228 = arith.addf %224, %227 : vector<32x256xf32>
    %cst_53 = arith.constant 0.000000e+00 : f32
    %229 = vector.broadcast %cst_53 : f32 to vector<32x16xf32>
    %230 = vector.extract_strided_slice %191 {offsets = [0, 16], sizes = [32, 240], strides = [1, 1]} : vector<32x256xf32> to vector<32x240xf32>
    %231 = tpu.concatenate %230, %229 in 1 : vector<32x240xf32>, vector<32x16xf32> -> vector<32x256xf32>
    %232 = vector.extract_strided_slice %186 {offsets = [0, 6], sizes = [32, 1], strides = [1, 1]} : vector<32x9xf32> to vector<32x1xf32>
    %233 = vector.broadcast %232 : vector<32x1xf32> to vector<32x256xf32>
    %234 = arith.mulf %231, %233 : vector<32x256xf32>
    %235 = arith.addf %228, %234 : vector<32x256xf32>
    %cst_54 = arith.constant 0.000000e+00 : f32
    %236 = vector.broadcast %cst_54 : f32 to vector<32x16xf32>
    %237 = vector.extract_strided_slice %185 {offsets = [0, 16], sizes = [32, 240], strides = [1, 1]} : vector<32x256xf32> to vector<32x240xf32>
    %238 = tpu.concatenate %237, %236 in 1 : vector<32x240xf32>, vector<32x16xf32> -> vector<32x256xf32>
    %239 = vector.extract_strided_slice %186 {offsets = [0, 7], sizes = [32, 1], strides = [1, 1]} : vector<32x9xf32> to vector<32x1xf32>
    %240 = vector.broadcast %239 : vector<32x1xf32> to vector<32x256xf32>
    %241 = arith.mulf %238, %240 : vector<32x256xf32>
    %242 = arith.addf %235, %241 : vector<32x256xf32>
    %cst_55 = arith.constant 0.000000e+00 : f32
    %243 = vector.broadcast %cst_55 : f32 to vector<32x16xf32>
    %244 = vector.extract_strided_slice %196 {offsets = [0, 16], sizes = [32, 240], strides = [1, 1]} : vector<32x256xf32> to vector<32x240xf32>
    %245 = tpu.concatenate %244, %243 in 1 : vector<32x240xf32>, vector<32x16xf32> -> vector<32x256xf32>
    %246 = vector.extract_strided_slice %186 {offsets = [0, 8], sizes = [32, 1], strides = [1, 1]} : vector<32x9xf32> to vector<32x1xf32>
    %247 = vector.broadcast %246 : vector<32x1xf32> to vector<32x256xf32>
    %248 = arith.mulf %245, %247 : vector<32x256xf32>
    %249 = arith.addf %242, %248 : vector<32x256xf32>
    %c0_56 = arith.constant 0 : index
    %c0_57 = arith.constant 0 : index
    %250 = vector.load %arg12[%c0_56, %c0_57] : memref<32x1xf32, #tpu.memory_space<vmem>>, vector<32x1xf32>
    %251 = vector.broadcast %250 : vector<32x1xf32> to vector<32x256xf32>
    %252 = arith.addf %249, %251 : vector<32x256xf32>
    %cst_58 = arith.constant 0.000000e+00 : f32
    %253 = vector.broadcast %cst_58 : f32 to vector<32x256xf32>
    %254 = arith.maximumf %252, %253 : vector<32x256xf32>
    %255 = vector.extract_strided_slice %254 {offsets = [0, 0], sizes = [16, 256], strides = [1, 1]} : vector<32x256xf32> to vector<16x256xf32>
    %256 = vector.extract_strided_slice %254 {offsets = [16, 0], sizes = [16, 256], strides = [1, 1]} : vector<32x256xf32> to vector<16x256xf32>
    %c0_59 = arith.constant 0 : index
    %c0_60 = arith.constant 0 : index
    %257 = vector.load %arg13[%c0_59, %c0_60] : memref<16x16xbf16, #tpu.memory_space<vmem>>, vector<16x16xbf16>
    %258 = arith.truncf %256 : vector<16x256xf32> to vector<16x256xbf16>
    %cst_61 = arith.constant dense<0.000000e+00> : vector<16x256xf32>
    %259 = tpu.matmul %257, %258, %cst_61 {dimension_numbers = #tpu.dot_dimension_numbers<[1], [0], [0], [1], [0, 0, 1, 1], [], []>} : vector<16x16xbf16>, vector<16x256xbf16>, vector<16x256xf32> -> vector<16x256xf32>
    %c0_62 = arith.constant 0 : index
    %c0_63 = arith.constant 0 : index
    %260 = vector.load %arg14[%c0_62, %c0_63] : memref<16x9xf32, #tpu.memory_space<vmem>>, vector<16x9xf32>
    %cst_64 = arith.constant 0.000000e+00 : f32
    %261 = vector.broadcast %cst_64 : f32 to vector<16x1xf32>
    %262 = vector.extract_strided_slice %259 {offsets = [0, 0], sizes = [16, 255], strides = [1, 1]} : vector<16x256xf32> to vector<16x255xf32>
    %263 = tpu.concatenate %261, %262 in 1 : vector<16x1xf32>, vector<16x255xf32> -> vector<16x256xf32>
    %264 = vector.broadcast %30 : vector<1x256xf32> to vector<16x256xf32>
    %265 = arith.mulf %263, %264 : vector<16x256xf32>
    %cst_65 = arith.constant 0.000000e+00 : f32
    %266 = vector.broadcast %cst_65 : f32 to vector<16x1xf32>
    %267 = vector.extract_strided_slice %259 {offsets = [0, 1], sizes = [16, 255], strides = [1, 1]} : vector<16x256xf32> to vector<16x255xf32>
    %268 = tpu.concatenate %267, %266 in 1 : vector<16x255xf32>, vector<16x1xf32> -> vector<16x256xf32>
    %269 = vector.broadcast %34 : vector<1x256xf32> to vector<16x256xf32>
    %270 = arith.mulf %268, %269 : vector<16x256xf32>
    %cst_66 = arith.constant 0.000000e+00 : f32
    %271 = vector.broadcast %cst_66 : f32 to vector<16x16xf32>
    %272 = vector.extract_strided_slice %265 {offsets = [0, 0], sizes = [16, 240], strides = [1, 1]} : vector<16x256xf32> to vector<16x240xf32>
    %273 = tpu.concatenate %271, %272 in 1 : vector<16x16xf32>, vector<16x240xf32> -> vector<16x256xf32>
    %274 = vector.extract_strided_slice %260 {offsets = [0, 0], sizes = [16, 1], strides = [1, 1]} : vector<16x9xf32> to vector<16x1xf32>
    %275 = vector.broadcast %274 : vector<16x1xf32> to vector<16x256xf32>
    %276 = arith.mulf %273, %275 : vector<16x256xf32>
    %cst_67 = arith.constant 0.000000e+00 : f32
    %277 = vector.broadcast %cst_67 : f32 to vector<16x16xf32>
    %278 = vector.extract_strided_slice %259 {offsets = [0, 0], sizes = [16, 240], strides = [1, 1]} : vector<16x256xf32> to vector<16x240xf32>
    %279 = tpu.concatenate %277, %278 in 1 : vector<16x16xf32>, vector<16x240xf32> -> vector<16x256xf32>
    %280 = vector.extract_strided_slice %260 {offsets = [0, 1], sizes = [16, 1], strides = [1, 1]} : vector<16x9xf32> to vector<16x1xf32>
    %281 = vector.broadcast %280 : vector<16x1xf32> to vector<16x256xf32>
    %282 = arith.mulf %279, %281 : vector<16x256xf32>
    %283 = arith.addf %276, %282 : vector<16x256xf32>
    %cst_68 = arith.constant 0.000000e+00 : f32
    %284 = vector.broadcast %cst_68 : f32 to vector<16x16xf32>
    %285 = vector.extract_strided_slice %270 {offsets = [0, 0], sizes = [16, 240], strides = [1, 1]} : vector<16x256xf32> to vector<16x240xf32>
    %286 = tpu.concatenate %284, %285 in 1 : vector<16x16xf32>, vector<16x240xf32> -> vector<16x256xf32>
    %287 = vector.extract_strided_slice %260 {offsets = [0, 2], sizes = [16, 1], strides = [1, 1]} : vector<16x9xf32> to vector<16x1xf32>
    %288 = vector.broadcast %287 : vector<16x1xf32> to vector<16x256xf32>
    %289 = arith.mulf %286, %288 : vector<16x256xf32>
    %290 = arith.addf %283, %289 : vector<16x256xf32>
    %291 = vector.extract_strided_slice %260 {offsets = [0, 3], sizes = [16, 1], strides = [1, 1]} : vector<16x9xf32> to vector<16x1xf32>
    %292 = vector.broadcast %291 : vector<16x1xf32> to vector<16x256xf32>
    %293 = arith.mulf %265, %292 : vector<16x256xf32>
    %294 = arith.addf %290, %293 : vector<16x256xf32>
    %295 = vector.extract_strided_slice %260 {offsets = [0, 4], sizes = [16, 1], strides = [1, 1]} : vector<16x9xf32> to vector<16x1xf32>
    %296 = vector.broadcast %295 : vector<16x1xf32> to vector<16x256xf32>
    %297 = arith.mulf %259, %296 : vector<16x256xf32>
    %298 = arith.addf %294, %297 : vector<16x256xf32>
    %299 = vector.extract_strided_slice %260 {offsets = [0, 5], sizes = [16, 1], strides = [1, 1]} : vector<16x9xf32> to vector<16x1xf32>
    %300 = vector.broadcast %299 : vector<16x1xf32> to vector<16x256xf32>
    %301 = arith.mulf %270, %300 : vector<16x256xf32>
    %302 = arith.addf %298, %301 : vector<16x256xf32>
    %cst_69 = arith.constant 0.000000e+00 : f32
    %303 = vector.broadcast %cst_69 : f32 to vector<16x16xf32>
    %304 = vector.extract_strided_slice %265 {offsets = [0, 16], sizes = [16, 240], strides = [1, 1]} : vector<16x256xf32> to vector<16x240xf32>
    %305 = tpu.concatenate %304, %303 in 1 : vector<16x240xf32>, vector<16x16xf32> -> vector<16x256xf32>
    %306 = vector.extract_strided_slice %260 {offsets = [0, 6], sizes = [16, 1], strides = [1, 1]} : vector<16x9xf32> to vector<16x1xf32>
    %307 = vector.broadcast %306 : vector<16x1xf32> to vector<16x256xf32>
    %308 = arith.mulf %305, %307 : vector<16x256xf32>
    %309 = arith.addf %302, %308 : vector<16x256xf32>
    %cst_70 = arith.constant 0.000000e+00 : f32
    %310 = vector.broadcast %cst_70 : f32 to vector<16x16xf32>
    %311 = vector.extract_strided_slice %259 {offsets = [0, 16], sizes = [16, 240], strides = [1, 1]} : vector<16x256xf32> to vector<16x240xf32>
    %312 = tpu.concatenate %311, %310 in 1 : vector<16x240xf32>, vector<16x16xf32> -> vector<16x256xf32>
    %313 = vector.extract_strided_slice %260 {offsets = [0, 7], sizes = [16, 1], strides = [1, 1]} : vector<16x9xf32> to vector<16x1xf32>
    %314 = vector.broadcast %313 : vector<16x1xf32> to vector<16x256xf32>
    %315 = arith.mulf %312, %314 : vector<16x256xf32>
    %316 = arith.addf %309, %315 : vector<16x256xf32>
    %cst_71 = arith.constant 0.000000e+00 : f32
    %317 = vector.broadcast %cst_71 : f32 to vector<16x16xf32>
    %318 = vector.extract_strided_slice %270 {offsets = [0, 16], sizes = [16, 240], strides = [1, 1]} : vector<16x256xf32> to vector<16x240xf32>
    %319 = tpu.concatenate %318, %317 in 1 : vector<16x240xf32>, vector<16x16xf32> -> vector<16x256xf32>
    %320 = vector.extract_strided_slice %260 {offsets = [0, 8], sizes = [16, 1], strides = [1, 1]} : vector<16x9xf32> to vector<16x1xf32>
    %321 = vector.broadcast %320 : vector<16x1xf32> to vector<16x256xf32>
    %322 = arith.mulf %319, %321 : vector<16x256xf32>
    %323 = arith.addf %316, %322 : vector<16x256xf32>
    %c0_72 = arith.constant 0 : index
    %c0_73 = arith.constant 0 : index
    %324 = vector.load %arg15[%c0_72, %c0_73] : memref<16x1xf32, #tpu.memory_space<vmem>>, vector<16x1xf32>
    %325 = vector.broadcast %324 : vector<16x1xf32> to vector<16x256xf32>
    %326 = arith.addf %323, %325 : vector<16x256xf32>
    %cst_74 = arith.constant 0.000000e+00 : f32
    %327 = vector.broadcast %cst_74 : f32 to vector<16x256xf32>
    %328 = arith.maximumf %326, %327 : vector<16x256xf32>
    %cst_75 = arith.constant dense<0.000000e+00> : vector<16xf32>
    %329 = vector.multi_reduction <add>, %107, %cst_75 [1] : vector<16x256xf32> to vector<16xf32>
    %330 = vector.shape_cast %329 : vector<16xf32> to vector<16x1xf32>
    %cst_76 = arith.constant 3.906250e-03 : f32
    %331 = vector.broadcast %cst_76 : f32 to vector<16x1xf32>
    %332 = arith.mulf %330, %331 : vector<16x1xf32>
    %cst_77 = arith.constant dense<0.000000e+00> : vector<16xf32>
    %333 = vector.multi_reduction <add>, %181, %cst_77 [1] : vector<16x256xf32> to vector<16xf32>
    %334 = vector.shape_cast %333 : vector<16xf32> to vector<16x1xf32>
    %cst_78 = arith.constant 3.906250e-03 : f32
    %335 = vector.broadcast %cst_78 : f32 to vector<16x1xf32>
    %336 = arith.mulf %334, %335 : vector<16x1xf32>
    %cst_79 = arith.constant dense<0.000000e+00> : vector<16xf32>
    %337 = vector.multi_reduction <add>, %255, %cst_79 [1] : vector<16x256xf32> to vector<16xf32>
    %338 = vector.shape_cast %337 : vector<16xf32> to vector<16x1xf32>
    %cst_80 = arith.constant 3.906250e-03 : f32
    %339 = vector.broadcast %cst_80 : f32 to vector<16x1xf32>
    %340 = arith.mulf %338, %339 : vector<16x1xf32>
    %cst_81 = arith.constant dense<0.000000e+00> : vector<16xf32>
    %341 = vector.multi_reduction <add>, %328, %cst_81 [1] : vector<16x256xf32> to vector<16xf32>
    %342 = vector.shape_cast %341 : vector<16xf32> to vector<16x1xf32>
    %cst_82 = arith.constant 3.906250e-03 : f32
    %343 = vector.broadcast %cst_82 : f32 to vector<16x1xf32>
    %344 = arith.mulf %342, %343 : vector<16x1xf32>
    %345 = tpu.concatenate %332, %336, %340, %344 in 1 : vector<16x1xf32>, vector<16x1xf32>, vector<16x1xf32>, vector<16x1xf32> -> vector<16x4xf32>
    %c0_83 = arith.constant 0 : index
    %c0_84 = arith.constant 0 : index
    %346 = vector.load %arg16[%c0_83, %c0_84] : memref<1x16xf32, #tpu.memory_space<vmem>>, vector<1x16xf32>
    %cst_85 = arith.constant dense<0.000000e+00> : vector<1x4xf32>
    %347 = tpu.matmul %346, %345, %cst_85 {dimension_numbers = #tpu.dot_dimension_numbers<[1], [0], [0], [1], [0, 0, 1, 1], [], []>} : vector<1x16xf32>, vector<16x4xf32>, vector<1x4xf32> -> vector<1x4xf32>
    %c0_86 = arith.constant 0 : index
    %c0_87 = arith.constant 0 : index
    %348 = vector.load %arg17[%c0_86, %c0_87] : memref<1x1xf32, #tpu.memory_space<vmem>>, vector<1x1xf32>
    %349 = vector.broadcast %348 : vector<1x1xf32> to vector<1x4xf32>
    %350 = arith.addf %347, %349 : vector<1x4xf32>
    %cst_88 = arith.constant 0.000000e+00 : f32
    %351 = vector.broadcast %cst_88 : f32 to vector<1x4xf32>
    %352 = arith.maximumf %350, %351 : vector<1x4xf32>
    %c0_89 = arith.constant 0 : index
    %c0_90 = arith.constant 0 : index
    %353 = vector.load %arg18[%c0_89, %c0_90] : memref<16x1xf32, #tpu.memory_space<vmem>>, vector<16x1xf32>
    %cst_91 = arith.constant dense<0.000000e+00> : vector<16x4xf32>
    %354 = tpu.matmul %353, %352, %cst_91 {dimension_numbers = #tpu.dot_dimension_numbers<[1], [0], [0], [1], [0, 0, 1, 1], [], []>} : vector<16x1xf32>, vector<1x4xf32>, vector<16x4xf32> -> vector<16x4xf32>
    %c0_92 = arith.constant 0 : index
    %c0_93 = arith.constant 0 : index
    %355 = vector.load %arg19[%c0_92, %c0_93] : memref<16x1xf32, #tpu.memory_space<vmem>>, vector<16x1xf32>
    %356 = vector.broadcast %355 : vector<16x1xf32> to vector<16x4xf32>
    %357 = arith.addf %354, %356 : vector<16x4xf32>
    %cst_94 = arith.constant 0.000000e+00 : f32
    %358 = vector.broadcast %cst_94 : f32 to vector<16x4xf32>
    %359 = arith.subf %358, %357 : vector<16x4xf32>
    %360 = math.exp %359 : vector<16x4xf32>
    %cst_95 = arith.constant 1.000000e+00 : f32
    %361 = vector.broadcast %cst_95 : f32 to vector<16x4xf32>
    %362 = arith.addf %361, %360 : vector<16x4xf32>
    %cst_96 = arith.constant 1.000000e+00 : f32
    %363 = vector.broadcast %cst_96 : f32 to vector<16x4xf32>
    %364 = arith.divf %363, %362 : vector<16x4xf32>
    %365 = vector.extract_strided_slice %364 {offsets = [0, 0], sizes = [16, 1], strides = [1, 1]} : vector<16x4xf32> to vector<16x1xf32>
    %366 = vector.broadcast %365 : vector<16x1xf32> to vector<16x256xf32>
    %367 = arith.mulf %107, %366 : vector<16x256xf32>
    %368 = vector.extract_strided_slice %364 {offsets = [0, 1], sizes = [16, 1], strides = [1, 1]} : vector<16x4xf32> to vector<16x1xf32>
    %369 = vector.broadcast %368 : vector<16x1xf32> to vector<16x256xf32>
    %370 = arith.mulf %181, %369 : vector<16x256xf32>
    %371 = arith.addf %367, %370 : vector<16x256xf32>
    %372 = vector.extract_strided_slice %364 {offsets = [0, 2], sizes = [16, 1], strides = [1, 1]} : vector<16x4xf32> to vector<16x1xf32>
    %373 = vector.broadcast %372 : vector<16x1xf32> to vector<16x256xf32>
    %374 = arith.mulf %255, %373 : vector<16x256xf32>
    %375 = arith.addf %371, %374 : vector<16x256xf32>
    %376 = vector.extract_strided_slice %364 {offsets = [0, 3], sizes = [16, 1], strides = [1, 1]} : vector<16x4xf32> to vector<16x1xf32>
    %377 = vector.broadcast %376 : vector<16x1xf32> to vector<16x256xf32>
    %378 = arith.mulf %328, %377 : vector<16x256xf32>
    %379 = arith.addf %375, %378 : vector<16x256xf32>
    %c0_97 = arith.constant 0 : index
    %c0_98 = arith.constant 0 : index
    %380 = vector.load %arg20[%c0_97, %c0_98] : memref<64x16xbf16, #tpu.memory_space<vmem>>, vector<64x16xbf16>
    %381 = arith.truncf %379 : vector<16x256xf32> to vector<16x256xbf16>
    %cst_99 = arith.constant dense<0.000000e+00> : vector<64x256xf32>
    %382 = tpu.matmul %380, %381, %cst_99 {dimension_numbers = #tpu.dot_dimension_numbers<[1], [0], [0], [1], [0, 0, 1, 1], [], []>} : vector<64x16xbf16>, vector<16x256xbf16>, vector<64x256xf32> -> vector<64x256xf32>
    %c0_100 = arith.constant 0 : index
    %c0_101 = arith.constant 0 : index
    %383 = vector.load %arg21[%c0_100, %c0_101] : memref<64x1xf32, #tpu.memory_space<vmem>>, vector<64x1xf32>
    %384 = vector.broadcast %383 : vector<64x1xf32> to vector<64x256xf32>
    %385 = arith.addf %382, %384 : vector<64x256xf32>
    %c0_102 = arith.constant 0 : index
    %c0_103 = arith.constant 0 : index
    %386 = vector.load %arg22[%c0_102, %c0_103] : memref<64x32xbf16, #tpu.memory_space<vmem>>, vector<64x32xbf16>
    %387 = arith.truncf %1 : vector<32x256xf32> to vector<32x256xbf16>
    %cst_104 = arith.constant dense<0.000000e+00> : vector<64x256xf32>
    %388 = tpu.matmul %386, %387, %cst_104 {dimension_numbers = #tpu.dot_dimension_numbers<[1], [0], [0], [1], [0, 0, 1, 1], [], []>} : vector<64x32xbf16>, vector<32x256xbf16>, vector<64x256xf32> -> vector<64x256xf32>
    %c0_105 = arith.constant 0 : index
    %c0_106 = arith.constant 0 : index
    %389 = vector.load %arg23[%c0_105, %c0_106] : memref<64x1xf32, #tpu.memory_space<vmem>>, vector<64x1xf32>
    %390 = vector.broadcast %389 : vector<64x1xf32> to vector<64x256xf32>
    %391 = arith.addf %388, %390 : vector<64x256xf32>
    %392 = arith.addf %385, %391 : vector<64x256xf32>
    %cst_107 = arith.constant 0.000000e+00 : f32
    %393 = vector.broadcast %cst_107 : f32 to vector<64x256xf32>
    %394 = arith.maximumf %392, %393 : vector<64x256xf32>
    %c0_108 = arith.constant 0 : index
    %c0_109 = arith.constant 0 : index
    %c0_110 = arith.constant 0 : index
    %395 = vector.load %arg24[%c0_108, %c0_109, %c0_110] : memref<1x64x256xf32, #tpu.memory_space<vmem>>, vector<1x64x256xf32>
    %396 = vector.shape_cast %395 : vector<1x64x256xf32> to vector<64x256xf32>
    %397 = vector.shape_cast %394 : vector<64x256xf32> to vector<1x64x256xf32>
    tpu.vector_store %arg24[%c0_108, %c0_109, %c0_110], %397 {strides = array<i32>} : memref<1x64x256xf32, #tpu.memory_space<vmem>>, vector<1x64x256xf32>,
    return
  }
  func.func @transform_0(%arg0: i32) -> (i32, i32, i32) {
    %c0_i32 = arith.constant 0 : i32
    %c0_i32_0 = arith.constant 0 : i32
    %c0_i32_1 = arith.constant 0 : i32
    return %arg0, %c0_i32, %c0_i32_0 : i32, i32, i32
  }
  func.func @transform_1(%arg0: i32) -> (i32, i32) {
    %c0_i32 = arith.constant 0 : i32
    %c0_i32_0 = arith.constant 0 : i32
    %c0_i32_1 = arith.constant 0 : i32
    return %c0_i32, %c0_i32_0 : i32, i32
  }
  func.func @transform_2(%arg0: i32) -> (i32, i32) {
    %c0_i32 = arith.constant 0 : i32
    %c0_i32_0 = arith.constant 0 : i32
    %c0_i32_1 = arith.constant 0 : i32
    return %c0_i32, %c0_i32_0 : i32, i32
  }
  func.func @transform_3(%arg0: i32) -> (i32, i32) {
    %c0_i32 = arith.constant 0 : i32
    %c0_i32_0 = arith.constant 0 : i32
    %c0_i32_1 = arith.constant 0 : i32
    return %c0_i32, %c0_i32_0 : i32, i32
  }
  func.func @transform_4(%arg0: i32) -> (i32, i32) {
    %c0_i32 = arith.constant 0 : i32
    %c0_i32_0 = arith.constant 0 : i32
    %c0_i32_1 = arith.constant 0 : i32
    return %c0_i32, %c0_i32_0 : i32, i32
  }
  func.func @transform_5(%arg0: i32) -> (i32, i32) {
    %c0_i32 = arith.constant 0 : i32
    %c0_i32_0 = arith.constant 0 : i32
    %c0_i32_1 = arith.constant 0 : i32
    return %c0_i32, %c0_i32_0 : i32, i32
  }
  func.func @transform_6(%arg0: i32) -> (i32, i32) {
    %c0_i32 = arith.constant 0 : i32
    %c0_i32_0 = arith.constant 0 : i32
    %c0_i32_1 = arith.constant 0 : i32
    return %c0_i32, %c0_i32_0 : i32, i32
  }
  func.func @transform_7(%arg0: i32) -> (i32, i32) {
    %c0_i32 = arith.constant 0 : i32
    %c0_i32_0 = arith.constant 0 : i32
    %c0_i32_1 = arith.constant 0 : i32
    return %c0_i32, %c0_i32_0 : i32, i32
  }
  func.func @transform_8(%arg0: i32) -> (i32, i32) {
    %c0_i32 = arith.constant 0 : i32
    %c0_i32_0 = arith.constant 0 : i32
    %c0_i32_1 = arith.constant 0 : i32
    return %c0_i32, %c0_i32_0 : i32, i32
  }
  func.func @transform_9(%arg0: i32) -> (i32, i32) {
    %c0_i32 = arith.constant 0 : i32
    %c0_i32_0 = arith.constant 0 : i32
    %c0_i32_1 = arith.constant 0 : i32
    return %c0_i32, %c0_i32_0 : i32, i32
  }
  func.func @transform_10(%arg0: i32) -> (i32, i32) {
    %c0_i32 = arith.constant 0 : i32
    %c0_i32_0 = arith.constant 0 : i32
    %c0_i32_1 = arith.constant 0 : i32
    return %c0_i32, %c0_i32_0 : i32, i32
  }
  func.func @transform_11(%arg0: i32) -> (i32, i32) {
    %c0_i32 = arith.constant 0 : i32
    %c0_i32_0 = arith.constant 0 : i32
    %c0_i32_1 = arith.constant 0 : i32
    return %c0_i32, %c0_i32_0 : i32, i32
  }
  func.func @transform_12(%arg0: i32) -> (i32, i32) {
    %c0_i32 = arith.constant 0 : i32
    %c0_i32_0 = arith.constant 0 : i32
    %c0_i32_1 = arith.constant 0 : i32
    return %c0_i32, %c0_i32_0 : i32, i32
  }
  func.func @transform_13(%arg0: i32) -> (i32, i32) {
    %c0_i32 = arith.constant 0 : i32
    %c0_i32_0 = arith.constant 0 : i32
    %c0_i32_1 = arith.constant 0 : i32
    return %c0_i32, %c0_i32_0 : i32, i32
  }
  func.func @transform_14(%arg0: i32) -> (i32, i32) {
    %c0_i32 = arith.constant 0 : i32
    %c0_i32_0 = arith.constant 0 : i32
    %c0_i32_1 = arith.constant 0 : i32
    return %c0_i32, %c0_i32_0 : i32, i32
  }
  func.func @transform_15(%arg0: i32) -> (i32, i32) {
    %c0_i32 = arith.constant 0 : i32
    %c0_i32_0 = arith.constant 0 : i32
    %c0_i32_1 = arith.constant 0 : i32
    return %c0_i32, %c0_i32_0 : i32, i32
  }
  func.func @transform_16(%arg0: i32) -> (i32, i32) {
    %c0_i32 = arith.constant 0 : i32
    %c0_i32_0 = arith.constant 0 : i32
    %c0_i32_1 = arith.constant 0 : i32
    return %c0_i32, %c0_i32_0 : i32, i32
  }
  func.func @transform_17(%arg0: i32) -> (i32, i32) {
    %c0_i32 = arith.constant 0 : i32
    %c0_i32_0 = arith.constant 0 : i32
    %c0_i32_1 = arith.constant 0 : i32
    return %c0_i32, %c0_i32_0 : i32, i32
  }
  func.func @transform_18(%arg0: i32) -> (i32, i32) {
    %c0_i32 = arith.constant 0 : i32
    %c0_i32_0 = arith.constant 0 : i32
    %c0_i32_1 = arith.constant 0 : i32
    return %c0_i32, %c0_i32_0 : i32, i32
  }
  func.func @transform_19(%arg0: i32) -> (i32, i32) {
    %c0_i32 = arith.constant 0 : i32
    %c0_i32_0 = arith.constant 0 : i32
    %c0_i32_1 = arith.constant 0 : i32
    return %c0_i32, %c0_i32_0 : i32, i32
  }
  func.func @transform_20(%arg0: i32) -> (i32, i32) {
    %c0_i32 = arith.constant 0 : i32
    %c0_i32_0 = arith.constant 0 : i32
    %c0_i32_1 = arith.constant 0 : i32
    return %c0_i32, %c0_i32_0 : i32, i32
  }
  func.func @transform_21(%arg0: i32) -> (i32, i32) {
    %c0_i32 = arith.constant 0 : i32
    %c0_i32_0 = arith.constant 0 : i32
    %c0_i32_1 = arith.constant 0 : i32
    return %c0_i32, %c0_i32_0 : i32, i32
  }
  func.func @transform_22(%arg0: i32) -> (i32, i32) {
    %c0_i32 = arith.constant 0 : i32
    %c0_i32_0 = arith.constant 0 : i32
    %c0_i32_1 = arith.constant 0 : i32
    return %c0_i32, %c0_i32_0 : i32, i32
  }
  func.func @transform_23(%arg0: i32) -> (i32, i32, i32) {
    %c0_i32 = arith.constant 0 : i32
    %c0_i32_0 = arith.constant 0 : i32
    %c0_i32_1 = arith.constant 0 : i32
    return %arg0, %c0_i32, %c0_i32_0 : i32, i32, i32
  }
}

</mosaic_0001>

<bundles_post_ra>
// kernel: os_block_forward.1
= control target key start
LH: loop header
LB: loop body
LE: loop exit
PB: predicated region body
PF: predicated region fallthrough
CT: control target
= control target key end

     0   :  { %s5427_s24 = smov 0   ;;  %s9042_s0 = inlined_call_operand.vmem [shape: f32[2,32,256], index: 0, kind: input, shape index: {}]   ;;  %s9043_s1 = inlined_call_operand.vmem [shape: bf16[16,32], index: 1, kind: input, shape index: {}]   ;;  %s9044_s2 = inlined_call_operand.vmem [shape: f32[16,1], index: 2, kind: input, shape index: {}]   ;;  %s9045_s3 = inlined_call_operand.vmem [shape: bf16[64,16], index: 3, kind: input, shape index: {}]   ;;  %s9046_s4 = inlined_call_operand.vmem [shape: f32[64,9], index: 4, kind: input, shape index: {}]   ;;  %s9047_s5 = inlined_call_operand.vmem [shape: f32[64,1], index: 5, kind: input, shape index: {}]   ;;  %s9048_s6 = inlined_call_operand.vmem [shape: bf16[48,48], index: 6, kind: input, shape index: {}]   ;;  %s9049_s7 = inlined_call_operand.vmem [shape: f32[48,9], index: 7, kind: input, shape index: {}]   ;;  %s9050_s8 = inlined_call_operand.vmem [shape: f32[48,1], index: 8, kind: input, shape index: {}]   ;;  %s9051_s9 = inlined_call_operand.vmem [shape: bf16[32,32], index: 9, kind: input, shape index: {}]   ;;  %s9052_s10 = inlined_call_operand.vmem [shape: f32[32,9], index: 10, kind: input, shape index: {}]   ;;  %s9053_s11 = inlined_call_operand.vmem [shape: f32[32,1], index: 11, kind: input, shape index: {}]   ;;  %s9054_s12 = inlined_call_operand.vmem [shape: bf16[16,16], index: 12, kind: input, shape index: {}]   ;;  %s9055_s13 = inlined_call_operand.vmem [shape: f32[16,9], index: 13, kind: input, shape index: {}]   ;;  %s9056_s14 = inlined_call_operand.vmem [shape: f32[16,1], index: 14, kind: input, shape index: {}]   ;;  %s9057_s15 = inlined_call_operand.vmem [shape: f32[1,16], index: 15, kind: input, shape index: {}]   ;;  %s9058_s16 = inlined_call_operand.<no memory space> [shape: f32[1,1], index: 16, kind: input, shape index: {}]   ;;  %s9059_s17 = inlined_call_operand.vmem [shape: f32[16,1], index: 17, kind: input, shape index: {}]   ;;  %s9060_s18 = inlined_call_operand.vmem [shape: f32[16,1], index: 18, kind: input, shape index: {}]   ;;  %s9061_s19 = inlined_call_operand.vmem [shape: bf16[64,16], index: 19, kind: input, shape index: {}]   ;;  %s9062_s20 = inlined_call_operand.vmem [shape: f32[64,1], index: 20, kind: input, shape index: {}]   ;;  %s9063_s21 = inlined_call_operand.vmem [shape: bf16[64,32], index: 21, kind: input, shape index: {}]   ;;  %s9064_s22 = inlined_call_operand.vmem [shape: f32[64,1], index: 22, kind: input, shape index: {}]   ;;  %s9065_s23 = inlined_call_operand.vmem [shape: f32[2,64,256], index: 23, kind: output, shape index: {}]  }
   0x1   :  { %9388 = sst [smem:[#allocation116_spill]] %s9042_s0  ;;  %v28_v0 = vstv %s9058_s16 }
   0x2   :  { %9389 = sst [smem:[#allocation117_spill]] %s9043_s1  ;;  %29 = vst [vmem:[#allocation2] sm:$0x1] %v28_v0 }
   0x3   :  { %9390 = sst [smem:[#allocation118_spill]] %s9044_s2 }
   0x4   :  { %9391 = sst [smem:[#allocation119_spill]] %s9045_s3 }
   0x5   :  { %9392 = sst [smem:[#allocation120_spill]] %s9046_s4 }
   0x6   :  { %9393 = sst [smem:[#allocation121_spill]] %s9047_s5 }
   0x7   :  { %9394 = sst [smem:[#allocation122_spill]] %s9048_s6 }
   0x8   :  { %9395 = sst [smem:[#allocation123_spill]] %s9049_s7 }
   0x9   :  { %9396 = sst [smem:[#allocation124_spill]] %s9051_s9 }
   0xa LB: > { %s5031_s25 = sadd.s32 4294967295, %s5287_s24   ;;  %p5035_p0 = scmp.ge.s32.totalorder %s5287_s24, 1  ;;  %s5287_s24 = sphi %s5427_s24, %s35_s24  }
   0xb   : > { %p639_p1 = scmp.lt.s32.totalorder %s5287_s24, 3 }
   0xd   : > { %p640_p2 = pnand %p5035_p0, %p639_p1 }
   0xf   : > { %643 = sbr.rel (%p640_p2) target bundleno = 3325 (0xcfd), region = 112 }
  0x14   : > { %p703_p3 = scmp.lt.s32.totalorder %s5031_s25, 1  ;;  %v9084_v1 = vmov 0   ;;  %s9397_s1 = sld [smem:[#allocation118_spill]]  ;;  %v9088_v12 = vmov 1   ;;  %vm745_vm0 = vcmask 261120   ;;  %v9086_v20 = vmov 2  }
  0x15   : > { %781 = vmatprep.mubr.bf16.mxu0 %v9084_v1  ;;  %5131 = vset.pattern.permute.xlu0 %v9084_v1  ;;  %s9398_s7 = sld [smem:[#allocation120_spill]]  ;;  %v9082_v23 = vmov 3   ;;  %v9078_v25 = vmov 4   ;;  %v9080_v27 = vmov 5   ;;  %v9076_v28 = vmov 6   ;;  %s9206_s3 = smov 16  }
  0x16   : > { %s9983_s25 = smov (!%p703_p3, %s5031_s25), 1  ;;  %5132 = vset.pattern.permute.xlu1 %v9084_v1  ;;  %910 = vmatprep.mubr.bf16.mxu1 %v9084_v1  ;;  %s9399_s0 = sld [smem:[#allocation116_spill]]  ;;  %v9074_v29 = vmov 7   ;;  %v9072_v30 = vmov 8   ;;  %vm865_vm1 = vcmask 130048   ;;  %vm1007_vm3 = vcmask 7168  }
  0x17   : > { %s5088_s28 = sshll.u32 %s9983_s25, 6  ;;  %s9404_s2 = sld [smem:[#allocation117_spill]]  ;;  %vm1088_vm7 = vcmask 1039360   ;;  %vm1769_vm8 = vcmask 916480   ;;  %vm2229_vm9 = vcmask 392192   ;;  %vm5303_vm10 = vmmov 0  }
  0x18   : > { %s9405_s26 = sld [smem:[#allocation121_spill]]  ;;  %s9177_s30 = smov 112   ;;  %vm4340_vm11 = vcmask 15360   ;;  %vm4343_vm12 = vcmask 23552   ;;  %vm4451_vm13 = vcmask 1040384  }
  0x19   : > { %s9406_s29 = sld [smem:[#allocation119_spill]] }
  0x1a   : > { %v728_v2 = vld [vmem:[%s9397_s1] sm:$0xff]  ;;  %v729_v3 = vld [vmem:[%s9397_s1 + $0x8] sm:$0xff]  ;;  %s9487_s16 = sld [smem:[#allocation123_spill]] }
  0x1b   : > { %732 = vperm.xlu0 %5131, %v728_v2   ;;  %v5449_v4 = vld [vmem:[%s9398_s7 + $0x38] sm:$0xff]  ;;  %v5468_v17 = vld [vmem:[%s9398_s7 + $0x30] sm:$0xff]  ;;  %v5489_v21 = vld [vmem:[%s9398_s7 + $0x28] sm:$0xff]  ;;  %s9575_s27 = sld [smem:[#allocation122_spill]] }
  0x1c   : > { %1254 = vperm.xlu1 %5132, %v5449_v4   ;;  %s707_s4 = scalar_lea.vmem %s9399_s0, %s5088_s28  ;;  %v5497_v22 = vld [vmem:[%s9398_s7 + $0x20] sm:$0xff]  ;;  %v5508_v24 = vld [vmem:[%s9398_s7 + $0x18] sm:$0xff]  ;;  %v5520_v26 = vld [vmem:[%s9398_s7 + $0x10] sm:$0xff]  ;;  %s9208_s0 = smov 1  }
  0x1d   : > { %v719_v5 = vld [vmem:[%s707_s4 + $0x28] sm:$0xff]  ;;  %v721_v6 = vld [vmem:[%s707_s4 + $0x38] sm:$0xff]  ;;  %v718_v7 = vld [vmem:[%s707_s4 + $0x20] sm:$0xff]  ;;  %s9619_s28 = smov 1   ;;  %s9661_s9 = sld [smem:[#allocation124_spill]] }
  0x1e   : > { %v5457_v8 = vpack.c.bf16 %v721_v6, %v719_v5  ;;  %v720_v9 = vld [vmem:[%s707_s4 + $0x30] sm:$0xff]  ;;  %v715_v10 = vld [vmem:[%s707_s4 + $0x8] sm:$0xff]  ;;  %v717_v11 = vld [vmem:[%s707_s4 + $0x18] sm:$0xff] }
  0x1f   : > { %737 = vperm.xlu0 %5131, %v729_v3   ;;  %v5460_v13 = vpack.c.bf16 %v720_v9, %v718_v7  ;;  %v5462_v14 = vpack.c.bf16 %v717_v11, %v715_v10  ;;  %v714_v15 = vld [vmem:[%s707_s4] sm:$0xff]  ;;  %v716_v16 = vld [vmem:[%s707_s4 + $0x10] sm:$0xff]  ;;  %v2129_v35 = vld [vmem:[%s9405_s26 + $0x38] sm:$0xff]  ;;  %s9179_s4 = smov 127  }
  0x20   : > { %9400 = vst [vmem:[#allocation3_spill] sm:$0xff] %v5457_v8  ;;  %5134 = vset.pattern.permute.xlu1 %v9088_v12  ;;  %761 = vmatprep.subr.bf16.mxu0 %v5457_v8  ;;  %v5472_v18 = vpack.c.bf16 %v716_v16, %v714_v15  ;;  %v5254_v19 = vld [vmem:[%s9404_s2] sm:$0xff]   ;;  %v2128_v32 = vld [vmem:[%s9405_s26 + $0x30] sm:$0xff]  ;;  %v5256_v51 = vld [vmem:[%s9406_s29 + $0x8] sm:$0xff]   ;;  %s9665_s2 = smov 16  }
  0x21   : > { %9401 = vst [vmem:[#allocation4_spill] sm:$0xff] %v5460_v13  ;;  %9402 = vst [vmem:[#allocation5_spill] sm:$0xff] %v5462_v14  ;;  %1366 = vperm.xlu1 %5134, %v5449_v4   ;;  %762 = vmatpush1.bf16.msra.mxu0 %v5460_v13  ;;  %v5255_v49 = vld [vmem:[%s9406_s29] sm:$0xff]   ;;  %v2127_v52 = vld [vmem:[%s9405_s26 + $0x28] sm:$0xff] }
  0x22   : > { %9403 = vst [vmem:[#allocation6_spill] sm:$0xff] %v5472_v18  ;;  %763 = vmatprep.subr.bf16.mxu0 %v5462_v14  ;;  %v2126_v50 = vld [vmem:[%s9405_s26 + $0x20] sm:$0xff]  ;;  %v5257_v53 = vld [vmem:[%s9406_s29 + $0x10] sm:$0xff]   ;;  %v5258_v54 = vld [vmem:[%s9406_s29 + $0x18] sm:$0xff]  }
  0x23   : > { %5133 = vset.pattern.permute.xlu0 %v9088_v12 }
  0x24   : > { %1362 = vperm.xlu0 %5133, %v5468_v17  }
  0x25   : > { %5135 = vset.pattern.permute.xlu1 %v9086_v20  ;;  %764 = vmatpush1.bf16.msra.mxu0 %v5472_v18 }
  0x26   : > { %1506 = vperm.xlu1 %5135, %v5468_v17  }
  0x28   : > { %5041 = vmatmul.mubr.msk.bf16.vlgmr.msra.gmra.mxu0 %vm745_vm0, %v5254_v19  ;;  %1358 = vperm.xlu0 %5133, %v5489_v21  }
  0x29   : > { %2271 = vmatprep.mubr.bf16.mxu0 %v9084_v1 }
  0x2a   : > { %5136 = vset.pattern.permute.xlu1 %v9084_v1 }
  0x2b   : > { %1244 = vperm.xlu1 %5136, %v5489_v21  }
  0x2c   : > { %1350 = vperm.xlu0 %5133, %v5508_v24  }
  0x2f   : > { %5137 = vset.pattern.permute.xlu1 %v9088_v12 }
  0x30   : > { %1354 = vperm.xlu1 %5137, %v5497_v22   ;;  %5143 = vset.pattern.permute.xlu0 %v9086_v20 }
  0x31   : > { %1510 = vperm.xlu0 %5143, %v5449_v4  }
  0x34   : > { %5138 = vset.pattern.permute.xlu1 %v9082_v23 }
  0x35   : > { %1570 = vperm.xlu1 %5138, %v5468_v17   ;;  %1498 = vperm.xlu0 %5143, %v5497_v22  }
  0x39   : > { %1574 = vperm.xlu1 %5138, %v5449_v4   ;;  %1494 = vperm.xlu0 %5143, %v5508_v24  }
  0x3d   : > { %5139 = vset.pattern.permute.xlu1 %v9086_v20  ;;  %5150 = vset.pattern.permute.xlu0 %v9082_v23 }
  0x3e   : > { %1502 = vperm.xlu1 %5139, %v5489_v21   ;;  %1558 = vperm.xlu0 %5150, %v5508_v24  }
  0x42   : > { %5140 = vset.pattern.permute.xlu1 %v9078_v25  ;;  %5151 = vset.pattern.permute.xlu0 %v9078_v25 }
  0x43   : > { %1634 = vperm.xlu1 %5140, %v5468_v17   ;;  %1638 = vperm.xlu0 %5151, %v5449_v4  }
  0x47   : > { %5141 = vset.pattern.permute.xlu1 %v9084_v1  ;;  %1622 = vperm.xlu0 %5151, %v5508_v24  }
  0x48   : > { %1234 = vperm.xlu1 %5141, %v5508_v24  }
  0x4b   : > { %5155 = vset.pattern.permute.xlu0 %v9080_v27 }
  0x4c   : > { %5142 = vset.pattern.permute.xlu1 %v9088_v12  ;;  %1698 = vperm.xlu0 %5155, %v5468_v17  }
  0x4d   : > { %1346 = vperm.xlu1 %5142, %v5520_v26  }
  0x50   : > { %1682 = vperm.xlu0 %5155, %v5520_v26  }
  0x51   : > { %5144 = vset.pattern.permute.xlu1 %v9082_v23 }
  0x52   : > { %1562 = vperm.xlu1 %5144, %v5497_v22  }
  0x54   : > { %5158 = vset.pattern.permute.xlu0 %v9076_v28 }
  0x55   : > { %1827 = vperm.xlu0 %5158, %v5468_v17  }
  0x56   : > { %1566 = vperm.xlu1 %5144, %v5489_v21  }
  0x59   : > { %1819 = vperm.xlu0 %5158, %v5497_v22  }
  0x5a   : > { %5145 = vset.pattern.permute.xlu1 %v9080_v27 }
  0x5b   : > { %1702 = vperm.xlu1 %5145, %v5449_v4  }
  0x5d   : > { %1811 = vperm.xlu0 %5158, %v5520_v26  }
  0x5f   : > { %5146 = vset.pattern.permute.xlu1 %v9086_v20 }
  0x60   : > { %1490 = vperm.xlu1 %5146, %v5520_v26  }
  0x61   : > { %5161 = vset.pattern.permute.xlu0 %v9074_v29 }
  0x62   : > { %1955 = vperm.xlu0 %5161, %v5468_v17  }
  0x64   : > { %5147 = vset.pattern.permute.xlu1 %v9078_v25 }
  0x65   : > { %1626 = vperm.xlu1 %5147, %v5497_v22  }
  0x66   : > { %1951 = vperm.xlu0 %5161, %v5489_v21  }
  0x69   : > { %1630 = vperm.xlu1 %5147, %v5489_v21  }
  0x6a   : > { %1939 = vperm.xlu0 %5161, %v5520_v26  }
  0x6d   : > { %5148 = vset.pattern.permute.xlu1 %v9076_v28 }
  0x6e   : > { %1831 = vperm.xlu1 %5148, %v5449_v4   ;;  %5165 = vset.pattern.permute.xlu0 %v9072_v30 }
  0x6f   : > { %2087 = vperm.xlu0 %5165, %v5449_v4  }
  0x72   : > { %5149 = vset.pattern.permute.xlu1 %v9082_v23 }
  0x73   : > { %1554 = vperm.xlu1 %5149, %v5520_v26   ;;  %2079 = vperm.xlu0 %5165, %v5489_v21  }
  0x77   : > { %5152 = vset.pattern.permute.xlu1 %v9080_v27  ;;  %2071 = vperm.xlu0 %5165, %v5508_v24  }
  0x78   : > { %1690 = vperm.xlu1 %5152, %v5497_v22  }
  0x7b   : > { %5168 = vset.pattern.permute.xlu0 %v9084_v1 }
  0x7c   : > { %1694 = vperm.xlu1 %5152, %v5489_v21   ;;  %1249 = vperm.xlu0 %5168, %v5468_v17  }
  0x80   : > { %5153 = vset.pattern.permute.xlu1 %v9074_v29  ;;  %1239 = vperm.xlu0 %5168, %v5497_v22  }
  0x81   : > { %1959 = vperm.xlu1 %5153, %v5449_v4  }
  0x84   : > { %1229 = vperm.xlu0 %5168, %v5520_v26  }
  0x85   : > { %5154 = vset.pattern.permute.xlu1 %v9078_v25 }
  0x86   : > { %1618 = vperm.xlu1 %5154, %v5520_v26  }
  0x8a   : > { %5156 = vset.pattern.permute.xlu1 %v9076_v28 }
  0x8b   : > { %1823 = vperm.xlu1 %5156, %v5489_v21  }
  0x8f   : > { %5157 = vset.pattern.permute.xlu1 %v9072_v30 }
  0x90   : > { %2083 = vperm.xlu1 %5157, %v5468_v17  }
  0x94   : > { %5159 = vset.pattern.permute.xlu1 %v9080_v27 }
  0x95   : > { %1686 = vperm.xlu1 %5159, %v5508_v24  }
  0x96   : > { %v733_v31 = vpop.permute.xlu0 %732 }
  0x97   : > { %v5621_v55 = vpop.permute.xlu1 %1254 }
  0x98   : > { %9407 = vst [vmem:[#allocation7_spill] sm:$0xff] %v5621_v55 }
  0x99   : > { %5160 = vset.pattern.permute.xlu1 %v9074_v29 }
  0x9a   : > { %1947 = vperm.xlu1 %5160, %v5497_v22   ;;  %v738_v36 = vpop.permute.xlu0 %737 }
  0x9c   : > { %v5623_v56 = vpop.permute.xlu1 %1366 }
  0x9d   : > { %9408 = vst [vmem:[#allocation8_spill] sm:$0xff] %v5623_v56 }
  0x9e   : > { %5162 = vset.pattern.permute.xlu1 %v9076_v28 }
  0x9f   : > { %1815 = vperm.xlu1 %5162, %v5508_v24   ;;  %v5645_v4 = vpop.permute.xlu0 %1362 }
  0xa0   : > { %9414 = vst [vmem:[#allocation14_spill] sm:$0xff] %v5645_v4 }
  0xa1   : > { %v5625_v57 = vpop.permute.xlu1 %1506 }
  0xa2   : > { %9409 = vst [vmem:[#allocation9_spill] sm:$0xff] %v5625_v57 }
  0xa3   : > { %5163 = vset.pattern.permute.xlu1 %v9072_v30  ;;  %v5649_v6 = vpop.permute.xlu0 %1358 }
  0xa4   : > { %2075 = vperm.xlu1 %5163, %v5497_v22  }
  0xa6   : > { %v5627_v58 = vpop.permute.xlu1 %1244 }
  0xa7   : > { %v5655_v10 = vpop.permute.xlu0 %1350 }
  0xa8   : > { %5164 = vset.pattern.permute.xlu1 %v9084_v1 }
  0xa9   : > { %2162 = vperm.xlu1 %5164, %v2128_v32  }
  0xab   : > { %v5629_v59 = vpop.permute.xlu1 %1354 }
  0xac   : > { %v5665_v19 = vpop.permute.xlu0 %1510 }
  0xad   : > { %2167 = vperm.xlu1 %5164, %v2129_v35   ;;  %9422 = vst [vmem:[#allocation22_spill] sm:$0xff] %v5665_v19 }
  0xb0   : > { %v5631_v60 = vpop.permute.xlu1 %1570 }
  0xb1   : > { %5166 = vset.pattern.permute.xlu1 %v9074_v29  ;;  %9410 = vst [vmem:[#allocation10_spill] sm:$0xff] %v5631_v60 }
  0xb2   : > { %1943 = vperm.xlu1 %5166, %v5508_v24  }
  0xb4   : > { %v5633_v61 = vpop.permute.xlu1 %1574 }
  0xb5   : > { %9411 = vst [vmem:[#allocation11_spill] sm:$0xff] %v5633_v61 }
  0xb6   : > { %5167 = vset.pattern.permute.xlu1 %v9072_v30 }
  0xb7   : > { %2067 = vperm.xlu1 %5167, %v5520_v26   ;;  %v5677_v26 = vpop.permute.xlu0 %1498 }
  0xb9   : > { %v5635_v62 = vpop.permute.xlu1 %1502 }
  0xbb   : > { %5169 = vset.pattern.permute.xlu1 %v9084_v1  ;;  %v5689_v32 = vpop.permute.xlu0 %1494 }
  0xbc   : > { %2152 = vperm.xlu1 %5169, %v2126_v50  }
  0xbe   : > { %v5637_v63 = vpop.permute.xlu1 %1634 }
  0xbf   : > { %9412 = vst [vmem:[#allocation12_spill] sm:$0xff] %v5637_v63 }
  0xc0   : > { %2157 = vperm.xlu1 %5169, %v2127_v52  }
  0xc3   : > { %v5639_v0 = vpop.permute.xlu1 %1234 }
  0xc4   : > { %9413 = vst [vmem:[#allocation13_spill] sm:$0xff] %v5639_v0 }
  0xc8   : > { %v5641_v2 = vpop.permute.xlu1 %1346 }
  0xcd   : > { %v5643_v3 = vpop.permute.xlu1 %1562 }
  0xd1   : > { %v5647_v5 = vpop.permute.xlu1 %1566 }
  0xd2   : > { %9415 = vst [vmem:[#allocation15_spill] sm:$0xff] %v5647_v5 }
  0xd6   : > { %v5651_v7 = vpop.permute.xlu1 %1702 }
  0xd7   : > { %9416 = vst [vmem:[#allocation16_spill] sm:$0xff] %v5651_v7 }
  0xdb   : > { %v5659_v15 = vpop.permute.xlu1 %1490 }
  0xdc   : > { %9419 = vst [vmem:[#allocation19_spill] sm:$0xff] %v5659_v15 }
  0xe0   : > { %v5669_v22 = vpop.permute.xlu1 %1626 }
  0xe8   : > { %v783_v33 = vpop.f32.mrf.mxu0 }
  0xe9   : > { %v784_v40 = vadd.f32 %v783_v33, %v733_v31 }
  0xea   : > { %v785_v34 = vpop.f32.mrf.mxu0 }
  0xeb   : > { %v786_v38 = vadd.f32 %v785_v34, %v733_v31  ;;  %v792_v46 = vmax.f32 %v784_v40, 0.0  ;;  %v5683_v31 = vpop.permute.xlu1 %1630 }
  0xec   : > { %v787_v37 = vpop.f32.mrf.mxu0  ;;  %9423 = vst [vmem:[#allocation23_spill] sm:$0xff] %v5683_v31 }
  0xed   : > { %v788_v39 = vadd.f32 %v787_v37, %v738_v36  ;;  %v793_v44 = vmax.f32 %v786_v38, 0.0 }
  0xee   : > { %v789_v41 = vpop.f32.mrf.mxu0 }
  0xef   : > { %v790_v42 = vadd.f32 %v789_v41, %v738_v36  ;;  %v794_v43 = vmax.f32 %v788_v39, 0.0  ;;  %v5693_v34 = vpop.permute.xlu1 %1831  ;;  %v5701_v36 = vpop.permute.xlu0 %1558 }
  0xf0   : > { %9424 = vst [vmem:[#allocation24_spill] sm:$0xff] %v5693_v34 }
  0xf1   : > { %v795_v45 = vmax.f32 %v790_v42, 0.0  ;;  %v843_v48 = vpack.c.bf16 %v794_v43, %v792_v46 }
  0xf3   : > { %v844_v47 = vpack.c.bf16 %v795_v45, %v793_v44  ;;  %v5707_v37 = vpop.permute.xlu1 %1554  ;;  %v5713_v38 = vpop.permute.xlu0 %1638 }
  0xf4   : > { %9425 = vst [vmem:[#allocation25_spill] sm:$0xff] %v5713_v38 }
  0xf5   : > { %892 = vmatprep.subr.bf16.mxu1 %v844_v47 }
  0xf6   : > { %893 = vmatpush1.bf16.msra.mxu1 %v843_v48 }
  0xf7   : > { %v5715_v39 = vpop.permute.xlu1 %1690  ;;  %v5723_v41 = vpop.permute.xlu0 %1622 }
  0xf9   : > { %5050 = vmatmul.mubr.msk.bf16.vlgmr.msra.gmra.mxu1 %vm865_vm1, %v5255_v49 }
  0xfa   : > { %920 = vmatprep.mubr.bf16.mxu1 %v9084_v1 }
  0xfb   : > { %v5729_v42 = vpop.permute.xlu1 %1694  ;;  %v5735_v43 = vpop.permute.xlu0 %1698 }
  0xfc   : > { %9426 = vst [vmem:[#allocation26_spill] sm:$0xff] %v5729_v42  ;;  %9427 = vst [vmem:[#allocation27_spill] sm:$0xff] %v5735_v43 }
  0xff   : > { %v5739_v45 = vpop.permute.xlu1 %1959  ;;  %v5745_v46 = vpop.permute.xlu0 %1682 }
 0x100   : > { %9428 = vst [vmem:[#allocation28_spill] sm:$0xff] %v5739_v45  ;;  %9429 = vst [vmem:[#allocation29_spill] sm:$0xff] %v5745_v46  ;;  %v9121_v45 = vmov 0.0  }
 0x101   : > { %5051 = vmatmul.mubr.msk.bf16.gmra.mxu1 %vm865_vm1, %v5256_v51 }
 0x102   : > { %930 = vmatprep.mubr.bf16.mxu1 %v9084_v1 }
 0x103   : > { %v5751_v47 = vpop.permute.xlu1 %1618  ;;  %v5759_v49 = vpop.permute.xlu0 %1827 }
 0x104   : > { %9430 = vst [vmem:[#allocation30_spill] sm:$0xff] %v5759_v49 }
 0x107   : > { %v5761_v50 = vpop.permute.xlu1 %1823  ;;  %v5769_v52 = vpop.permute.xlu0 %1819 }
 0x108   : > { %9431 = vst [vmem:[#allocation31_spill] sm:$0xff] %v5761_v50 }
 0x109   : > { %5052 = vmatmul.mubr.msk.bf16.gmra.mxu1 %vm865_vm1, %v5257_v53 }
 0x10a   : > { %940 = vmatprep.mubr.bf16.mxu1 %v9084_v1 }
 0x10b   : > { %v5775_v53 = vpop.permute.xlu1 %2083 }
 0x10c   : > { %9433 = vst [vmem:[#allocation33_spill] sm:$0xff] %v5775_v53 }
 0x110   : > { %v5783_v30 = vpop.permute.xlu1 %1686 }
 0x111   : > { %5053 = vmatmul.mubr.msk.bf16.gmra.mxu1 %vm865_vm1, %v5258_v54  ;;  %v5781_v54 = vpop.permute.xlu0 %1811  ;;  %9435 = vst [vmem:[#allocation35_spill] sm:$0xff] %v5783_v30 }
 0x112   : > { %3294 = vmatprep.mubr.bf16.mxu1 %v9084_v1  ;;  %9434 = vst [vmem:[#allocation34_spill] sm:$0xff] %v5781_v54  ;;  %v9112_v54 = vlaneseq }
 0x115   : > { %v5791_v28 = vpop.permute.xlu0 %1955  ;;  %v5799_v27 = vpop.permute.xlu1 %1947 }
 0x116   : > { %9437 = vst [vmem:[#allocation37_spill] sm:$0xff] %v5791_v28  ;;  %9439 = vst [vmem:[#allocation39_spill] sm:$0xff] %v5799_v27 }
 0x119   : > { %v5807_v1 = vpop.permute.xlu0 %1951 }
 0x11a   : > { %9441 = vst [vmem:[#allocation41_spill] sm:$0xff] %v5807_v1  ;;  %v5809_v20 = vpop.permute.xlu1 %1815 }
 0x11b   : > { %9442 = vst [vmem:[#allocation42_spill] sm:$0xff] %v5809_v20 }
 0x11d   : > { %v5815_v12 = vpop.permute.xlu0 %1939 }
 0x11e   : > { %9443 = vst [vmem:[#allocation43_spill] sm:$0xff] %v5815_v12 }
 0x11f   : > { %v5823_v14 = vpop.permute.xlu1 %2075 }
 0x120   : > { %9445 = vst [vmem:[#allocation45_spill] sm:$0xff] %v5823_v14 }
 0x121   : > { %v5829_v13 = vpop.permute.xlu0 %2087 }
 0x122   : > { %9446 = vst [vmem:[#allocation46_spill] sm:$0xff] %v5829_v13 }
 0x124   : > { %v5831_v8 = vpop.permute.xlu1 %2162 }
 0x125   : > { %9447 = vst [vmem:[#allocation47_spill] sm:$0xff] %v5831_v8 }
 0x1b9   : > { %v5653_v9 = vpop.f32.mrf.mxu1 }
 0x1ba   : > { %9417 = vst [vmem:[#allocation17_spill] sm:$0xff] %v5653_v9 }
 0x1bb   : > { %v5657_v11 = vpop.f32.mrf.mxu1 }
 0x1bc   : > { %9418 = vst [vmem:[#allocation18_spill] sm:$0xff] %v5657_v11  ;;  %v5835_v11 = vpop.permute.xlu0 %2079 }
 0x1bd   : > { %v5661_v16 = vpop.f32.mrf.mxu1  ;;  %9448 = vst [vmem:[#allocation48_spill] sm:$0xff] %v5835_v11 }
 0x1be   : > { %9420 = vst [vmem:[#allocation20_spill] sm:$0xff] %v5661_v16 }
 0x1bf   : > { %v5663_v17 = vpop.f32.mrf.mxu1 }
 0x1c0   : > { %9421 = vst [vmem:[#allocation21_spill] sm:$0xff] %v5663_v17  ;;  %v5837_v17 = vpop.permute.xlu1 %2167  ;;  %v5843_v9 = vpop.permute.xlu0 %2071 }
 0x1c1   : > { %v5667_v21 = vpop.f32.mrf.mxu1  ;;  %9449 = vst [vmem:[#allocation49_spill] sm:$0xff] %v5837_v17  ;;  %9450 = vst [vmem:[#allocation50_spill] sm:$0xff] %v5843_v9  ;;  %v797_v17 = vand.u32 127, %v9112_v54 }
 0x1c2   : > { %1281 = vrot.lane.b32.xlu1 %v5667_v21, %s9206_s3  ;;  %983 = vrot.lane.b32.xlu0 %v5667_v21, %s9208_s0 }
 0x1c3   : > { %v5675_v24 = vpop.f32.mrf.mxu1  ;;  %v798_v13 = vadd.s32 128, %v797_v17  ;;  %v803_v34 = vand.u32 15, %v797_v17 }
 0x1c4   : > { %v5845_v16 = vpop.permute.xlu1 %1943  ;;  %v5851_v20 = vpop.permute.xlu0 %1249 }
 0x1c5   : > { %v5691_v33 = vpop.f32.mrf.mxu1  ;;  %9451 = vst [vmem:[#allocation51_spill] sm:$0xff] %v5845_v16  ;;  %9453 = vst [vmem:[#allocation53_spill] sm:$0xff] %v5851_v20  ;;  %v810_v16 = vand.u32 15, %v798_v13  ;;  %vm823_vm2 = vcmp.ne.s32.totalorder %v803_v34, 0  ;;  %vm829_vm5 = vcmp.ne.s32.totalorder %v803_v34, 15 }
 0x1c6   : > { %1064 = vrot.lane.b32.xlu0 %v5667_v21, %s9179_s4  ;;  %985 = vrot.lane.b32.xlu1 %v5675_v24, %s9208_s0 }
 0x1c7   : > { %v5699_v35 = vpop.f32.mrf.mxu1  ;;  %vm824_vm4 = vcmp.ne.s32.totalorder %v810_v16, 0  ;;  %vm830_vm6 = vcmp.ne.s32.totalorder %v810_v16, 15 }
 0x1c8   : > { %v5849_v12 = vpop.permute.xlu1 %2067  ;;  %v5856_v30 = vpop.permute.xlu0 %1239  ;;  %v5872_v17 = vsel %vm824_vm4, 1.0, %v9121_v45  ;;  %v5886_v19 = vsel %vm830_vm6, 1.0, %v9121_v45 }
 0x1c9   : > { %v5721_v40 = vpop.f32.mrf.mxu1  ;;  %9452 = vst [vmem:[#allocation52_spill] sm:$0xff] %v5849_v12  ;;  %v5863_v12 = vsel %vm823_vm2, 1.0, %v9121_v45  ;;  %9459 = vst [vmem:[#allocation59_spill] sm:$0xff] %v5872_v17 }
 0x1ca   : > { %1283 = vrot.lane.b32.xlu0 %v5675_v24, %s9206_s3  ;;  %1066 = vrot.lane.b32.xlu1 %v5675_v24, %s9179_s4  ;;  %9457 = vst [vmem:[#allocation57_spill] sm:$0xff] %v5863_v12  ;;  %9461 = vst [vmem:[#allocation61_spill] sm:$0xff] %v5886_v19 }
 0x1cb   : > { %v5737_v44 = vpop.f32.mrf.mxu1 }
 0x1cc   : > { %v5854_v8 = vpop.permute.xlu1 %2152  ;;  %v5860_v9 = vpop.permute.xlu0 %1229 }
 0x1cd   : > { %v5753_v48 = vpop.f32.mrf.mxu1  ;;  %9454 = vst [vmem:[#allocation54_spill] sm:$0xff] %v5854_v8  ;;  %9456 = vst [vmem:[#allocation56_spill] sm:$0xff] %v5860_v9 }
 0x1ce   : > { %1876 = vrot.lane.b32.xlu0 %v5675_v24, %s9177_s30  ;;  %1285 = vrot.lane.b32.xlu1 %v5691_v33, %s9206_s3 }
 0x1cf   : > { %v5763_v51 = vpop.f32.mrf.mxu1 }
 0x1d0   : > { %9432 = vst [vmem:[#allocation32_spill] sm:$0xff] %v5763_v51  ;;  %v5858_v53 = vpop.permute.xlu1 %2157 }
 0x1d1   : > { %v5785_v29 = vpop.f32.mrf.mxu1  ;;  %9455 = vst [vmem:[#allocation55_spill] sm:$0xff] %v5858_v53 }
 0x1d2   : > { %987 = vrot.lane.b32.xlu0 %v5691_v33, %s9208_s0  ;;  %989 = vrot.lane.b32.xlu1 %v5699_v35, %s9208_s0  ;;  %9436 = vst [vmem:[#allocation36_spill] sm:$0xff] %v5785_v29 }
 0x1d3   : > { %v5793_v25 = vpop.f32.mrf.mxu1 }
 0x1d4   : > { %9438 = vst [vmem:[#allocation38_spill] sm:$0xff] %v5793_v25 }
 0x1d5   : > { %v5801_v23 = vpop.f32.mrf.mxu1 }
 0x1d6   : > { %1068 = vrot.lane.b32.xlu0 %v5691_v33, %s9179_s4  ;;  %1070 = vrot.lane.b32.xlu1 %v5699_v35, %s9179_s4  ;;  %9440 = vst [vmem:[#allocation40_spill] sm:$0xff] %v5801_v23 }
 0x1d7   : > { %v5817_v18 = vpop.f32.mrf.mxu1 }
 0x1d8   : > { %9444 = vst [vmem:[#allocation44_spill] sm:$0xff] %v5817_v18 }
 0x1da   : > { %1287 = vrot.lane.b32.xlu0 %v5699_v35, %s9206_s3  ;;  %1880 = vrot.lane.b32.xlu1 %v5699_v35, %s9177_s30 }
 0x1de   : > { %1289 = vrot.lane.b32.xlu1 %v5721_v40, %s9206_s3  ;;  %991 = vrot.lane.b32.xlu0 %v5721_v40, %s9208_s0 }
 0x1e2   : > { %1882 = vrot.lane.b32.xlu1 %v5721_v40, %s9177_s30  ;;  %1072 = vrot.lane.b32.xlu0 %v5721_v40, %s9179_s4 }
 0x1e6   : > { %1291 = vrot.lane.b32.xlu0 %v5737_v44, %s9206_s3  ;;  %993 = vrot.lane.b32.xlu1 %v5737_v44, %s9208_s0 }
 0x1ea   : > { %1884 = vrot.lane.b32.xlu0 %v5737_v44, %s9177_s30  ;;  %1074 = vrot.lane.b32.xlu1 %v5737_v44, %s9179_s4 }
 0x1ee   : > { %1293 = vrot.lane.b32.xlu1 %v5753_v48, %s9206_s3  ;;  %995 = vrot.lane.b32.xlu0 %v5753_v48, %s9208_s0 }
 0x1f2   : > { %1076 = vrot.lane.b32.xlu0 %v5753_v48, %s9179_s4  ;;  %997 = vrot.lane.b32.xlu1 %v5763_v51, %s9208_s0 }
 0x1f6   : > { %1886 = vrot.lane.b32.xlu0 %v5753_v48, %s9177_s30  ;;  %1078 = vrot.lane.b32.xlu1 %v5763_v51, %s9179_s4 }
 0x1fa   : > { %1295 = vrot.lane.b32.xlu0 %v5763_v51, %s9206_s3  ;;  %1888 = vrot.lane.b32.xlu1 %v5763_v51, %s9177_s30 }
 0x1fe   : > { %1080 = vrot.lane.b32.xlu0 %v5785_v29, %s9179_s4  ;;  %999 = vrot.lane.b32.xlu1 %v5785_v29, %s9208_s0 }
 0x202   : > { %1297 = vrot.lane.b32.xlu1 %v5785_v29, %s9206_s3  ;;  %1299 = vrot.lane.b32.xlu0 %v5793_v25, %s9206_s3 }
 0x206   : > { %1890 = vrot.lane.b32.xlu1 %v5785_v29, %s9177_s30  ;;  %1003 = vrot.lane.b32.xlu0 %v5801_v23, %s9208_s0 }
 0x20a   : > { %1001 = vrot.lane.b32.xlu1 %v5793_v25, %s9208_s0  ;;  %1084 = vrot.lane.b32.xlu0 %v5801_v23, %s9179_s4 }
 0x20e   : > { %1082 = vrot.lane.b32.xlu1 %v5793_v25, %s9179_s4  ;;  %1303 = vrot.lane.b32.xlu0 %v5817_v18, %s9206_s3 }
 0x212   : > { %1892 = vrot.lane.b32.xlu1 %v5793_v25, %s9177_s30  ;;  %1896 = vrot.lane.b32.xlu0 %v5817_v18, %s9177_s30 }
 0x216   : > { %1301 = vrot.lane.b32.xlu1 %v5801_v23, %s9206_s3 }
 0x21a   : > { %1894 = vrot.lane.b32.xlu1 %v5801_v23, %s9177_s30 }
 0x21e   : > { %1005 = vrot.lane.b32.xlu1 %v5817_v18, %s9208_s0 }
 0x222   : > { %1086 = vrot.lane.b32.xlu1 %v5817_v18, %s9179_s4  ;;  %s9580_s4 = smov 127  }
 0x234   : > { %v5865_v28 = vpop.permute.xlu1 %1281  ;;  %v984_v54 = vpop.permute.xlu0 %983 }
 0x235   : > { %v1034_v46 = vsel %vm1007_vm3, 0.0, %v984_v54 }
 0x236   : > { %v5869_v7 = vmul.f32 %v5863_v12, %v1034_v46  ;;  %v5883_v46 = vsel %vm829_vm5, 1.0, %v9121_v45 }
 0x237   : > { %9460 = vst [vmem:[#allocation60_spill] sm:$0xff] %v5883_v46 }
 0x238   : > { %9458 = vst [vmem:[#allocation58_spill] sm:$0xff] %v5869_v7  ;;  %v1065_v49 = vpop.permute.xlu0 %1064  ;;  %v986_v13 = vpop.permute.xlu1 %985  ;;  %1745 = vrot.lane.b32.xlu0 %v5869_v7, %s9177_s30  ;;  %1161 = vrot.lane.b32.xlu1 %v5869_v7, %s9206_s3 }
 0x239   : > { %v1010_v61 = vsel %vm1007_vm3, %v984_v54, %v986_v13 }
 0x23a   : > { %v5880_v18 = vmul.f32 %v5872_v17, %v1010_v61 }
 0x23c   : > { %v5888_v38 = vpop.permute.xlu0 %1283  ;;  %v1067_v23 = vpop.permute.xlu1 %1066  ;;  %1163 = vrot.lane.b32.xlu0 %v5880_v18, %s9206_s3 }
 0x23d   : > { %v1091_v16 = vsel %vm1088_vm7, %v1065_v49, %v1067_v23  ;;  %v1115_v34 = vsel %vm1088_vm7, %v1067_v23, 0.0 }
 0x23e   : > { %v5895_v61 = vmul.f32 %v5883_v46, %v1091_v16  ;;  %v5898_v54 = vmul.f32 %v5886_v19, %v1115_v34 }
 0x240   : > { %9462 = vst [vmem:[#allocation62_spill] sm:$0xff] %v5895_v61  ;;  %9463 = vst [vmem:[#allocation63_spill] sm:$0xff] %v5898_v54  ;;  %v5900_v13 = vpop.permute.xlu0 %1876  ;;  %v5902_v45 = vpop.permute.xlu1 %1285  ;;  %1427 = vrot.lane.b32.xlu0 %v5898_v54, %s9206_s3  ;;  %1425 = vrot.lane.b32.xlu1 %v5895_v61, %s9206_s3 }
 0x241   : > { %9464 = vst [vmem:[#allocation64_spill] sm:$0xff] %v5900_v13 }
 0x244   : > { %v988_v7 = vpop.permute.xlu0 %987  ;;  %v990_v49 = vpop.permute.xlu1 %989  ;;  %1747 = vrot.lane.b32.xlu1 %v5880_v18, %s9177_s30 }
 0x245   : > { %v1035_v23 = vsel %vm1007_vm3, 0.0, %v988_v7  ;;  %v1011_v16 = vsel %vm1007_vm3, %v988_v7, %v990_v49 }
 0x246   : > { %v5913_v34 = vmul.f32 %v5863_v12, %v1035_v23  ;;  %v5916_v13 = vmul.f32 %v5872_v17, %v1011_v16 }
 0x248   : > { %9465 = vst [vmem:[#allocation65_spill] sm:$0xff] %v5913_v34  ;;  %v1069_v56 = vpop.permute.xlu0 %1068  ;;  %v1071_v55 = vpop.permute.xlu1 %1070  ;;  %1167 = vrot.lane.b32.xlu0 %v5916_v13, %s9206_s3  ;;  %1165 = vrot.lane.b32.xlu1 %v5913_v34, %s9206_s3 }
 0x249   : > { %v1116_v25 = vsel %vm1088_vm7, %v1071_v55, 0.0  ;;  %v1092_v7 = vsel %vm1088_vm7, %v1069_v56, %v1071_v55 }
 0x24a   : > { %v5924_v43 = vmul.f32 %v5886_v19, %v1116_v25  ;;  %v5936_v16 = vmul.f32 %v5883_v46, %v1092_v7 }
 0x24c   : > { %9466 = vst [vmem:[#allocation66_spill] sm:$0xff] %v5924_v43  ;;  %v5927_v49 = vpop.permute.xlu0 %1287  ;;  %v5929_v23 = vpop.permute.xlu1 %1880  ;;  %1431 = vrot.lane.b32.xlu0 %v5924_v43, %s9206_s3  ;;  %1749 = vrot.lane.b32.xlu1 %v5913_v34, %s9177_s30  ;;  %9468 = vst [vmem:[#allocation68_spill] sm:$0xff] %v5936_v16 }
 0x24d   : > { %9467 = vst [vmem:[#allocation67_spill] sm:$0xff] %v5929_v23 }
 0x250   : > { %v5938_v63 = vpop.permute.xlu1 %1289  ;;  %v992_v29 = vpop.permute.xlu0 %991  ;;  %1751 = vrot.lane.b32.xlu0 %v5916_v13, %s9177_s30  ;;  %1429 = vrot.lane.b32.xlu1 %v5936_v16, %s9206_s3 }
 0x251   : > { %v1036_v25 = vsel %vm1007_vm3, 0.0, %v992_v29 }
 0x252   : > { %v5946_v55 = vmul.f32 %v5863_v12, %v1036_v25 }
 0x254   : > { %v5948_v56 = vpop.permute.xlu1 %1882  ;;  %v1073_v23 = vpop.permute.xlu0 %1072  ;;  %1753 = vrot.lane.b32.xlu0 %v5946_v55, %s9177_s30  ;;  %1169 = vrot.lane.b32.xlu1 %v5946_v55, %s9206_s3 }
 0x258   : > { %v5954_v7 = vpop.permute.xlu0 %1291  ;;  %v994_v34 = vpop.permute.xlu1 %993 }
 0x259   : > { %v1012_v60 = vsel %vm1007_vm3, %v992_v29, %v994_v34 }
 0x25a   : > { %v5958_v57 = vmul.f32 %v5872_v17, %v1012_v60 }
 0x25c   : > { %v5960_v4 = vpop.permute.xlu0 %1884  ;;  %v1075_v25 = vpop.permute.xlu1 %1074  ;;  %1171 = vrot.lane.b32.xlu1 %v5958_v57, %s9206_s3 }
 0x25d   : > { %v1093_v53 = vsel %vm1088_vm7, %v1073_v23, %v1075_v25  ;;  %v1117_v20 = vsel %vm1088_vm7, %v1075_v25, 0.0 }
 0x25e   : > { %v5967_v8 = vmul.f32 %v5883_v46, %v1093_v53  ;;  %v5970_v11 = vmul.f32 %v5886_v19, %v1117_v20 }
 0x260   : > { %v5972_v29 = vpop.permute.xlu1 %1293  ;;  %v996_v60 = vpop.permute.xlu0 %995  ;;  %1435 = vrot.lane.b32.xlu0 %v5970_v11, %s9206_s3  ;;  %1433 = vrot.lane.b32.xlu1 %v5967_v8, %s9206_s3 }
 0x261   : > { %v1037_v34 = vsel %vm1007_vm3, 0.0, %v996_v60 }
 0x262   : > { %v5984_v20 = vmul.f32 %v5863_v12, %v1037_v34 }
 0x264   : > { %v998_v23 = vpop.permute.xlu1 %997  ;;  %1755 = vrot.lane.b32.xlu0 %v5958_v57, %s9177_s30  ;;  %2012 = vrot.lane.b32.xlu1 %v5970_v11, %s9177_s30  ;;  %9469 = vst [vmem:[#allocation69_spill] sm:$0xff] %v5984_v20  ;;  %v1077_v53 = vpop.permute.xlu0 %1076 }
 0x265   : > { %v1013_v25 = vsel %vm1007_vm3, %v996_v60, %v998_v23 }
 0x266   : > { %v5992_v50 = vmul.f32 %v5872_v17, %v1013_v25 }
 0x268   : > { %v1079_v1 = vpop.permute.xlu1 %1078  ;;  %2010 = vrot.lane.b32.xlu0 %v5967_v8, %s9177_s30  ;;  %1757 = vrot.lane.b32.xlu1 %v5984_v20, %s9177_s30  ;;  %9470 = vst [vmem:[#allocation70_spill] sm:$0xff] %v5992_v50  ;;  %v5996_v27 = vpop.permute.xlu0 %1886 }
 0x269   : > { %v1094_v14 = vsel %vm1088_vm7, %v1077_v53, %v1079_v1  ;;  %v1118_v42 = vsel %vm1088_vm7, %v1079_v1, 0.0  ;;  %9471 = vst [vmem:[#allocation71_spill] sm:$0xff] %v5996_v27 }
 0x26a   : > { %v6005_v60 = vmul.f32 %v5883_v46, %v1094_v14  ;;  %v6008_v23 = vmul.f32 %v5886_v19, %v1118_v42 }
 0x26c   : > { %v5998_v34 = vpop.permute.xlu1 %1888  ;;  %1173 = vrot.lane.b32.xlu0 %v5984_v20, %s9206_s3  ;;  %1175 = vrot.lane.b32.xlu1 %v5992_v50, %s9206_s3  ;;  %9473 = vst [vmem:[#allocation73_spill] sm:$0xff] %v6005_v60  ;;  %9474 = vst [vmem:[#allocation74_spill] sm:$0xff] %v6008_v23  ;;  %v6014_v1 = vpop.permute.xlu0 %1295 }
 0x26d   : > { %9472 = vst [vmem:[#allocation72_spill] sm:$0xff] %v5998_v34 }
 0x270   : > { %v1000_v25 = vpop.permute.xlu1 %999  ;;  %1439 = vrot.lane.b32.xlu0 %v6008_v23, %s9206_s3  ;;  %1437 = vrot.lane.b32.xlu1 %v6005_v60, %s9206_s3  ;;  %v1081_v42 = vpop.permute.xlu0 %1080 }
 0x271   : > { %v1038_v14 = vsel %vm1007_vm3, 0.0, %v1000_v25 }
 0x272   : > { %v6028_v34 = vmul.f32 %v5863_v12, %v1038_v14 }
 0x274   : > { %v6016_v53 = vpop.permute.xlu1 %1297  ;;  %2016 = vrot.lane.b32.xlu0 %v6008_v23, %s9177_s30  ;;  %1759 = vrot.lane.b32.xlu1 %v5992_v50, %s9177_s30 }
 0x275   : > { %9475 = vst [vmem:[#allocation75_spill] sm:$0xff] %v6016_v53  ;;  %v6032_v53 = vpop.permute.xlu0 %1299 }
 0x278   : > { %v6023_v27 = vpop.permute.xlu1 %1890  ;;  %2014 = vrot.lane.b32.xlu1 %v6005_v60, %s9177_s30 }
 0x279   : > { %9476 = vst [vmem:[#allocation76_spill] sm:$0xff] %v6023_v27  ;;  %v1004_v51 = vpop.permute.xlu0 %1003 }
 0x27c   : > { %v1002_v5 = vpop.permute.xlu1 %1001  ;;  %1177 = vrot.lane.b32.xlu1 %v6028_v34, %s9206_s3 }
 0x27d   : > { %v1014_v23 = vsel %vm1007_vm3, %v1000_v25, %v1002_v5 }
 0x27e   : > { %v6039_v20 = vmul.f32 %v5872_v17, %v1014_v23  ;;  %v1039_v23 = vsel %vm1007_vm3, 0.0, %v1004_v51 }
 0x280   : > { %v1083_v50 = vpop.permute.xlu1 %1082  ;;  %1761 = vrot.lane.b32.xlu1 %v6028_v34, %s9177_s30 }
 0x281   : > { %v1095_v27 = vsel %vm1088_vm7, %v1081_v42, %v1083_v50  ;;  %v1119_v60 = vsel %vm1088_vm7, %v1083_v50, 0.0 }
 0x282   : > { %v6042_v14 = vmul.f32 %v5883_v46, %v1095_v27  ;;  %v6052_v5 = vmul.f32 %v5886_v19, %v1119_v60  ;;  %v6062_v27 = vmul.f32 %v5863_v12, %v1039_v23 }
 0x284   : > { %9477 = vst [vmem:[#allocation77_spill] sm:$0xff] %v6042_v14  ;;  %v6045_v31 = vpop.permute.xlu1 %1892  ;;  %1441 = vrot.lane.b32.xlu0 %v6042_v14, %s9206_s3  ;;  %1179 = vrot.lane.b32.xlu1 %v6039_v20, %s9206_s3 }
 0x285   : > { %9478 = vst [vmem:[#allocation78_spill] sm:$0xff] %v6045_v31  ;;  %v1085_v31 = vpop.permute.xlu0 %1084 }
 0x288   : > { %v6055_v25 = vpop.permute.xlu1 %1301  ;;  %2018 = vrot.lane.b32.xlu0 %v6042_v14, %s9177_s30  ;;  %1443 = vrot.lane.b32.xlu1 %v6052_v5, %s9206_s3 }
 0x289   : > { %9479 = vst [vmem:[#allocation79_spill] sm:$0xff] %v6055_v25 }
 0x28c   : > { %v6064_v50 = vpop.permute.xlu1 %1894  ;;  %1181 = vrot.lane.b32.xlu0 %v6062_v27, %s9206_s3  ;;  %1763 = vrot.lane.b32.xlu1 %v6039_v20, %s9177_s30 }
 0x28d   : > { %9480 = vst [vmem:[#allocation80_spill] sm:$0xff] %v6064_v50 }
 0x290   : > { %2020 = vrot.lane.b32.xlu1 %v6052_v5, %s9177_s30  ;;  %v1006_v60 = vpop.permute.xlu1 %1005 }
 0x291   : > { %v1015_v42 = vsel %vm1007_vm3, %v1004_v51, %v1006_v60 }
 0x292   : > { %v6077_v50 = vmul.f32 %v5872_v17, %v1015_v42  ;;  %v2125_v42 = vld [vmem:[%s9405_s26 + $0x18] sm:$0xff] }
 0x294   : > { %1765 = vrot.lane.b32.xlu1 %v6062_v27, %s9177_s30  ;;  %v1087_v23 = vpop.permute.xlu1 %1086  ;;  %9481 = vst [vmem:[#allocation81_spill] sm:$0xff] %v6077_v50 }
 0x295   : > { %v1096_v12 = vsel %vm1088_vm7, %v1085_v31, %v1087_v23  ;;  %v1120_v14 = vsel %vm1088_vm7, %v1087_v23, 0.0  ;;  %v6094_v31 = vpop.permute.xlu0 %1303  ;;  %v9485_v23 = vmov 1  }
 0x296   : > { %v6080_v25 = vmul.f32 %v5883_v46, %v1096_v12  ;;  %v6088_v51 = vmul.f32 %v5886_v19, %v1120_v14  ;;  %v2124_v12 = vld [vmem:[%s9405_s26 + $0x10] sm:$0xff] }
 0x298   : > { %9482 = vst [vmem:[#allocation82_spill] sm:$0xff] %v6080_v25  ;;  %1183 = vrot.lane.b32.xlu1 %v6077_v50, %s9206_s3  ;;  %1445 = vrot.lane.b32.xlu0 %v6080_v25, %s9206_s3  ;;  %9483 = vst [vmem:[#allocation83_spill] sm:$0xff] %v6088_v51 }
 0x299   : > { %v6107_v14 = vpop.permute.xlu0 %1896 }
 0x29c   : > { %1447 = vrot.lane.b32.xlu1 %v6088_v51, %s9206_s3  ;;  %1874 = vrot.lane.b32.xlu0 %v5667_v21, %s9177_s30 }
 0x2a0   : > { %1878 = vrot.lane.b32.xlu1 %v5691_v33, %s9177_s30  ;;  %2004 = vrot.lane.b32.xlu0 %v5898_v54, %s9177_s30 }
 0x2a4   : > { %1767 = vrot.lane.b32.xlu1 %v6077_v50, %s9177_s30  ;;  %2024 = vrot.lane.b32.xlu0 %v6088_v51, %s9177_s30 }
 0x2a8   : > { %2008 = vrot.lane.b32.xlu1 %v5924_v43, %s9177_s30  ;;  %2142 = vperm.xlu0 %5168, %v2124_v12   ;;  %v1307_v12 = vsel %vm865_vm1, %v5865_v28, %v5888_v38  ;;  %v6140_v38 = vld [vmem:[%s9487_s16 + $0x20] sm:$0xff] }
 0x2aa   : > { %v6111_v60 = vpop.permute.xlu0 %1745  ;;  %v6121_v19 = vpop.permute.xlu1 %1161 }
 0x2ab   : > { %9484 = vst [vmem:[#allocation84_spill] sm:$0xff] %v6111_v60 }
 0x2ac   : > { %2022 = vrot.lane.b32.xlu1 %v6080_v25, %s9177_s30  ;;  %2006 = vrot.lane.b32.xlu0 %v5936_v16, %s9177_s30  ;;  %v1374_v16 = vmul.f32 %v5641_v2, %v1307_v12 }
 0x2ad   : > { %5171 = vset.pattern.permute.xlu0 %v9485_v23 }
 0x2ae   : > { %v1164_v46 = vpop.permute.xlu0 %1163 }
 0x2af   : > { %v1187_v17 = vsel %vm865_vm1, %v6121_v19, %v1164_v46 }
 0x2b0   : > { %v1262_v60 = vmul.f32 %v5860_v9, %v1187_v17  ;;  %2147 = vperm.xlu1 %5169, %v2125_v42   ;;  %v1582_v17 = vmul.f32 %v5707_v37, %v5880_v18 }
 0x2b2   : > { %v1428_v43 = vpop.permute.xlu0 %1427  ;;  %v6130_v51 = vpop.permute.xlu1 %1425  ;;  %v1390_v25 = vadd.f32 %v1374_v16, %v1262_v60 }
 0x2b3   : > { %9486 = vst [vmem:[#allocation85_spill] sm:$0xff] %v6130_v51  ;;  %v1451_v54 = vsel %vm865_vm1, %v6130_v51, %v1428_v43  ;;  %v1646_v43 = vmul.f32 %v5751_v47, %v5675_v24  ;;  %v1308_v24 = vsel %vm865_vm1, %v5902_v45, %v5927_v49  ;;  %v1584_v49 = vmul.f32 %v5701_v36, %v5916_v13 }
 0x2b4   : > { %v1518_v50 = vmul.f32 %v5659_v15, %v1451_v54  ;;  %2002 = vrot.lane.b32.xlu1 %v5895_v61, %s9177_s30  ;;  %v1333_v13 = vsel %vm865_vm1, 0.0, %v5938_v63  ;;  %s9583_s30 = smov 112  }
 0x2b6   : > { %v1534_v46 = vadd.f32 %v1518_v50, %v1390_v25  ;;  %v6144_v42 = vpop.permute.xlu1 %1747  ;;  %v9491_v50 = vmov 2  }
 0x2b7   : > { %9488 = vst [vmem:[#allocation86_spill] sm:$0xff] %v6144_v42 }
 0x2b8   : > { %v1598_v16 = vadd.f32 %v1582_v17, %v1534_v46  ;;  %2522 = vperm.xlu1 %5169, %v6140_v38   ;;  %v1376_v17 = vmul.f32 %v5655_v10, %v1308_v24 }
 0x2ba   : > { %v6149_v54 = vadd.f32 %v1646_v43, %v1598_v16  ;;  %v1168_v60 = vpop.permute.xlu0 %1167  ;;  %v6151_v12 = vpop.permute.xlu1 %1165 }
 0x2bb   : > { %v1188_v61 = vsel %vm865_vm1, %v6151_v12, %v1168_v60 }
 0x2bc   : > { %9489 = vst [vmem:[#allocation87_spill] sm:$0xff] %v6149_v54  ;;  %5170 = vset.pattern.permute.xlu1 %v9485_v23  ;;  %v1264_v25 = vmul.f32 %v5639_v0, %v1188_v61  ;;  %v1648_v61 = vmul.f32 %v5723_v41, %v5699_v35  ;;  %v1309_v35 = vsel %vm865_vm1, %v5938_v63, %v5954_v7 }
 0x2bd   : > { %2607 = vperm.xlu1 %5170, %v6140_v38  }
 0x2be   : > { %v6157_v18 = vpop.permute.xlu1 %1749  ;;  %v1432_v46 = vpop.permute.xlu0 %1431  ;;  %v1392_v60 = vadd.f32 %v1376_v17, %v1264_v25  ;;  %v6183_v25 = vld [vmem:[%s9487_s16 + $0x28] sm:$0xff] }
 0x2bf   : > { %9490 = vst [vmem:[#allocation88_spill] sm:$0xff] %v6157_v18  ;;  %2611 = vperm.xlu0 %5171, %v6183_v25  }
 0x2c1   : > { %5172 = vset.pattern.permute.xlu1 %v9491_v50 }
 0x2c2   : > { %v6165_v43 = vpop.permute.xlu1 %1429  ;;  %2715 = vperm.xlu1 %5172, %v6140_v38   ;;  %v6175_v42 = vpop.permute.xlu0 %1751 }
 0x2c3   : > { %v1452_v16 = vsel %vm865_vm1, %v6165_v43, %v1432_v46 }
 0x2c4   : > { %v1520_v18 = vmul.f32 %v5689_v32, %v1452_v16  ;;  %v6198_v16 = vld [vmem:[%s9487_s16 + $0x18] sm:$0xff] }
 0x2c5   : > { %2603 = vperm.xlu0 %5171, %v6198_v16  }
 0x2c6   : > { %v1536_v54 = vadd.f32 %v1520_v18, %v1392_v60  ;;  %v1170_v9 = vpop.permute.xlu1 %1169  ;;  %v1754_v0 = vpop.permute.xlu0 %1753  ;;  %2719 = vperm.xlu1 %5172, %v6183_v25   ;;  %v1377_v60 = vmul.f32 %v5629_v59, %v1333_v13  ;;  %v1586_v13 = vmul.f32 %v5643_v3, %v5958_v57 }
 0x2c7   : > { %v1213_v51 = vsel %vm865_vm1, 0.0, %v1170_v9 }
 0x2c8   : > { %v1600_v24 = vadd.f32 %v1584_v49, %v1536_v54  ;;  %v1265_v18 = vmul.f32 %v5856_v30, %v1213_v51  ;;  %v1378_v49 = vmul.f32 %v5629_v59, %v1309_v35  ;;  %v1585_v59 = vmul.f32 %v5643_v3, %v5946_v55 }
 0x2c9   : > { %5176 = vset.pattern.permute.xlu0 %v9491_v50  ;;  %v1650_v55 = vmul.f32 %v5669_v22, %v5737_v44  ;;  %v1713_v3 = vmul.f32 %v5715_v39, %v5967_v8  ;;  %v9494_v44 = vmov 3   ;;  %v1334_v8 = vsel %vm865_vm1, 0.0, %v5972_v29 }
 0x2ca   : > { %v6177_v15 = vadd.f32 %v1648_v61, %v1600_v24  ;;  %v9493_v24 = vmov 0  }
 0x2cb   : > { %5173 = vset.pattern.permute.xlu1 %v9493_v24 }
 0x2cc   : > { %9492 = vst [vmem:[#allocation89_spill] sm:$0xff] %v6177_v15  ;;  %2517 = vperm.xlu1 %5173, %v6198_v16  }
 0x2ce   : > { %v1172_v46 = vpop.permute.xlu1 %1171 }
 0x2cf   : > { %v1189_v54 = vsel %vm865_vm1, %v1170_v9, %v1172_v46 }
 0x2d0   : > { %v1266_v17 = vmul.f32 %v5856_v30, %v1189_v54  ;;  %v1393_v30 = vadd.f32 %v1377_v60, %v1265_v18  ;;  %v6218_v18 = vld [vmem:[%s9487_s16 + $0x10] sm:$0xff]  ;;  %5174 = vset.pattern.permute.xlu1 %v9485_v23  ;;  %v1714_v60 = vmul.f32 %v5715_v39, %v5970_v11  ;;  %v1310_v11 = vsel %vm865_vm1, %v5972_v29, %v6014_v1 }
 0x2d1   : > { %2599 = vperm.xlu1 %5174, %v6218_v18   ;;  %2707 = vperm.xlu0 %5176, %v6218_v18   ;;  %v1379_v29 = vmul.f32 %v5649_v6, %v1334_v8  ;;  %v1380_v1 = vmul.f32 %v5649_v6, %v1310_v11  ;;  %v9498_v8 = vld [vmem:[#allocation69_spill] sm:$0xff]  ;;  %v9499_v11 = vld [vmem:[#allocation15_spill] sm:$0xff] }
 0x2d2   : > { %v1436_v63 = vpop.permute.xlu0 %1435  ;;  %v1434_v7 = vpop.permute.xlu1 %1433  ;;  %v1394_v51 = vadd.f32 %v1378_v49, %v1266_v17 }
 0x2d3   : > { %v1453_v9 = vsel %vm865_vm1, %v1434_v7, %v1436_v63  ;;  %v1477_v61 = vsel %vm865_vm1, 0.0, %v1434_v7 }
 0x2d4   : > { %v1521_v46 = vmul.f32 %v5677_v26, %v1477_v61  ;;  %v1522_v54 = vmul.f32 %v5677_v26, %v1453_v9  ;;  %v1649_v26 = vmul.f32 %v5669_v22, %v5721_v40 }
 0x2d5   : > { %5175 = vset.pattern.permute.xlu1 %v9494_v44  ;;  %5179 = vset.pattern.permute.xlu0 %v9494_v44 }
 0x2d6   : > { %v1537_v35 = vadd.f32 %v1521_v46, %v1393_v30  ;;  %v1538_v63 = vadd.f32 %v1522_v54, %v1394_v51  ;;  %v1756_v7 = vpop.permute.xlu0 %1755  ;;  %v6213_v15 = vpop.permute.xlu1 %2012  ;;  %2763 = vperm.xlu1 %5175, %v6140_v38   ;;  %2755 = vperm.xlu0 %5179, %v6218_v18  }
 0x2d8   : > { %v1601_v17 = vadd.f32 %v1585_v59, %v1537_v35  ;;  %v1602_v57 = vadd.f32 %v1586_v13, %v1538_v63  ;;  %v1774_v59 = vsel %vm1769_vm8, %v1754_v0, %v1756_v7  ;;  %v1798_v13 = vsel %vm1769_vm8, %v1756_v7, 0.0 }
 0x2d9   : > { %v1842_v0 = vmul.f32 %v5769_v52, %v1774_v59  ;;  %v1843_v7 = vmul.f32 %v5769_v52, %v1798_v13 }
 0x2da   : > { %v1665_v49 = vadd.f32 %v1649_v26, %v1601_v17  ;;  %v1666_v9 = vadd.f32 %v1650_v55, %v1602_v57  ;;  %v2011_v40 = vpop.permute.xlu0 %2010  ;;  %v1758_v61 = vpop.permute.xlu1 %1757  ;;  %v1902_v26 = vsel %vm1769_vm8, %v5948_v56, %v5960_v4  ;;  %v1926_v55 = vsel %vm1769_vm8, %v5960_v4, 0.0  ;;  %2767 = vperm.xlu1 %5175, %v6183_v25  }
 0x2db   : > { %v9495_v56 = vmov 5  }
 0x2dc   : > { %v1729_v30 = vadd.f32 %v1713_v3, %v1665_v49  ;;  %v1730_v22 = vadd.f32 %v1714_v60, %v1666_v9  ;;  %5182 = vset.pattern.permute.xlu0 %v9495_v56  ;;  %v9496_v9 = vld [vmem:[#allocation23_spill] sm:$0xff] }
 0x2dd   : > { %2863 = vperm.xlu0 %5182, %v6183_v25  }
 0x2de   : > { %v1174_v51 = vpop.permute.xlu0 %1173  ;;  %v1176_v46 = vpop.permute.xlu1 %1175  ;;  %v1858_v13 = vadd.f32 %v1842_v0, %v1729_v30  ;;  %5177 = vset.pattern.permute.xlu1 %v9491_v50  ;;  %v2054_v30 = vsel %vm1769_vm8, %v6213_v15, 0.0 }
 0x2df   : > { %v1214_v39 = vsel %vm865_vm1, 0.0, %v1174_v51  ;;  %v1190_v54 = vsel %vm865_vm1, %v1174_v51, %v1176_v46  ;;  %v1651_v51 = vmul.f32 %v9496_v9, %v5753_v48  ;;  %v9497_v46 = vld [vmem:[#allocation32_spill] sm:$0xff]  ;;  %2711 = vperm.xlu1 %5177, %v6198_v16  }
 0x2e0   : > { %v1267_v35 = vmul.f32 %v5627_v58, %v1214_v39  ;;  %v1268_v63 = vmul.f32 %v5627_v58, %v1190_v54  ;;  %v1652_v52 = vmul.f32 %v9496_v9, %v9497_v46  ;;  %v1587_v39 = vmul.f32 %v9499_v11, %v9498_v8  ;;  %v9500_v54 = vld [vmem:[#allocation70_spill] sm:$0xff] }
 0x2e1   : > { %v1588_v59 = vmul.f32 %v9499_v11, %v9500_v54  ;;  %v9504_v9 = vld [vmem:[#allocation74_spill] sm:$0xff] }
 0x2e2   : > { %v1440_v17 = vpop.permute.xlu0 %1439  ;;  %v1438_v57 = vpop.permute.xlu1 %1437  ;;  %v1395_v60 = vadd.f32 %v1379_v29, %v1267_v35  ;;  %v1396_v4 = vadd.f32 %v1380_v1, %v1268_v63  ;;  %v1859_v35 = vadd.f32 %v1843_v7, %v1730_v22  ;;  %v2030_v22 = vsel %vm1769_vm8, %v2011_v40, %v6213_v15 }
 0x2e3   : > { %v1454_v58 = vsel %vm865_vm1, %v1438_v57, %v1440_v17  ;;  %v1478_v3 = vsel %vm865_vm1, 0.0, %v1438_v57  ;;  %v9502_v57 = vld [vmem:[#allocation73_spill] sm:$0xff] }
 0x2e4   : > { %v1523_v49 = vmul.f32 %v5635_v62, %v1478_v3  ;;  %v1524_v6 = vmul.f32 %v5635_v62, %v1454_v58  ;;  %v9501_v62 = vld [vmem:[#allocation39_spill] sm:$0xff]  ;;  %v9503_v58 = vld [vmem:[#allocation26_spill] sm:$0xff] }
 0x2e5   : > { %v1970_v17 = vmul.f32 %v9501_v62, %v1902_v26  ;;  %v1971_v48 = vmul.f32 %v9501_v62, %v1926_v55  ;;  %v1715_v3 = vmul.f32 %v9503_v58, %v9502_v57  ;;  %v1716_v46 = vmul.f32 %v9503_v58, %v9504_v9  ;;  %v9506_v55 = vld [vmem:[#allocation72_spill] sm:$0xff] }
 0x2e6   : > { %v1539_v63 = vadd.f32 %v1523_v49, %v1395_v60  ;;  %v1540_v29 = vadd.f32 %v1524_v6, %v1396_v4  ;;  %v1760_v1 = vpop.permute.xlu1 %1759  ;;  %v2017_v60 = vpop.permute.xlu0 %2016  ;;  %v9505_v26 = vmov 4   ;;  %v9507_v4 = vld [vmem:[#allocation71_spill] sm:$0xff]  ;;  %v1927_v6 = vsel %vm1769_vm8, %v9506_v55, 0.0 }
 0x2e7   : > { %5183 = vset.pattern.permute.xlu0 %v9505_v26  ;;  %v1903_v49 = vsel %vm1769_vm8, %v9507_v4, %v9506_v55  ;;  %v1775_v8 = vsel %vm1769_vm8, %v1758_v61, %v1760_v1  ;;  %v1799_v11 = vsel %vm1769_vm8, %v1760_v1, 0.0  ;;  %v1987_v54 = vadd.f32 %v1971_v48, %v1859_v35  ;;  %5178 = vset.pattern.permute.xlu1 %v9505_v26  ;;  %v9509_v61 = vld [vmem:[#allocation31_spill] sm:$0xff] }
 0x2e8   : > { %v1603_v0 = vadd.f32 %v1587_v39, %v1539_v63  ;;  %v1604_v7 = vadd.f32 %v1588_v59, %v1540_v29  ;;  %2815 = vperm.xlu0 %5183, %v6183_v25   ;;  %v1986_v15 = vadd.f32 %v1970_v17, %v1858_v13  ;;  %v9508_v63 = vld [vmem:[#allocation45_spill] sm:$0xff]  ;;  %v2055_v57 = vsel %vm1769_vm8, %v2017_v60, 0.0  ;;  %2811 = vperm.xlu1 %5178, %v6140_v38  }
 0x2e9   : > { %v2099_v29 = vmul.f32 %v9508_v63, %v2054_v30  ;;  %v2098_v62 = vmul.f32 %v9508_v63, %v2030_v22  ;;  %v1844_v55 = vmul.f32 %v9509_v61, %v1775_v8  ;;  %v1845_v1 = vmul.f32 %v9509_v61, %v1799_v11  ;;  %v9510_v13 = vld [vmem:[#allocation41_spill] sm:$0xff]  ;;  %v9517_v61 = vld [vmem:[#allocation14_spill] sm:$0xff] }
 0x2ea   : > { %v1667_v40 = vadd.f32 %v1651_v51, %v1603_v0  ;;  %v1668_v39 = vadd.f32 %v1652_v52, %v1604_v7  ;;  %v2015_v59 = vpop.permute.xlu1 %2014  ;;  %v1972_v51 = vmul.f32 %v9510_v13, %v1903_v49  ;;  %v1973_v52 = vmul.f32 %v9510_v13, %v1927_v6  ;;  %v9512_v49 = vld [vmem:[#allocation75_spill] sm:$0xff] }
 0x2eb   : > { %v2031_v35 = vsel %vm1769_vm8, %v2015_v59, %v2017_v60  ;;  %v2115_v17 = vadd.f32 %v2099_v29, %v1987_v54  ;;  %v2114_v48 = vadd.f32 %v2098_v62, %v1986_v15  ;;  %v1335_v60 = vsel %vm865_vm1, 0.0, %v9512_v49  ;;  %v9514_v54 = vld [vmem:[#allocation54_spill] sm:$0xff]  ;;  %v9515_v29 = vld [vmem:[#allocation53_spill] sm:$0xff] }
 0x2ec   : > { %v1731_v58 = vadd.f32 %v1715_v3, %v1667_v40  ;;  %v1732_v9 = vadd.f32 %v1716_v46, %v1668_v39  ;;  %2803 = vperm.xlu0 %5183, %v6218_v18   ;;  %v9511_v46 = vld [vmem:[#allocation48_spill] sm:$0xff]  ;;  %5180 = vset.pattern.permute.xlu1 %v9494_v44  ;;  %v9513_v6 = vmov 6  }
 0x2ed   : > { %v2101_v0 = vmul.f32 %v9511_v46, %v2055_v57  ;;  %v2100_v8 = vmul.f32 %v9511_v46, %v2031_v35  ;;  %2759 = vperm.xlu1 %5180, %v6198_v16   ;;  %v2178_v15 = vadd.f32 %v9514_v54, %v2114_v48  ;;  %v2179_v63 = vadd.f32 %v9514_v54, %v2115_v17  ;;  %v9516_v57 = vld [vmem:[#allocation55_spill] sm:$0xff] }
 0x2ee   : > { %v1860_v30 = vadd.f32 %v1844_v55, %v1731_v58  ;;  %v1861_v22 = vadd.f32 %v1845_v1, %v1732_v9  ;;  %v1178_v3 = vpop.permute.xlu1 %1177  ;;  %v1381_v55 = vmul.f32 %v9517_v61, %v1335_v60  ;;  %v1311_v17 = vsel %vm865_vm1, %v9512_v49, %v6032_v53  ;;  %v9519_v60 = vld [vmem:[#allocation10_spill] sm:$0xff] }
 0x2ef   : > { %v1215_v11 = vsel %vm865_vm1, 0.0, %v1178_v3  ;;  %v2194_v1 = vmax.f32 %v2178_v15, 0.0  ;;  %v2195_v35 = vmax.f32 %v2179_v63, 0.0  ;;  %v1589_v54 = vmul.f32 %v9519_v60, %v6028_v34  ;;  %v9522_v63 = vld [vmem:[#allocation12_spill] sm:$0xff] }
 0x2f0   : > { %v1989_v7 = vadd.f32 %v1973_v52, %v1861_v22  ;;  %v1988_v4 = vadd.f32 %v1972_v51, %v1860_v30  ;;  %5186 = vset.pattern.permute.xlu0 %v9513_v6  ;;  %v1269_v62 = vmul.f32 %v9515_v29, %v1215_v11  ;;  %v1382_v15 = vmul.f32 %v9517_v61, %v1311_v17  ;;  %v9523_v61 = vld [vmem:[#allocation77_spill] sm:$0xff] }
 0x2f1   : > { %2959 = vperm.xlu0 %5186, %v6183_v25   ;;  %5181 = vset.pattern.permute.xlu1 %v9495_v56  ;;  %v9520_v49 = vmov 7  }
 0x2f2   : > { %v2116_v40 = vadd.f32 %v2100_v8, %v1988_v4  ;;  %v6312_v39 = vpop.permute.xlu1 %1761  ;;  %v2117_v59 = vadd.f32 %v2101_v0, %v1989_v7  ;;  %2859 = vperm.xlu1 %5181, %v6140_v38   ;;  %v1397_v30 = vadd.f32 %v1381_v55, %v1269_v62  ;;  %v9518_v0 = vld [vmem:[#allocation9_spill] sm:$0xff]  ;;  %v9524_v55 = vld [vmem:[#allocation27_spill] sm:$0xff] }
 0x2f4   : > { %v2180_v58 = vadd.f32 %v9516_v57, %v2116_v40  ;;  %v2181_v9 = vadd.f32 %v9516_v57, %v2117_v59  ;;  %v9521_v59 = vld [vmem:[#allocation36_spill] sm:$0xff] }
 0x2f5   : > { %2951 = vperm.xlu0 %5186, %v6198_v16  }
 0x2f6   : > { %v2196_v13 = vmax.f32 %v2180_v58, 0.0  ;;  %v1442_v51 = vpop.permute.xlu0 %1441  ;;  %v1180_v52 = vpop.permute.xlu1 %1179  ;;  %v2197_v48 = vmax.f32 %v2181_v9, 0.0  ;;  %5184 = vset.pattern.permute.xlu1 %v9505_v26  ;;  %v1590_v9 = vmul.f32 %v9519_v60, %v6039_v20  ;;  %v1718_v20 = vmul.f32 %v9524_v55, %v6052_v5 }
 0x2f7   : > { %v1479_v22 = vsel %vm865_vm1, 0.0, %v1442_v51  ;;  %v1191_v46 = vsel %vm865_vm1, %v1178_v3, %v1180_v52  ;;  %2807 = vperm.xlu1 %5184, %v6198_v16  }
 0x2f8   : > { %v1525_v7 = vmul.f32 %v9518_v0, %v1479_v22  ;;  %v1270_v4 = vmul.f32 %v9515_v29, %v1191_v46  ;;  %v6330_v8 = vpack.c.bf16 %v2197_v48, %v2195_v35  ;;  %v6332_v11 = vpack.c.bf16 %v2196_v13, %v2194_v1  ;;  %v9525_v35 = vld [vmem:[#allocation38_spill] sm:$0xff] }
 0x2f9   : > { %5190 = vset.pattern.permute.xlu0 %v9520_v49  ;;  %v1653_v29 = vmul.f32 %v9522_v63, %v9521_v59  ;;  %v1717_v1 = vmul.f32 %v9524_v55, %v9523_v61  ;;  %v1654_v48 = vmul.f32 %v9522_v63, %v9525_v35  ;;  %v1331_v59 = vsel %vm865_vm1, 0.0, %v5865_v28  ;;  %v9529_v63 = vld [vmem:[#allocation8_spill] sm:$0xff]  ;;  %v9531_v28 = vld [vmem:[#allocation25_spill] sm:$0xff] }
 0x2fa   : > { %v1541_v40 = vadd.f32 %v1525_v7, %v1397_v30  ;;  %v1444_v53 = vpop.permute.xlu1 %1443  ;;  %3051 = vperm.xlu0 %5190, %v6140_v38   ;;  %v1398_v57 = vadd.f32 %v1382_v15, %v1270_v4  ;;  %v6344_v34 = vpop.permute.xlu0 %2018  ;;  %v9526_v7 = vmov 8   ;;  %v9527_v15 = vld [vmem:[#allocation79_spill] sm:$0xff]  ;;  %v9530_v61 = vld [vmem:[#allocation40_spill] sm:$0xff] }
 0x2fb   : > { %v1455_v3 = vsel %vm865_vm1, %v1442_v51, %v1444_v53  ;;  %5185 = vset.pattern.permute.xlu1 %v9513_v6  ;;  %v1336_v5 = vsel %vm865_vm1, 0.0, %v9527_v15  ;;  %v1655_v55 = vmul.f32 %v9531_v28, %v9530_v61  ;;  %v1929_v61 = vsel %vm1769_vm8, %v6107_v14, 0.0 }
 0x2fc   : > { %v1605_v62 = vadd.f32 %v1589_v54, %v1541_v40  ;;  %v1526_v58 = vmul.f32 %v9518_v0, %v1455_v3  ;;  %2955 = vperm.xlu1 %5185, %v6140_v38   ;;  %v9528_v40 = vld [vmem:[#allocation7_spill] sm:$0xff]  ;;  %v6376_v3 = vmul.f32 %v5751_v47, %v5667_v21 }
 0x2fe   : > { %v1542_v13 = vadd.f32 %v1526_v58, %v1398_v57  ;;  %v1669_v51 = vadd.f32 %v1653_v29, %v1605_v62  ;;  %v1764_v52 = vpop.permute.xlu1 %1763  ;;  %3043 = vperm.xlu0 %5190, %v6218_v18   ;;  %v1182_v46 = vpop.permute.xlu0 %1181  ;;  %v1383_v29 = vmul.f32 %v9529_v63, %v1336_v5  ;;  %v6384_v58 = vmul.f32 %v5723_v41, %v5691_v33 }
 0x2ff   : > { %v1216_v60 = vsel %vm865_vm1, 0.0, %v1182_v46  ;;  %v6398_v41 = vmul.f32 %v5641_v2, %v1331_v59 }
 0x300   : > { %v1606_v17 = vadd.f32 %v1590_v9, %v1542_v13  ;;  %v6355_v30 = vadd.f32 %v1717_v1, %v1669_v51  ;;  %5187 = vset.pattern.permute.xlu1 %v9495_v56  ;;  %v1271_v53 = vmul.f32 %v9528_v40, %v1216_v60  ;;  %v1312_v9 = vsel %vm865_vm1, %v9527_v15, %v6094_v31  ;;  %v9532_v13 = vld [vmem:[#allocation22_spill] sm:$0xff] }
 0x301   : > { %2851 = vperm.xlu1 %5187, %v6218_v18   ;;  %v1384_v15 = vmul.f32 %v9529_v63, %v1312_v9 }
 0x302   : > { %v1670_v22 = vadd.f32 %v1654_v48, %v1606_v17  ;;  %v6360_v0 = vpop.permute.xlu1 %2020  ;;  %5194 = vset.pattern.permute.xlu0 %v9526_v7  ;;  %v1399_v1 = vadd.f32 %v1383_v29, %v1271_v53  ;;  %v9533_v48 = vld [vmem:[#allocation44_spill] sm:$0xff]  ;;  %v9534_v17 = vld [vmem:[#allocation58_spill] sm:$0xff] }
 0x303   : > { %3143 = vperm.xlu0 %5194, %v6198_v16   ;;  %v1656_v33 = vmul.f32 %v9531_v28, %v9533_v48  ;;  %v6402_v31 = vmul.f32 %v5707_v37, %v9534_v17  ;;  %v9536_v37 = vld [vmem:[#allocation78_spill] sm:$0xff]  ;;  %v9537_v53 = vld [vmem:[#allocation76_spill] sm:$0xff]  ;;  %v9539_v28 = vld [vmem:[#allocation81_spill] sm:$0xff] }
 0x304   : > { %v1734_v4 = vadd.f32 %v1718_v20, %v1670_v22  ;;  %v1800_v20 = vsel %vm1769_vm8, %v1764_v52, 0.0  ;;  %v1332_v22 = vsel %vm865_vm1, 0.0, %v5902_v45  ;;  %v1904_v59 = vsel %vm1769_vm8, %v9537_v53, %v9536_v37  ;;  %v9541_v48 = vld [vmem:[#allocation16_spill] sm:$0xff] }
 0x305   : > { %2855 = vperm.xlu1 %5187, %v6198_v16   ;;  %v1928_v29 = vsel %vm1769_vm8, %v9536_v37, 0.0  ;;  %v1776_v45 = vsel %vm1769_vm8, %v6312_v39, %v1764_v52  ;;  %v1212_v39 = vsel %vm865_vm1, 0.0, %v6151_v12  ;;  %v9544_v37 = vld [vmem:[#allocation37_spill] sm:$0xff] }
 0x306   : > { %v6367_v54 = vpop.permute.xlu1 %1765  ;;  %v1974_v53 = vmul.f32 %v9544_v37, %v1904_v59  ;;  %v1975_v12 = vmul.f32 %v9544_v37, %v1928_v29  ;;  %v2056_v59 = vsel %vm1769_vm8, %v6360_v0, 0.0  ;;  %v9548_v29 = vld [vmem:[#allocation85_spill] sm:$0xff] }
 0x307   : > { %5195 = vset.pattern.permute.xlu0 %v9493_v24 }
 0x308   : > { %2527 = vperm.xlu0 %5195, %v6183_v25  }
 0x309   : > { %5188 = vset.pattern.permute.xlu1 %v9520_v49 }
 0x30a   : > { %v1446_v62 = vpop.permute.xlu0 %1445  ;;  %v1184_v57 = vpop.permute.xlu1 %1183  ;;  %3055 = vperm.xlu1 %5188, %v6183_v25  }
 0x30b   : > { %v1480_v21 = vsel %vm865_vm1, 0.0, %v1446_v62  ;;  %v1192_v47 = vsel %vm865_vm1, %v1182_v46, %v1184_v57  ;;  %v9535_v46 = vld [vmem:[#allocation11_spill] sm:$0xff]  ;;  %v9538_v57 = vld [vmem:[#allocation30_spill] sm:$0xff] }
 0x30c   : > { %v1527_v51 = vmul.f32 %v9532_v13, %v1480_v21  ;;  %v1272_v35 = vmul.f32 %v9528_v40, %v1192_v47  ;;  %v1591_v60 = vmul.f32 %v9535_v46, %v6062_v27  ;;  %v1847_v63 = vmul.f32 %v9538_v57, %v1800_v20 }
 0x30d   : > { %v1846_v52 = vmul.f32 %v9538_v57, %v1776_v45 }
 0x30e   : > { %v1543_v5 = vadd.f32 %v1527_v51, %v1399_v1  ;;  %v6411_v40 = vpop.permute.xlu0 %1874  ;;  %v1448_v2 = vpop.permute.xlu1 %1447  ;;  %v1400_v21 = vadd.f32 %v1384_v15, %v1272_v35  ;;  %v1592_v1 = vmul.f32 %v9535_v46, %v9539_v28  ;;  %v9540_v51 = vld [vmem:[#allocation82_spill] sm:$0xff]  ;;  %5189 = vset.pattern.permute.xlu1 %v9513_v6  ;;  %v1375_v15 = vmul.f32 %v5655_v10, %v1332_v22  ;;  %v9542_v46 = vld [vmem:[#allocation63_spill] sm:$0xff]  ;;  %v9547_v22 = vld [vmem:[#allocation13_spill] sm:$0xff] }
 0x30f   : > { %v1456_v27 = vsel %vm865_vm1, %v1446_v62, %v1448_v2  ;;  %v1719_v17 = vmul.f32 %v9541_v48, %v9540_v51  ;;  %v1863_v62 = vadd.f32 %v1847_v63, %v1734_v4  ;;  %2947 = vperm.xlu1 %5189, %v6218_v18   ;;  %v9545_v4 = vld [vmem:[#allocation28_spill] sm:$0xff]  ;;  %v9546_v63 = vld [vmem:[#allocation83_spill] sm:$0xff]  ;;  %v1211_v10 = vsel %vm865_vm1, 0.0, %v6121_v19 }
 0x310   : > { %v1607_v9 = vadd.f32 %v1591_v60, %v1543_v5  ;;  %v1528_v47 = vmul.f32 %v9532_v13, %v1456_v27  ;;  %v9543_v5 = vld [vmem:[#allocation29_spill] sm:$0xff]  ;;  %v1977_v45 = vmul.f32 %v9545_v4, %v1929_v61  ;;  %v1476_v27 = vsel %vm865_vm1, 0.0, %v6165_v43 }
 0x311   : > { %v1710_v2 = vmul.f32 %v9543_v5, %v9542_v46  ;;  %v1862_v61 = vadd.f32 %v1846_v52, %v6355_v30  ;;  %v1991_v28 = vadd.f32 %v1975_v12, %v1863_v62  ;;  %v2032_v19 = vsel %vm1769_vm8, %v6344_v34, %v6360_v0  ;;  %v9550_v52 = vld [vmem:[#allocation24_spill] sm:$0xff] }
 0x312   : > { %v1544_v20 = vadd.f32 %v1528_v47, %v1400_v21  ;;  %v6433_v60 = vpop.permute.xlu0 %2004  ;;  %v6435_v35 = vpop.permute.xlu1 %1878  ;;  %v1671_v13 = vadd.f32 %v1655_v55, %v1607_v9  ;;  %v1720_v9 = vmul.f32 %v9541_v48, %v9546_v63  ;;  %v1263_v21 = vmul.f32 %v9547_v22, %v1212_v39  ;;  %v9552_v0 = vld [vmem:[#allocation56_spill] sm:$0xff] }
 0x313   : > { %v1475_v47 = vsel %vm865_vm1, 0.0, %v9548_v29  ;;  %5191 = vset.pattern.permute.xlu1 %v9526_v7  ;;  %v1261_v46 = vmul.f32 %v9552_v0, %v1211_v10  ;;  %v1990_v12 = vadd.f32 %v1974_v53, %v1862_v61  ;;  %v9553_v22 = vld [vmem:[#allocation64_spill] sm:$0xff]  ;;  %v9554_v29 = vld [vmem:[#allocation65_spill] sm:$0xff]  ;;  %v9557_v10 = vld [vmem:[#allocation46_spill] sm:$0xff] }
 0x314   : > { %v1608_v57 = vadd.f32 %v1592_v1, %v1544_v20  ;;  %v1735_v55 = vadd.f32 %v1719_v17, %v1671_v13  ;;  %v1519_v17 = vmul.f32 %v5689_v32, %v1476_v27  ;;  %v9549_v20 = vld [vmem:[#allocation33_spill] sm:$0xff]  ;;  %3147 = vperm.xlu1 %5191, %v6140_v38   ;;  %v9551_v32 = vld [vmem:[#allocation80_spill] sm:$0xff]  ;;  %v1583_v38 = vmul.f32 %v5701_v36, %v9554_v29  ;;  %v9560_v36 = vld [vmem:[#allocation87_spill] sm:$0xff] }
 0x315   : > { %v2103_v13 = vmul.f32 %v9549_v20, %v2056_v59  ;;  %v1905_v34 = vsel %vm1769_vm8, %v9551_v32, %v6107_v14  ;;  %v2102_v27 = vmul.f32 %v9549_v20, %v2032_v19  ;;  %v1924_v59 = vsel %vm1769_vm8, %v9553_v22, 0.0  ;;  %v9559_v19 = vld [vmem:[#allocation35_spill] sm:$0xff] }
 0x316   : > { %v1672_v43 = vadd.f32 %v1656_v33, %v1608_v57  ;;  %v2025_v1 = vpop.permute.xlu0 %2024  ;;  %v1768_v51 = vpop.permute.xlu1 %1767  ;;  %v1976_v20 = vmul.f32 %v9545_v4, %v1905_v34  ;;  %v9561_v32 = vld [vmem:[#allocation47_spill] sm:$0xff] }
 0x317   : > { %v1777_v48 = vsel %vm1769_vm8, %v6367_v54, %v1768_v51  ;;  %v1801_v39 = vsel %vm1769_vm8, %v1768_v51, 0.0  ;;  %v1391_v54 = vadd.f32 %v1375_v15, %v1263_v21  ;;  %v2057_v37 = vsel %vm1769_vm8, %v2025_v1, 0.0 }
 0x318   : > { %v1736_v30 = vadd.f32 %v1720_v9, %v1672_v43  ;;  %v1848_v33 = vmul.f32 %v9550_v52, %v1777_v48  ;;  %v1849_v62 = vmul.f32 %v9550_v52, %v1801_v39  ;;  %v2119_v57 = vadd.f32 %v2103_v13, %v1991_v28  ;;  %v9555_v43 = vld [vmem:[#allocation19_spill] sm:$0xff]  ;;  %v9556_v48 = vld [vmem:[#allocation86_spill] sm:$0xff]  ;;  %3151 = vperm.xlu1 %5191, %v6183_v25  }
 0x319   : > { %v1517_v51 = vmul.f32 %v9555_v43, %v1475_v47  ;;  %v1535_v14 = vadd.f32 %v1519_v17, %v1391_v54  ;;  %v1796_v15 = vsel %vm1769_vm8, %v9556_v48, 0.0  ;;  %v2105_v21 = vmul.f32 %v9557_v10, %v2057_v37  ;;  %v9558_v28 = vld [vmem:[#allocation66_spill] sm:$0xff] }
 0x31a   : > { %v1865_v63 = vadd.f32 %v1849_v62, %v1736_v30  ;;  %v2009_v9 = vpop.permute.xlu1 %2008  ;;  %v1864_v53 = vadd.f32 %v1848_v33, %v1735_v55  ;;  %v1712_v39 = vmul.f32 %v9559_v19, %v9558_v28  ;;  %v1389_v13 = vadd.f32 %v6398_v41, %v1261_v46  ;;  %v9562_v33 = vld [vmem:[#allocation34_spill] sm:$0xff]  ;;  %v9563_v41 = vld [vmem:[#allocation49_spill] sm:$0xff] }
 0x31b   : > { %v1726_v30 = vadd.f32 %v1710_v2, %v9560_v36  ;;  %v1797_v47 = vsel %vm1769_vm8, %v6175_v42, 0.0  ;;  %v2118_v17 = vadd.f32 %v2102_v27, %v1990_v12  ;;  %v2183_v55 = vadd.f32 %v9561_v32, %v2119_v57  ;;  %v9564_v2 = vld [vmem:[#allocation89_spill] sm:$0xff]  ;;  %v9565_v12 = vld [vmem:[#allocation67_spill] sm:$0xff]  ;;  %v9566_v57 = vld [vmem:[#allocation42_spill] sm:$0xff] }
 0x31c   : > { %v1993_v61 = vadd.f32 %v1977_v45, %v1865_v63  ;;  %v1533_v45 = vadd.f32 %v1517_v51, %v1389_v13  ;;  %v1839_v25 = vmul.f32 %v9562_v33, %v1796_v15  ;;  %v1599_v0 = vadd.f32 %v1583_v38, %v1535_v14  ;;  %5192 = vset.pattern.permute.xlu1 %v9520_v49  ;;  %v9567_v15 = vld [vmem:[#allocation43_spill] sm:$0xff] }
 0x31d   : > { %v1992_v37 = vadd.f32 %v1976_v20, %v1864_v53  ;;  %v1728_v46 = vadd.f32 %v1712_v39, %v9564_v2  ;;  %v1925_v27 = vsel %vm1769_vm8, %v9565_v12, 0.0  ;;  %v1841_v29 = vmul.f32 %v9566_v57, %v1797_v47  ;;  %3047 = vperm.xlu1 %5192, %v6198_v16   ;;  %v9568_v39 = vld [vmem:[#allocation52_spill] sm:$0xff] }
 0x31e   : > { %v2023_v52 = vpop.permute.xlu1 %2022  ;;  %v2121_v62 = vadd.f32 %v2105_v21, %v1993_v61  ;;  %v1855_v63 = vadd.f32 %v1839_v25, %v1726_v30  ;;  %v2052_v38 = vsel %vm1769_vm8, %v6433_v60, 0.0  ;;  %v2199_v51 = vmax.f32 %v2183_v55, 0.0  ;;  %v9569_v30 = vld [vmem:[#allocation68_spill] sm:$0xff]  ;;  %v9572_v55 = vld [vmem:[#allocation50_spill] sm:$0xff] }
 0x31f   : > { %v2033_v54 = vsel %vm1769_vm8, %v2023_v52, %v2025_v1  ;;  %v2182_v1 = vadd.f32 %v9561_v32, %v2118_v17  ;;  %v1597_v21 = vadd.f32 %v6402_v31, %v1533_v45  ;;  %v1663_v53 = vadd.f32 %v6384_v58, %v1599_v0  ;;  %v9570_v17 = vld [vmem:[#allocation51_spill] sm:$0xff] }
 0x320   : > { %v2104_v4 = vmul.f32 %v9557_v10, %v2033_v54  ;;  %v2185_v34 = vadd.f32 %v9563_v41, %v2121_v62  ;;  %v1967_v10 = vmul.f32 %v9567_v15, %v1924_v59  ;;  %v2053_v61 = vsel %vm1769_vm8, %v2009_v9, 0.0  ;;  %v9571_v59 = vld [vmem:[#allocation88_spill] sm:$0xff] }
 0x321   : > { %v2095_v20 = vmul.f32 %v9568_v39, %v2052_v38  ;;  %v1857_v16 = vadd.f32 %v1841_v29, %v1728_v46  ;;  %v1711_v47 = vmul.f32 %v9559_v19, %v9569_v30  ;;  %v1969_v52 = vmul.f32 %v9570_v17, %v1925_v27  ;;  %5193 = vset.pattern.permute.xlu1 %v9526_v7 }
 0x322   : > { %v2120_v43 = vadd.f32 %v2104_v4, %v1992_v37  ;;  %v2201_v14 = vmax.f32 %v2185_v34, 0.0  ;;  %v1773_v31 = vsel %vm1769_vm8, %v9571_v59, %v6175_v42  ;;  %v1983_v62 = vadd.f32 %v1967_v10, %v1855_v63  ;;  %3139 = vperm.xlu1 %5193, %v6218_v18   ;;  %v9573_v34 = vld [vmem:[#allocation62_spill] sm:$0xff] }
 0x323   : > { %v2143_v28 = vpop.permute.xlu0 %2142  ;;  %v2198_v58 = vmax.f32 %v2182_v1, 0.0  ;;  %v1901_v32 = vsel %vm1769_vm8, %v6435_v35, %v9565_v12  ;;  %v2097_v45 = vmul.f32 %v9572_v55, %v2053_v61  ;;  %v1661_v19 = vadd.f32 %v6376_v3, %v1597_v21  ;;  %v9574_v35 = vld [vmem:[#allocation84_spill] sm:$0xff] }
 0x324   : > { %v2184_v13 = vadd.f32 %v9563_v41, %v2120_v43  ;;  %v2213_v36 = vpack.c.bf16 %v2201_v14, %v2199_v51  ;;  %v1727_v0 = vadd.f32 %v1711_v47, %v1663_v53  ;;  %v2111_v37 = vadd.f32 %v2095_v20, %v1983_v62 }
 0x325   : > { %v1985_v41 = vadd.f32 %v1969_v52, %v1857_v16  ;;  %v1709_v2 = vmul.f32 %v9543_v5, %v9573_v34  ;;  %v1772_v46 = vsel %vm1769_vm8, %v9574_v35, %v9556_v48  ;;  %v1840_v12 = vmul.f32 %v9566_v57, %v1773_v31 }
 0x326   : > { %v2200_v25 = vmax.f32 %v2184_v13, 0.0  ;;  %2249 = vmatprep.subr.bf16.mxu0 %v2213_v36  ;;  %v1968_v27 = vmul.f32 %v9570_v17, %v1901_v32  ;;  %v1900_v3 = vsel %vm1769_vm8, %v6411_v40, %v9553_v22  ;;  %v2175_v63 = vadd.f32 %v2143_v28, %v2111_v37  ;;  %5196 = vset.pattern.permute.xlu1 %v9493_v24 }
 0x327   : > { %v2007_v54 = vpop.permute.xlu0 %2006  ;;  %v1725_v29 = vadd.f32 %v1709_v2, %v1661_v19  ;;  %v1856_v38 = vadd.f32 %v1840_v12, %v1727_v0  ;;  %v1838_v57 = vmul.f32 %v9562_v33, %v1772_v46  ;;  %v1966_v43 = vmul.f32 %v9567_v15, %v1900_v3  ;;  %v3182_v3 = vld [vmem:[%s9050_s8 + $0x20] sm:$0xff] }
 0x328   : > { %v2029_v42 = vsel %vm1769_vm8, %v2007_v54, %v2009_v9  ;;  %v2212_v4 = vpack.c.bf16 %v2200_v25, %v2198_v58  ;;  %v2113_v9 = vadd.f32 %v2097_v45, %v1985_v41  ;;  %v2191_v14 = vmax.f32 %v2175_v63, 0.0 }
 0x329   : > { %v2096_v5 = vmul.f32 %v9572_v55, %v2029_v42  ;;  %v1984_v51 = vadd.f32 %v1968_v27, %v1856_v38  ;;  %v1854_v22 = vadd.f32 %v1838_v57, %v1725_v29 }
 0x32a   : > { %2250 = vmatpush1.bf16.msra.mxu0 %v2212_v4 }
 0x32b   : > { %v2148_v1 = vpop.permute.xlu1 %2147  ;;  %2251 = vmatprep.subr.bf16.mxu0 %v6330_v8  ;;  %v2112_v10 = vadd.f32 %v2096_v5, %v1984_v51  ;;  %v1982_v20 = vadd.f32 %v1966_v43, %v1854_v22 }
 0x32c   : > { %v2177_v48 = vadd.f32 %v2148_v1, %v2113_v9  ;;  %v3183_v9 = vld [vmem:[%s9050_s8 + $0x28] sm:$0xff] }
 0x32d   : > { %v2176_v13 = vadd.f32 %v2148_v1, %v2112_v10 }
 0x32e   : > { %v2193_v40 = vmax.f32 %v2177_v48, 0.0  ;;  %2252 = vmatpush1.bf16.msra.mxu0 %v6332_v11  ;;  %v5259_v11 = vld [vmem:[%s9575_s27] sm:$0xff]  }
 0x32f   : > { %v2003_v21 = vpop.permute.xlu1 %2002  ;;  %v2192_v15 = vmax.f32 %v2176_v13, 0.0 }
 0x330   : > { %v2028_v53 = vsel %vm1769_vm8, %v2003_v21, %v6433_v60  ;;  %v2209_v61 = vpack.c.bf16 %v2193_v40, %v2191_v14  ;;  %v5260_v60 = vld [vmem:[%s9575_s27 + $0x8] sm:$0xff]  }
 0x331   : > { %v2094_v8 = vmul.f32 %v9568_v39, %v2028_v53 }
 0x332   : > { %2253 = vmatprep.subr.bf16.mxu0 %v2209_v61 }
 0x333   : > { %v2110_v33 = vadd.f32 %v2094_v8, %v1982_v20  ;;  %v6556_v39 = vpop.permute.xlu1 %2522 }
 0x335   : > { %v2174_v36 = vadd.f32 %v2143_v28, %v2110_v33  ;;  %v5261_v28 = vld [vmem:[%s9575_s27 + $0x10] sm:$0xff]  }
 0x337   : > { %v2190_v16 = vmax.f32 %v2174_v36, 0.0 }
 0x338   : > { %v6562_v52 = vpop.permute.xlu1 %2607 }
 0x339   : > { %v2208_v30 = vpack.c.bf16 %v2192_v15, %v2190_v16 }
 0x33a   : > { %v6636_v2 = vpop.permute.xlu0 %2611 }
 0x33b   : > { %2254 = vmatpush1.bf16.msra.mxu0 %v2208_v30  ;;  %9585 = vst [vmem:[#allocation26_spill] sm:$0xff] %v6636_v2 }
 0x33d   : > { %v6570_v58 = vpop.permute.xlu1 %2715 }
 0x33e   : > { %5057 = vmatmul.mubr.msk.bf16.vlgmr.msra.gmra.mxu0 %vm2229_vm9, %v5259_v11  ;;  %v9603_v11 = vld [vmem:[#allocation57_spill] sm:$0xff] }
 0x33f   : > { %2281 = vmatprep.mubr.bf16.mxu0 %v9493_v24 }
 0x340   : > { %v6650_v12 = vpop.permute.xlu0 %2603 }
 0x341   : > { %v6582_v55 = vpop.permute.xlu1 %2719 }
 0x342   : > { %9581 = vst [vmem:[#allocation70_spill] sm:$0xff] %v6582_v55 }
 0x346   : > { %5058 = vmatmul.mubr.msk.bf16.gmra.mxu0 %vm2229_vm9, %v5260_v60 }
 0x347   : > { %2291 = vmatprep.mubr.bf16.mxu0 %v9493_v24  ;;  %v6590_v25 = vpop.permute.xlu1 %2517 }
 0x34c   : > { %v6604_v54 = vpop.permute.xlu1 %2599  ;;  %v6661_v63 = vpop.permute.xlu0 %2707 }
 0x34e   : > { %5059 = vmatmul.mubr.msk.bf16.gmra.mxu0 %vm2229_vm9, %v5261_v28 }
 0x34f   : > { %3983 = vmatprep.mubr.bf16.mxu0 %v9493_v24 }
 0x351   : > { %v6612_v42 = vpop.permute.xlu1 %2763  ;;  %v6671_v38 = vpop.permute.xlu0 %2755 }
 0x355   : > { %v6622_v4 = vpop.permute.xlu1 %2767 }
 0x356   : > { %9582 = vst [vmem:[#allocation39_spill] sm:$0xff] %v6622_v4 }
 0x35a   : > { %v6628_v41 = vpop.permute.xlu1 %2711 }
 0x363   : > { %v6642_v35 = vpop.permute.xlu1 %2811 }
 0x368   : > { %v6652_v27 = vpop.permute.xlu1 %2759 }
 0x36d   : > { %v6667_v29 = vpop.permute.xlu1 %2859 }
 0x36e   : > { %9587 = vst [vmem:[#allocation72_spill] sm:$0xff] %v6667_v29 }
 0x372   : > { %v6673_v5 = vpop.permute.xlu1 %2807 }
 0x377   : > { %v6685_v1 = vpop.permute.xlu1 %2955 }
 0x378   : > { %9589 = vst [vmem:[#allocation45_spill] sm:$0xff] %v6685_v1 }
 0x37c   : > { %v6689_v57 = vpop.permute.xlu1 %2851 }
 0x380   : > { %v6693_v51 = vpop.permute.xlu1 %2855 }
 0x385   : > { %v6697_v40 = vpop.permute.xlu1 %3055 }
 0x386   : > { %9592 = vst [vmem:[#allocation48_spill] sm:$0xff] %v6697_v40 }
 0x38a   : > { %v6701_v10 = vpop.permute.xlu1 %2947 }
 0x38b   : > { %9594 = vst [vmem:[#allocation54_spill] sm:$0xff] %v6701_v10 }
 0x38f   : > { %v6705_v53 = vpop.permute.xlu1 %3147 }
 0x390   : > { %9596 = vst [vmem:[#allocation55_spill] sm:$0xff] %v6705_v53 }
 0x393   : > { %v6709_v20 = vpop.permute.xlu1 %3151 }
 0x394   : > { %9598 = vst [vmem:[#allocation9_spill] sm:$0xff] %v6709_v20  ;;  %v9605_v20 = vld [vmem:[#allocation60_spill] sm:$0xff] }
 0x398   : > { %v6713_v13 = vpop.permute.xlu1 %3047 }
 0x399   : > { %9600 = vst [vmem:[#allocation36_spill] sm:$0xff] %v6713_v13 }
 0x39d   : > { %v6717_v36 = vpop.permute.xlu1 %3139 }
 0x39e   : > { %9602 = vst [vmem:[#allocation77_spill] sm:$0xff] %v6717_v36 }
 0x3fe   : > { %v6558_v47 = vpop.f32.mrf.mxu0 }
 0x3ff   : > { %9576 = vst [vmem:[#allocation23_spill] sm:$0xff] %v6558_v47 }
 0x400   : > { %v6560_v17 = vpop.f32.mrf.mxu0 }
 0x401   : > { %9577 = vst [vmem:[#allocation32_spill] sm:$0xff] %v6560_v17  ;;  %v9604_v17 = vld [vmem:[#allocation59_spill] sm:$0xff] }
 0x402   : > { %v6564_v59 = vpop.f32.mrf.mxu0 }
 0x403   : > { %9578 = vst [vmem:[#allocation69_spill] sm:$0xff] %v6564_v59 }
 0x404   : > { %v6566_v31 = vpop.f32.mrf.mxu0 }
 0x405   : > { %9579 = vst [vmem:[#allocation15_spill] sm:$0xff] %v6566_v31 }
 0x406   : > { %v6568_v62 = vpop.f32.mrf.mxu0 }
 0x407   : > { %2550 = vrot.lane.b32.xlu0 %v6568_v62, %s9206_s3  ;;  %2328 = vrot.lane.b32.xlu1 %v6568_v62, %s9208_s0 }
 0x408   : > { %v6576_v32 = vpop.f32.mrf.mxu0 }
 0x40a   : > { %v6588_v45 = vpop.f32.mrf.mxu0 }
 0x40b   : > { %2388 = vrot.lane.b32.xlu1 %v6568_v62, %s9580_s4  ;;  %2330 = vrot.lane.b32.xlu0 %v6576_v32, %s9208_s0 }
 0x40c   : > { %v6596_v19 = vpop.f32.mrf.mxu0 }
 0x40e   : > { %v6602_v0 = vpop.f32.mrf.mxu0 }
 0x40f   : > { %2552 = vrot.lane.b32.xlu1 %v6576_v32, %s9206_s3  ;;  %2390 = vrot.lane.b32.xlu0 %v6576_v32, %s9580_s4 }
 0x410   : > { %v6610_v37 = vpop.f32.mrf.mxu0 }
 0x412   : > { %v6634_v34 = vpop.f32.mrf.mxu0 }
 0x413   : > { %2554 = vrot.lane.b32.xlu0 %v6588_v45, %s9206_s3  ;;  %2332 = vrot.lane.b32.xlu1 %v6588_v45, %s9208_s0  ;;  %9584 = vst [vmem:[#allocation73_spill] sm:$0xff] %v6634_v34 }
 0x414   : > { %v6644_v46 = vpop.f32.mrf.mxu0 }
 0x415   : > { %9586 = vst [vmem:[#allocation74_spill] sm:$0xff] %v6644_v46 }
 0x417   : > { %2392 = vrot.lane.b32.xlu1 %v6588_v45, %s9580_s4  ;;  %2334 = vrot.lane.b32.xlu0 %v6596_v19, %s9208_s0 }
 0x41b   : > { %2556 = vrot.lane.b32.xlu1 %v6596_v19, %s9206_s3  ;;  %2394 = vrot.lane.b32.xlu0 %v6596_v19, %s9580_s4 }
 0x41f   : > { %2336 = vrot.lane.b32.xlu1 %v6602_v0, %s9208_s0  ;;  %2338 = vrot.lane.b32.xlu0 %v6610_v37, %s9208_s0 }
 0x423   : > { %2396 = vrot.lane.b32.xlu1 %v6602_v0, %s9580_s4  ;;  %2398 = vrot.lane.b32.xlu0 %v6610_v37, %s9580_s4 }
 0x427   : > { %2558 = vrot.lane.b32.xlu1 %v6602_v0, %s9206_s3  ;;  %2560 = vrot.lane.b32.xlu0 %v6610_v37, %s9206_s3 }
 0x42b   : > { %3002 = vrot.lane.b32.xlu1 %v6602_v0, %s9583_s30  ;;  %3004 = vrot.lane.b32.xlu0 %v6610_v37, %s9583_s30 }
 0x42f   : > { %3006 = vrot.lane.b32.xlu0 %v6634_v34, %s9583_s30  ;;  %2340 = vrot.lane.b32.xlu1 %v6634_v34, %s9208_s0 }
 0x433   : > { %2400 = vrot.lane.b32.xlu1 %v6634_v34, %s9580_s4  ;;  %2342 = vrot.lane.b32.xlu0 %v6644_v46, %s9208_s0 }
 0x437   : > { %2562 = vrot.lane.b32.xlu1 %v6634_v34, %s9206_s3  ;;  %2402 = vrot.lane.b32.xlu0 %v6644_v46, %s9580_s4 }
 0x43b   : > { %3206 = vperm.xlu1 %5196, %v3182_v3   ;;  %2512 = vperm.xlu0 %5195, %v6218_v18   ;;  %v6679_v18 = vpop.permute.xlu0 %2863 }
 0x43c   : > { %9588 = vst [vmem:[#allocation71_spill] sm:$0xff] %v6679_v18 }
 0x43f   : > { %3211 = vperm.xlu1 %5196, %v3183_v9   ;;  %2996 = vrot.lane.b32.xlu0 %v6576_v32, %s9583_s30  ;;  %v6687_v48 = vpop.permute.xlu0 %2815 }
 0x440   : > { %9590 = vst [vmem:[#allocation31_spill] sm:$0xff] %v6687_v48 }
 0x443   : > { %3000 = vrot.lane.b32.xlu1 %v6596_v19, %s9583_s30  ;;  %2994 = vrot.lane.b32.xlu0 %v6568_v62, %s9583_s30  ;;  %v6691_v43 = vpop.permute.xlu0 %2803 }
 0x447   : > { %3008 = vrot.lane.b32.xlu1 %v6644_v46, %s9583_s30  ;;  %2564 = vrot.lane.b32.xlu0 %v6644_v46, %s9206_s3  ;;  %v6695_v14 = vpop.permute.xlu0 %2959 }
 0x448   : > { %9591 = vst [vmem:[#allocation41_spill] sm:$0xff] %v6695_v14 }
 0x44b   : > { %v6699_v22 = vpop.permute.xlu0 %2951 }
 0x44c   : > { %9593 = vst [vmem:[#allocation75_spill] sm:$0xff] %v6699_v22 }
 0x44f   : > { %v6703_v21 = vpop.permute.xlu0 %3051 }
 0x450   : > { %9595 = vst [vmem:[#allocation53_spill] sm:$0xff] %v6703_v21 }
 0x453   : > { %v6707_v61 = vpop.permute.xlu0 %3043 }
 0x454   : > { %9597 = vst [vmem:[#allocation14_spill] sm:$0xff] %v6707_v61 }
 0x457   : > { %v6711_v8 = vpop.permute.xlu0 %3143 }
 0x458   : > { %9599 = vst [vmem:[#allocation10_spill] sm:$0xff] %v6711_v8 }
 0x45b   : > { %v6715_v33 = vpop.permute.xlu0 %2527 }
 0x45c   : > { %9601 = vst [vmem:[#allocation12_spill] sm:$0xff] %v6715_v33 }
 0x479   : > { %v6719_v15 = vpop.permute.xlu0 %2550  ;;  %v2329_v16 = vpop.permute.xlu1 %2328 }
 0x47a   : > { %v2364_v30 = vsel %vm1007_vm3, 0.0, %v2329_v16 }
 0x47b   : > { %v6723_v60 = vmul.f32 %v9603_v11, %v2364_v30 }
 0x47d   : > { %v2389_v28 = vpop.permute.xlu1 %2388  ;;  %v2331_v3 = vpop.permute.xlu0 %2330  ;;  %2460 = vrot.lane.b32.xlu1 %v6723_v60, %s9206_s3  ;;  %2898 = vrot.lane.b32.xlu0 %v6723_v60, %s9583_s30 }
 0x47e   : > { %v2346_v9 = vsel %vm1007_vm3, %v2329_v16, %v2331_v3  ;;  %v9607_v3 = vld [vmem:[#allocation61_spill] sm:$0xff] }
 0x47f   : > { %v6731_v47 = vmul.f32 %v9604_v17, %v2346_v9 }
 0x481   : > { %v6733_v8 = vpop.permute.xlu1 %2552  ;;  %v2391_v13 = vpop.permute.xlu0 %2390  ;;  %2462 = vrot.lane.b32.xlu1 %v6731_v47, %s9206_s3 }
 0x482   : > { %v2406_v30 = vsel %vm1088_vm7, %v2389_v28, %v2391_v13  ;;  %v2424_v61 = vsel %vm1088_vm7, %v2391_v13, 0.0 }
 0x483   : > { %v6739_v36 = vmul.f32 %v9605_v20, %v2406_v30  ;;  %v6748_v9 = vmul.f32 %v9607_v3, %v2424_v61 }
 0x485   : > { %9606 = vst [vmem:[#allocation27_spill] sm:$0xff] %v6739_v36  ;;  %v6742_v22 = vpop.permute.xlu0 %2554  ;;  %v2333_v40 = vpop.permute.xlu1 %2332  ;;  %2658 = vrot.lane.b32.xlu1 %v6739_v36, %s9206_s3 }
 0x486   : > { %v2365_v16 = vsel %vm1007_vm3, 0.0, %v2333_v40 }
 0x487   : > { %v6751_v14 = vmul.f32 %v9603_v11, %v2365_v16 }
 0x489   : > { %v2393_v28 = vpop.permute.xlu1 %2392  ;;  %v2335_v10 = vpop.permute.xlu0 %2334  ;;  %2660 = vrot.lane.b32.xlu1 %v6748_v9, %s9206_s3  ;;  %2464 = vrot.lane.b32.xlu0 %v6751_v14, %s9206_s3 }
 0x48a   : > { %v2347_v16 = vsel %vm1007_vm3, %v2333_v40, %v2335_v10 }
 0x48b   : > { %v6771_v1 = vmul.f32 %v9604_v17, %v2347_v16 }
 0x48d   : > { %v6757_v13 = vpop.permute.xlu1 %2556  ;;  %v2395_v30 = vpop.permute.xlu0 %2394  ;;  %2900 = vrot.lane.b32.xlu1 %v6731_v47, %s9583_s30 }
 0x48e   : > { %v2407_v61 = vsel %vm1088_vm7, %v2393_v28, %v2395_v30  ;;  %v2425_v18 = vsel %vm1088_vm7, %v2395_v30, 0.0 }
 0x48f   : > { %v6763_v53 = vmul.f32 %v9605_v20, %v2407_v61  ;;  %v6780_v40 = vmul.f32 %v9607_v3, %v2425_v18 }
 0x491   : > { %v2337_v46 = vpop.permute.xlu1 %2336  ;;  %v2339_v21 = vpop.permute.xlu0 %2338  ;;  %2902 = vrot.lane.b32.xlu1 %v6751_v14, %s9583_s30  ;;  %2662 = vrot.lane.b32.xlu0 %v6763_v53, %s9206_s3 }
 0x492   : > { %v2366_v28 = vsel %vm1007_vm3, 0.0, %v2337_v46  ;;  %v2348_v16 = vsel %vm1007_vm3, %v2337_v46, %v2339_v21 }
 0x493   : > { %v6783_v10 = vmul.f32 %v9603_v11, %v2366_v28  ;;  %v6795_v4 = vmul.f32 %v9604_v17, %v2348_v16 }
 0x495   : > { %v2397_v48 = vpop.permute.xlu1 %2396  ;;  %v2399_v61 = vpop.permute.xlu0 %2398  ;;  %2466 = vrot.lane.b32.xlu1 %v6771_v1, %s9206_s3  ;;  %2904 = vrot.lane.b32.xlu0 %v6771_v1, %s9583_s30 }
 0x496   : > { %v2408_v18 = vsel %vm1088_vm7, %v2397_v48, %v2399_v61  ;;  %v2426_v28 = vsel %vm1088_vm7, %v2399_v61, 0.0 }
 0x497   : > { %v6808_v21 = vmul.f32 %v9605_v20, %v2408_v18  ;;  %v6811_v16 = vmul.f32 %v9607_v3, %v2426_v28 }
 0x499   : > { %v6786_v34 = vpop.permute.xlu1 %2558  ;;  %v6788_v30 = vpop.permute.xlu0 %2560  ;;  %2664 = vrot.lane.b32.xlu1 %v6780_v40, %s9206_s3  ;;  %2468 = vrot.lane.b32.xlu0 %v6783_v10, %s9206_s3 }
 0x49d   : > { %v6799_v55 = vpop.permute.xlu1 %3002  ;;  %v6801_v46 = vpop.permute.xlu0 %3004  ;;  %2470 = vrot.lane.b32.xlu1 %v6795_v4, %s9206_s3  ;;  %2906 = vrot.lane.b32.xlu0 %v6783_v10, %s9583_s30 }
 0x49e   : > { %9608 = vst [vmem:[#allocation38_spill] sm:$0xff] %v6799_v55  ;;  %9609 = vst [vmem:[#allocation79_spill] sm:$0xff] %v6801_v46 }
 0x4a1   : > { %v6813_v2 = vpop.permute.xlu0 %3006  ;;  %v2341_v48 = vpop.permute.xlu1 %2340  ;;  %2668 = vrot.lane.b32.xlu1 %v6811_v16, %s9206_s3  ;;  %2666 = vrot.lane.b32.xlu0 %v6808_v21, %s9206_s3 }
 0x4a2   : > { %9610 = vst [vmem:[#allocation7_spill] sm:$0xff] %v6813_v2  ;;  %v2367_v61 = vsel %vm1007_vm3, 0.0, %v2341_v48 }
 0x4a3   : > { %v6825_v28 = vmul.f32 %v9603_v11, %v2367_v61 }
 0x4a5   : > { %2908 = vrot.lane.b32.xlu1 %v6795_v4, %s9583_s30  ;;  %3098 = vrot.lane.b32.xlu0 %v6808_v21, %s9583_s30  ;;  %v2343_v18 = vpop.permute.xlu0 %2342  ;;  %v2401_v2 = vpop.permute.xlu1 %2400 }
 0x4a6   : > { %v2349_v29 = vsel %vm1007_vm3, %v2341_v48, %v2343_v18 }
 0x4a7   : > { %v6841_v61 = vmul.f32 %v9604_v17, %v2349_v29  ;;  %v3181_v29 = vld [vmem:[%s9050_s8 + $0x18] sm:$0xff]  ;;  %v9620_v17 = vld [vmem:[#allocation20_spill] sm:$0xff] }
 0x4a9   : > { %3100 = vrot.lane.b32.xlu1 %v6811_v16, %s9583_s30  ;;  %2472 = vrot.lane.b32.xlu0 %v6825_v28, %s9206_s3  ;;  %v2403_v55 = vpop.permute.xlu0 %2402  ;;  %9612 = vst [vmem:[#allocation40_spill] sm:$0xff] %v6841_v61  ;;  %v6888_v48 = vpop.permute.xlu1 %2562 }
 0x4aa   : > { %v2409_v46 = vsel %vm1088_vm7, %v2401_v2, %v2403_v55  ;;  %v2427_v11 = vsel %vm1088_vm7, %v2403_v55, 0.0  ;;  %v3180_v55 = vld [vmem:[%s9050_s8 + $0x10] sm:$0xff] }
 0x4ab   : > { %v6833_v33 = vmul.f32 %v9605_v20, %v2409_v46  ;;  %v6849_v2 = vmul.f32 %v9607_v3, %v2427_v11  ;;  %v3317_v11 = vld [vmem:[%s9052_s10 + $0x10] sm:$0xff]  ;;  %v6878_v46 = vld [vmem:[%s9052_s10 + $0x18] sm:$0xff] }
 0x4ad   : > { %9611 = vst [vmem:[#allocation8_spill] sm:$0xff] %v6833_v33  ;;  %2910 = vrot.lane.b32.xlu1 %v6825_v28, %s9583_s30  ;;  %2670 = vrot.lane.b32.xlu0 %v6833_v33, %s9206_s3  ;;  %9613 = vst [vmem:[#allocation25_spill] sm:$0xff] %v6849_v2 }
 0x4b1   : > { %2474 = vrot.lane.b32.xlu1 %v6841_v61, %s9206_s3  ;;  %3092 = vrot.lane.b32.xlu0 %v6748_v9, %s9583_s30 }
 0x4b5   : > { %2672 = vrot.lane.b32.xlu1 %v6849_v2, %s9206_s3  ;;  %2912 = vrot.lane.b32.xlu0 %v6841_v61, %s9583_s30 }
 0x4b6   : > { %v6892_v18 = vpop.permute.xlu1 %3206 }
 0x4b7   : > { %9614 = vst [vmem:[#allocation22_spill] sm:$0xff] %v6892_v18  ;;  %v9622_v18 = vld [vmem:[#allocation17_spill] sm:$0xff] }
 0x4b9   : > { %2998 = vrot.lane.b32.xlu1 %v6588_v45, %s9583_s30  ;;  %3104 = vrot.lane.b32.xlu0 %v6849_v2, %s9583_s30 }
 0x4bd   : > { %3096 = vrot.lane.b32.xlu1 %v6780_v40, %s9583_s30  ;;  %3196 = vperm.xlu0 %5195, %v3180_v55   ;;  %v6897_v55 = vpop.permute.xlu1 %3211 }
 0x4be   : > { %9615 = vst [vmem:[#allocation44_spill] sm:$0xff] %v6897_v55 }
 0x4c1   : > { %3201 = vperm.xlu1 %5196, %v3181_v29   ;;  %3094 = vrot.lane.b32.xlu0 %v6763_v53, %s9583_s30  ;;  %v3902_v29 = vld [vmem:[%s9053_s11 + $0x18] sm:$0xff]  ;;  %v6905_v20 = vpop.permute.xlu1 %3000 }
 0x4c2   : > { %5199 = vset.pattern.permute.xlu0 %v9494_v44  ;;  %9616 = vst [vmem:[#allocation58_spill] sm:$0xff] %v6905_v20 }
 0x4c5   : > { %3102 = vrot.lane.b32.xlu1 %v6833_v33, %s9583_s30  ;;  %3620 = vperm.xlu0 %5199, %v3317_v11  }
 0x4c9   : > { %3090 = vrot.lane.b32.xlu1 %v6739_v36, %s9583_s30  ;;  %5202 = vset.pattern.permute.xlu0 %v9505_v26 }
 0x4ca   : > { %3656 = vperm.xlu0 %5202, %v6878_v46  }
 0x4cd   : > { %3459 = vperm.xlu1 %5196, %v3317_v11  }
 0x4ce   : > { %5204 = vset.pattern.permute.xlu0 %v9513_v6 }
 0x4cf   : > { %3748 = vperm.xlu0 %5204, %v3317_v11  }
 0x4d1   : > { %5197 = vset.pattern.permute.xlu1 %v9485_v23 }
 0x4d2   : > { %3516 = vperm.xlu1 %5197, %v3317_v11  }
 0x4d3   : > { %5207 = vset.pattern.permute.xlu0 %v9520_v49 }
 0x4d4   : > { %3816 = vperm.xlu0 %5207, %v6878_v46  }
 0x4d6   : > { %5198 = vset.pattern.permute.xlu1 %v9491_v50  ;;  %v2513_v50 = vpop.permute.xlu0 %2512 }
 0x4d7   : > { %3588 = vperm.xlu1 %5198, %v3317_v11  }
 0x4d8   : > { %5208 = vset.pattern.permute.xlu0 %v9526_v7 }
 0x4d9   : > { %3876 = vperm.xlu0 %5208, %v3317_v11  }
 0x4da   : > { %v6908_v3 = vpop.permute.xlu0 %2996 }
 0x4db   : > { %3592 = vperm.xlu1 %5198, %v6878_v46   ;;  %9617 = vst [vmem:[#allocation11_spill] sm:$0xff] %v6908_v3 }
 0x4dd   : > { %5209 = vset.pattern.permute.xlu0 %v9493_v24 }
 0x4de   : > { %3464 = vperm.xlu0 %5209, %v6878_v46  }
 0x4df   : > { %5200 = vset.pattern.permute.xlu1 %v9494_v44  ;;  %v6912_v44 = vpop.permute.xlu1 %3008 }
 0x4e0   : > { %3624 = vperm.xlu1 %5200, %v6878_v46   ;;  %9618 = vst [vmem:[#allocation78_spill] sm:$0xff] %v6912_v44 }
 0x4e2   : > { %3920 = vperm.xlu0 %5209, %v3902_v29   ;;  %v6916_v29 = vpop.permute.xlu0 %2994 }
 0x4e3   : > { %9621 = vst [vmem:[#allocation76_spill] sm:$0xff] %v6916_v29 }
 0x4e4   : > { %5201 = vset.pattern.permute.xlu1 %v9505_v26 }
 0x4e5   : > { %3652 = vperm.xlu1 %5201, %v3317_v11  }
 0x4e6   : > { %5212 = vset.pattern.permute.xlu0 %v9485_v23  ;;  %v6923_v36 = vpop.permute.xlu0 %2564 }
 0x4e7   : > { %3520 = vperm.xlu0 %5212, %v6878_v46  }
 0x4e9   : > { %5203 = vset.pattern.permute.xlu1 %v9495_v56 }
 0x4ea   : > { %3684 = vperm.xlu1 %5203, %v3317_v11  }
 0x4eb   : > { %979 = vrot.lane.b32.xlu0 %v9620_v17, %s9619_s28  ;;  %v2586_v17 = vsel %vm865_vm1, 0.0, %v6719_v15 }
 0x4ee   : > { %3688 = vperm.xlu1 %5203, %v6878_v46  }
 0x4ef   : > { %v2461_v26 = vpop.permute.xlu1 %2460  ;;  %2324 = vrot.lane.b32.xlu0 %v6564_v59, %s9619_s28  ;;  %v2618_v59 = vmul.f32 %v6604_v54, %v2586_v17  ;;  %v6932_v3 = vpop.permute.xlu0 %2898 }
 0x4f0   : > { %v2496_v55 = vsel %vm865_vm1, 0.0, %v2461_v26  ;;  %9623 = vst [vmem:[#allocation30_spill] sm:$0xff] %v6932_v3 }
 0x4f1   : > { %v2534_v29 = vmul.f32 %v2513_v50, %v2496_v55 }
 0x4f2   : > { %5205 = vset.pattern.permute.xlu1 %v9513_v6  ;;  %v2568_v6 = vsel %vm865_vm1, %v6719_v15, %v6733_v8  ;;  %v2822_v8 = vmul.f32 %v6691_v43, %v6568_v62  ;;  %v3901_v62 = vld [vmem:[%s9053_s11 + $0x10] sm:$0xff] }
 0x4f3   : > { %v2463_v56 = vpop.permute.xlu1 %2462  ;;  %3752 = vperm.xlu1 %5205, %v6878_v46   ;;  %975 = vrot.lane.b32.xlu0 %v9622_v18, %s9619_s28  ;;  %v2630_v18 = vadd.f32 %v2618_v59, %v2534_v29 }
 0x4f4   : > { %v2478_v20 = vsel %vm865_vm1, %v2461_v26, %v2463_v56  ;;  %v2774_v56 = vmul.f32 %v6671_v38, %v6723_v60  ;;  %v2619_v26 = vmul.f32 %v6604_v54, %v2568_v6  ;;  %v2775_v6 = vmul.f32 %v6671_v38, %v6731_v47 }
 0x4f5   : > { %v2535_v61 = vmul.f32 %v2513_v50, %v2478_v20  ;;  %v2871_v47 = vmul.f32 %v6689_v57, %v6748_v9 }
 0x4f7   : > { %v2659_v44 = vpop.permute.xlu1 %2658  ;;  %5206 = vset.pattern.permute.xlu1 %v9520_v49  ;;  %v2631_v15 = vadd.f32 %v2619_v26, %v2535_v61 }
 0x4f8   : > { %v2694_v2 = vsel %vm865_vm1, 0.0, %v2659_v44  ;;  %3812 = vperm.xlu1 %5206, %v3317_v11  }
 0x4f9   : > { %v2726_v55 = vmul.f32 %v6661_v63, %v2694_v2 }
 0x4fb   : > { %v2738_v17 = vadd.f32 %v2726_v55, %v2630_v18  ;;  %v2661_v3 = vpop.permute.xlu1 %2660  ;;  %v2465_v33 = vpop.permute.xlu0 %2464 }
 0x4fc   : > { %v2676_v49 = vsel %vm865_vm1, %v2659_v44, %v2661_v3  ;;  %5210 = vset.pattern.permute.xlu1 %v9526_v7  ;;  %v2497_v20 = vsel %vm865_vm1, 0.0, %v2465_v33  ;;  %v2587_v3 = vsel %vm865_vm1, 0.0, %v6742_v22 }
 0x4fd   : > { %v2786_v59 = vadd.f32 %v2774_v56, %v2738_v17  ;;  %v2727_v50 = vmul.f32 %v6661_v63, %v2676_v49  ;;  %3880 = vperm.xlu1 %5210, %v6878_v46   ;;  %v2823_v49 = vmul.f32 %v6691_v43, %v6576_v32  ;;  %v2536_v61 = vmul.f32 %v6590_v25, %v2497_v20  ;;  %v9624_v43 = vld [vmem:[#allocation21_spill] sm:$0xff] }
 0x4fe   : > { %v2620_v38 = vmul.f32 %v6650_v12, %v2587_v3  ;;  %v2776_v56 = vmul.f32 %v6652_v27, %v6751_v14 }
 0x4ff   : > { %v2739_v54 = vadd.f32 %v2727_v50, %v2631_v15  ;;  %v6952_v60 = vpop.permute.xlu1 %2900  ;;  %v6954_v44 = vadd.f32 %v2822_v8, %v2786_v59  ;;  %v2569_v8 = vsel %vm865_vm1, %v6742_v22, %v6757_v13  ;;  %v2824_v59 = vmul.f32 %v6673_v5, %v6588_v45 }
 0x500   : > { %v2632_v29 = vadd.f32 %v2620_v38, %v2536_v61  ;;  %v2621_v14 = vmul.f32 %v6650_v12, %v2569_v8  ;;  %v2777_v12 = vmul.f32 %v6652_v27, %v6771_v1  ;;  %v2570_v38 = vsel %vm865_vm1, %v6786_v34, %v6788_v30 }
 0x501   : > { %v2787_v63 = vadd.f32 %v2775_v6, %v2739_v54  ;;  %5211 = vset.pattern.permute.xlu1 %v9493_v24  ;;  %v2872_v6 = vmul.f32 %v6693_v51, %v6763_v53  ;;  %v2588_v53 = vsel %vm865_vm1, 0.0, %v6786_v34 }
 0x502   : > { %3915 = vperm.xlu1 %5211, %v3901_v62   ;;  %v2622_v1 = vmul.f32 %v6562_v52, %v2588_v53  ;;  %v9628_v53 = vld [vmem:[#allocation26_spill] sm:$0xff] }
 0x503   : > { %v2835_v2 = vadd.f32 %v2823_v49, %v2787_v63  ;;  %v6968_v11 = vpop.permute.xlu1 %2902  ;;  %v2663_v46 = vpop.permute.xlu0 %2662  ;;  %v9625_v49 = vld [vmem:[#allocation18_spill] sm:$0xff] }
 0x504   : > { %v2695_v18 = vsel %vm865_vm1, 0.0, %v2663_v46 }
 0x505   : > { %v6971_v55 = vadd.f32 %v2871_v47, %v2835_v2  ;;  %v2728_v32 = vmul.f32 %v6628_v41, %v2695_v18 }
 0x506   : > { %981 = vrot.lane.b32.xlu1 %v9624_v43, %s9619_s28 }
 0x507   : > { %v2740_v9 = vadd.f32 %v2728_v32, %v2632_v29  ;;  %v2467_v26 = vpop.permute.xlu1 %2466  ;;  %v6978_v17 = vpop.permute.xlu0 %2904  ;;  %5213 = vset.pattern.permute.xlu1 %v9485_v23  ;;  %v2873_v29 = vmul.f32 %v6693_v51, %v6780_v40  ;;  %v2623_v32 = vmul.f32 %v6562_v52, %v2570_v38  ;;  %v2778_v51 = vmul.f32 %v6612_v42, %v6783_v10 }
 0x508   : > { %v2479_v15 = vsel %vm865_vm1, %v2465_v33, %v2467_v26  ;;  %v2779_v52 = vmul.f32 %v6612_v42, %v6795_v4 }
 0x509   : > { %v2788_v50 = vadd.f32 %v2776_v56, %v2740_v9  ;;  %v2537_v20 = vmul.f32 %v6590_v25, %v2479_v15 }
 0x50a   : > { %2326 = vrot.lane.b32.xlu1 %v6566_v31, %s9619_s28 }
 0x50b   : > { %v2836_v54 = vadd.f32 %v2824_v59, %v2788_v50  ;;  %v2665_v62 = vpop.permute.xlu1 %2664  ;;  %v2469_v3 = vpop.permute.xlu0 %2468  ;;  %v2633_v33 = vadd.f32 %v2621_v14, %v2537_v20  ;;  %v2826_v14 = vmul.f32 %v6642_v35, %v6602_v0 }
 0x50c   : > { %v2677_v22 = vsel %vm865_vm1, %v2663_v46, %v2665_v62  ;;  %v2498_v25 = vsel %vm865_vm1, 0.0, %v2469_v3  ;;  %v2825_v46 = vmul.f32 %v6673_v5, %v6596_v19  ;;  %v9626_v62 = vld [vmem:[#allocation72_spill] sm:$0xff] }
 0x50d   : > { %v6994_v13 = vadd.f32 %v2872_v6, %v2836_v54  ;;  %v2729_v45 = vmul.f32 %v6628_v41, %v2677_v22  ;;  %v2538_v41 = vmul.f32 %v6556_v39, %v2498_v25  ;;  %v2827_v6 = vmul.f32 %v6642_v35, %v6610_v37  ;;  %v9627_v35 = vld [vmem:[#allocation12_spill] sm:$0xff] }
 0x50e   : > { %977 = vrot.lane.b32.xlu1 %v9625_v49, %s9619_s28  ;;  %v2874_v10 = vmul.f32 %v9626_v62, %v6808_v21  ;;  %v2875_v42 = vmul.f32 %v9626_v62, %v6811_v16 }
 0x50f   : > { %v2741_v63 = vadd.f32 %v2729_v45, %v2633_v33  ;;  %v2471_v61 = vpop.permute.xlu1 %2470  ;;  %v7004_v47 = vpop.permute.xlu0 %2906  ;;  %v2634_v30 = vadd.f32 %v2622_v1, %v2538_v41  ;;  %v2589_v45 = vsel %vm865_vm1, 0.0, %v6888_v48  ;;  %v9629_v41 = vld [vmem:[#allocation70_spill] sm:$0xff] }
 0x510   : > { %v2480_v2 = vsel %vm865_vm1, %v2469_v3, %v2471_v61  ;;  %v2624_v21 = vmul.f32 %v9628_v53, %v2589_v45 }
 0x511   : > { %v2789_v18 = vadd.f32 %v2777_v12, %v2741_v63  ;;  %v2539_v27 = vmul.f32 %v6556_v39, %v2480_v2 }
 0x513   : > { %v2837_v56 = vadd.f32 %v2825_v46, %v2789_v18  ;;  %v2669_v9 = vpop.permute.xlu1 %2668  ;;  %v2667_v34 = vpop.permute.xlu0 %2666  ;;  %v2635_v19 = vadd.f32 %v2623_v32, %v2539_v27  ;;  %v9630_v46 = vld [vmem:[#allocation39_spill] sm:$0xff]  ;;  %v2571_v32 = vsel %vm865_vm1, %v6888_v48, %v6923_v36 }
 0x514   : > { %v2678_v26 = vsel %vm865_vm1, %v2667_v34, %v2669_v9  ;;  %v2696_v8 = vsel %vm865_vm1, 0.0, %v2667_v34  ;;  %v2780_v18 = vmul.f32 %v9630_v46, %v6825_v28  ;;  %v9631_v9 = vld [vmem:[#allocation73_spill] sm:$0xff]  ;;  %v9632_v34 = vld [vmem:[#allocation31_spill] sm:$0xff]  ;;  %v9633_v28 = vld [vmem:[#allocation8_spill] sm:$0xff] }
 0x515   : > { %v7020_v15 = vadd.f32 %v2873_v29, %v2837_v56  ;;  %v2730_v39 = vmul.f32 %v6570_v58, %v2696_v8  ;;  %v2731_v5 = vmul.f32 %v6570_v58, %v2678_v26 }
 0x517   : > { %v2742_v40 = vadd.f32 %v2730_v39, %v2634_v30  ;;  %v2743_v59 = vadd.f32 %v2731_v5, %v2635_v19  ;;  %v7028_v50 = vpop.permute.xlu1 %2908  ;;  %v7030_v20 = vpop.permute.xlu0 %3098  ;;  %v2828_v30 = vmul.f32 %v9632_v34, %v9631_v9  ;;  %v9634_v39 = vld [vmem:[#allocation71_spill] sm:$0xff]  ;;  %v2935_v9 = vsel %vm1769_vm8, %v6978_v17, 0.0 }
 0x518   : > { %v2936_v26 = vsel %vm1769_vm8, %v7028_v50, 0.0  ;;  %v2876_v5 = vmul.f32 %v9634_v39, %v9633_v28 }
 0x519   : > { %v2790_v54 = vadd.f32 %v2778_v51, %v2742_v40  ;;  %v2791_v58 = vadd.f32 %v2779_v52, %v2743_v59  ;;  %v2625_v51 = vmul.f32 %v9628_v53, %v2571_v32  ;;  %v9635_v59 = vld [vmem:[#allocation45_spill] sm:$0xff]  ;;  %v9642_v32 = vld [vmem:[#allocation11_spill] sm:$0xff] }
 0x51a   : > { %v2971_v36 = vmul.f32 %v9635_v59, %v2936_v26  ;;  %v9644_v26 = vld [vmem:[#allocation58_spill] sm:$0xff] }
 0x51b   : > { %v2838_v4 = vadd.f32 %v2826_v14, %v2790_v54  ;;  %v2839_v3 = vadd.f32 %v2827_v6, %v2791_v58  ;;  %v7040_v22 = vpop.permute.xlu1 %3100  ;;  %v2473_v33 = vpop.permute.xlu0 %2472  ;;  %v9636_v14 = vld [vmem:[#allocation79_spill] sm:$0xff] }
 0x51c   : > { %v2499_v0 = vsel %vm865_vm1, 0.0, %v2473_v33  ;;  %v3032_v6 = vsel %vm1769_vm8, %v9636_v14, 0.0 }
 0x51d   : > { %v7045_v25 = vadd.f32 %v2874_v10, %v2838_v4  ;;  %v2887_v37 = vadd.f32 %v2875_v42, %v2839_v3  ;;  %v2540_v12 = vmul.f32 %v9627_v35, %v2499_v0  ;;  %v9637_v4 = vld [vmem:[#allocation40_spill] sm:$0xff]  ;;  %v9638_v0 = vld [vmem:[#allocation53_spill] sm:$0xff] }
 0x51e   : > { %v2781_v3 = vmul.f32 %v9630_v46, %v9637_v4  ;;  %v9641_v46 = vld [vmem:[#allocation78_spill] sm:$0xff] }
 0x51f   : > { %v7049_v63 = vpop.permute.xlu1 %2910  ;;  %v2671_v16 = vpop.permute.xlu0 %2670  ;;  %v2636_v38 = vadd.f32 %v2624_v21, %v2540_v12  ;;  %v2983_v42 = vadd.f32 %v2971_v36, %v2887_v37  ;;  %v9639_v12 = vld [vmem:[#allocation74_spill] sm:$0xff]  ;;  %v3128_v21 = vsel %vm1769_vm8, %v7040_v22, 0.0 }
 0x520   : > { %v2697_v61 = vsel %vm865_vm1, 0.0, %v2671_v16  ;;  %v2829_v53 = vmul.f32 %v9632_v34, %v9639_v12  ;;  %v9643_v34 = vld [vmem:[#allocation55_spill] sm:$0xff] }
 0x521   : > { %v2732_v2 = vmul.f32 %v9629_v41, %v2697_v61  ;;  %v2934_v61 = vsel %vm1769_vm8, %v6952_v60, 0.0 }
 0x523   : > { %v2744_v27 = vadd.f32 %v2732_v2, %v2636_v38  ;;  %v2475_v1 = vpop.permute.xlu1 %2474  ;;  %v7055_v29 = vpop.permute.xlu0 %3092 }
 0x524   : > { %v2481_v56 = vsel %vm865_vm1, %v2473_v33, %v2475_v1 }
 0x525   : > { %v2792_v8 = vadd.f32 %v2780_v18, %v2744_v27  ;;  %v2541_v19 = vmul.f32 %v9627_v35, %v2481_v56  ;;  %v3067_v35 = vmul.f32 %v9638_v0, %v3032_v6  ;;  %v3033_v18 = vsel %vm1769_vm8, %v9641_v46, 0.0 }
 0x526   : > { %v3030_v56 = vsel %vm1769_vm8, %v9642_v32, 0.0  ;;  %v3126_v6 = vsel %vm1769_vm8, %v7055_v29, 0.0 }
 0x527   : > { %v2673_v52 = vpop.permute.xlu1 %2672  ;;  %v2840_v40 = vadd.f32 %v2828_v30, %v2792_v8  ;;  %v2637_v54 = vadd.f32 %v2625_v51, %v2541_v19  ;;  %v2913_v10 = vpop.permute.xlu0 %2912  ;;  %v3079_v38 = vadd.f32 %v3067_v35, %v2983_v42  ;;  %v3163_v30 = vmul.f32 %v9643_v34, %v3128_v21  ;;  %v9645_v19 = vld [vmem:[#allocation54_spill] sm:$0xff]  ;;  %v9648_v42 = vld [vmem:[#allocation75_spill] sm:$0xff] }
 0x528   : > { %v2679_v48 = vsel %vm865_vm1, %v2671_v16, %v2673_v52  ;;  %v2937_v37 = vsel %vm1769_vm8, %v2913_v10, 0.0  ;;  %v3031_v8 = vsel %vm1769_vm8, %v9644_v26, 0.0  ;;  %v2967_v28 = vmul.f32 %v9645_v19, %v2934_v61  ;;  %v9649_v35 = vld [vmem:[#allocation38_spill] sm:$0xff]  ;;  %v9651_v61 = vld [vmem:[#allocation77_spill] sm:$0xff] }
 0x529   : > { %v2733_v58 = vmul.f32 %v9629_v41, %v2679_v48  ;;  %v7074_v62 = vadd.f32 %v2876_v5, %v2840_v40  ;;  %v9640_v41 = vld [vmem:[#allocation25_spill] sm:$0xff]  ;;  %v9647_v40 = vld [vmem:[#allocation48_spill] sm:$0xff]  ;;  %v3175_v48 = vadd.f32 %v3163_v30, %v3079_v38  ;;  %v2969_v4 = vmul.f32 %v9648_v42, %v2935_v9 }
 0x52a   : > { %v2877_v2 = vmul.f32 %v9634_v39, %v9640_v41  ;;  %v9646_v5 = vld [vmem:[#allocation41_spill] sm:$0xff]  ;;  %v3069_v36 = vmul.f32 %v9647_v40, %v3033_v18  ;;  %v3014_v12 = vsel %vm1769_vm8, %v9649_v35, %v9636_v14  ;;  %v3159_v38 = vmul.f32 %v9651_v61, %v3126_v6  ;;  %v9653_v18 = vld [vmem:[#allocation36_spill] sm:$0xff] }
 0x52b   : > { %v2745_v33 = vadd.f32 %v2733_v58, %v2637_v54  ;;  %v2999_v45 = vpop.permute.xlu1 %2998  ;;  %v7090_v1 = vpop.permute.xlu0 %3104  ;;  %v2973_v51 = vmul.f32 %v9646_v5, %v2937_v37  ;;  %v2979_v58 = vadd.f32 %v2967_v28, %v6971_v55  ;;  %v9652_v41 = vld [vmem:[#allocation9_spill] sm:$0xff]  ;;  %v2919_v14 = vsel %vm1769_vm8, %v7049_v63, %v2913_v10 }
 0x52c   : > { %v3129_v54 = vsel %vm1769_vm8, %v7090_v1, 0.0  ;;  %v3066_v6 = vmul.f32 %v9638_v0, %v3014_v12  ;;  %v2917_v10 = vsel %vm1769_vm8, %v6968_v11, %v6978_v17  ;;  %v2972_v0 = vmul.f32 %v9646_v5, %v2919_v14  ;;  %v9659_v12 = vld [vmem:[#allocation7_spill] sm:$0xff]  ;;  %v9660_v14 = vld [vmem:[#allocation76_spill] sm:$0xff] }
 0x52d   : > { %v2793_v16 = vadd.f32 %v2781_v3, %v2745_v33  ;;  %v2918_v3 = vsel %vm1769_vm8, %v7004_v47, %v7028_v50  ;;  %v3165_v55 = vmul.f32 %v9652_v41, %v3129_v54  ;;  %v9654_v50 = vld [vmem:[#allocation22_spill] sm:$0xff] }
 0x52e   : > { %v2970_v47 = vmul.f32 %v9635_v59, %v2918_v3  ;;  %v3223_v9 = vadd.f32 %v9654_v50, %v3175_v48  ;;  %v9658_v3 = vld [vmem:[#allocation44_spill] sm:$0xff] }
 0x52f   : > { %v2841_v27 = vadd.f32 %v2829_v53, %v2793_v16  ;;  %v3097_v52 = vpop.permute.xlu1 %3096  ;;  %v9650_v53 = vld [vmem:[#allocation14_spill] sm:$0xff] }
 0x530   : > { %v3063_v21 = vmul.f32 %v9650_v53, %v3030_v56  ;;  %v3127_v16 = vsel %vm1769_vm8, %v3097_v52, 0.0  ;;  %v9655_v56 = vld [vmem:[#allocation10_spill] sm:$0xff] }
 0x531   : > { %v2889_v39 = vadd.f32 %v2877_v2, %v2841_v27  ;;  %v2981_v2 = vadd.f32 %v2969_v4, %v7020_v15  ;;  %v3065_v27 = vmul.f32 %v9653_v18, %v3031_v8  ;;  %v3161_v28 = vmul.f32 %v9655_v56, %v3127_v16  ;;  %v9657_v8 = vld [vmem:[#allocation30_spill] sm:$0xff] }
 0x532   : > { %v2982_v15 = vadd.f32 %v2970_v47, %v7045_v25  ;;  %v2916_v59 = vsel %vm1769_vm8, %v9657_v8, %v6952_v60  ;;  %v3235_v25 = vmax.f32 %v3223_v9, 0.0 }
 0x533   : > { %v2985_v33 = vadd.f32 %v2973_v51, %v2889_v39  ;;  %v3075_v39 = vadd.f32 %v3063_v21, %v2979_v58  ;;  %v9656_v51 = vld [vmem:[#allocation27_spill] sm:$0xff]  ;;  %v3077_v4 = vadd.f32 %v3065_v27, %v2981_v2  ;;  %v3013_v58 = vsel %vm1769_vm8, %v2999_v45, %v9644_v26 }
 0x534   : > { %v3015_v21 = vsel %vm1769_vm8, %v9659_v12, %v9641_v46  ;;  %v3078_v11 = vadd.f32 %v3066_v6, %v2982_v15  ;;  %v2968_v45 = vmul.f32 %v9648_v42, %v2917_v10  ;;  %v3064_v2 = vmul.f32 %v9653_v18, %v3013_v58  ;;  %v9668_v12 = vld [vmem:[#allocation20_spill] sm:$0xff] }
 0x535   : > { %v3081_v37 = vadd.f32 %v3069_v36, %v2985_v33  ;;  %v2870_v36 = vmul.f32 %v6689_v57, %v9656_v51  ;;  %v3171_v48 = vadd.f32 %v3159_v38, %v3075_v39  ;;  %v3110_v57 = vsel %vm1769_vm8, %v7030_v20, %v7040_v22 }
 0x536   : > { %v3173_v60 = vadd.f32 %v3161_v28, %v3077_v4  ;;  %v2966_v20 = vmul.f32 %v9645_v19, %v2916_v59  ;;  %v3162_v26 = vmul.f32 %v9643_v34, %v3110_v57  ;;  %v2980_v47 = vadd.f32 %v2968_v45, %v6994_v13 }
 0x537   : > { %v3177_v30 = vadd.f32 %v3165_v55, %v3081_v37  ;;  %v2882_v16 = vadd.f32 %v2870_v36, %v6954_v44  ;;  %v2984_v55 = vadd.f32 %v2972_v0, %v7074_v62  ;;  %v3068_v44 = vmul.f32 %v9647_v40, %v3015_v21 }
 0x538   : > { %v3197_v54 = vpop.permute.xlu0 %3196  ;;  %v3174_v19 = vadd.f32 %v3162_v26, %v3078_v11  ;;  %v3012_v42 = vsel %vm1769_vm8, %v9660_v14, %v9642_v32  ;;  %v9670_v11 = vld [vmem:[#allocation32_spill] sm:$0xff] }
 0x539   : > { %v3225_v63 = vadd.f32 %v9658_v3, %v3177_v30  ;;  %v3219_v33 = vadd.f32 %v3197_v54, %v3171_v48  ;;  %v2978_v18 = vadd.f32 %v2966_v20, %v2882_v16  ;;  %v3076_v30 = vadd.f32 %v3064_v2, %v2980_v47  ;;  %v9669_v16 = vld [vmem:[#allocation23_spill] sm:$0xff] }
 0x53a   : > { %v3080_v28 = vadd.f32 %v3068_v44, %v2984_v55  ;;  %v3062_v40 = vmul.f32 %v9650_v53, %v3012_v42  ;;  %v3222_v13 = vadd.f32 %v9654_v50, %v3174_v19  ;;  %v7277_v2 = vld [vmem:[%s9398_s7 + $0x8] sm:$0xff] }
 0x53b   : > { %v3237_v35 = vmax.f32 %v3225_v63, 0.0  ;;  %v3231_v46 = vmax.f32 %v3219_v33, 0.0  ;;  %v7297_v19 = vld [vmem:[%s9052_s10 + $0x8] sm:$0xff] }
 0x53c   : > { %v3202_v17 = vpop.permute.xlu1 %3201  ;;  %v3095_v38 = vpop.permute.xlu0 %3094  ;;  %v3074_v15 = vadd.f32 %v3062_v40, %v2978_v18  ;;  %v3234_v8 = vmax.f32 %v3222_v13, 0.0 }
 0x53d   : > { %v3221_v22 = vadd.f32 %v3202_v17, %v3173_v60  ;;  %v3109_v5 = vsel %vm1769_vm8, %v3095_v38, %v3097_v52  ;;  %v3245_v37 = vpack.c.bf16 %v3237_v35, %v3235_v25  ;;  %v9671_v38 = vld [vmem:[#allocation69_spill] sm:$0xff] }
 0x53e   : > { %v3160_v9 = vmul.f32 %v9655_v56, %v3109_v5 }
 0x53f   : > { %v3233_v27 = vmax.f32 %v3221_v22, 0.0  ;;  %3274 = vmatprep.subr.bf16.mxu1 %v3245_v37  ;;  %v9672_v37 = vld [vmem:[#allocation17_spill] sm:$0xff] }
 0x540   : > { %v3103_v52 = vpop.permute.xlu1 %3102  ;;  %v3172_v51 = vadd.f32 %v3160_v9, %v3076_v30  ;;  %v7250_v22 = vpop.permute.xlu0 %3620 }
 0x541   : > { %v3111_v62 = vsel %vm1769_vm8, %v3103_v52, %v7090_v1  ;;  %v3243_v34 = vpack.c.bf16 %v3233_v27, %v3231_v46  ;;  %v7287_v27 = vld [vmem:[%s9487_s16 + $0x8] sm:$0xff]  ;;  %v7305_v52 = vld [vmem:[%s9398_s7] sm:$0xff] }
 0x542   : > { %v3164_v39 = vmul.f32 %v9652_v41, %v3111_v62  ;;  %v3220_v59 = vadd.f32 %v3202_v17, %v3172_v51  ;;  %v7315_v62 = vld [vmem:[%s9487_s16] sm:$0xff] }
 0x544   : > { %v3176_v56 = vadd.f32 %v3164_v39, %v3080_v28  ;;  %v3091_v36 = vpop.permute.xlu1 %3090  ;;  %v3232_v53 = vmax.f32 %v3220_v59, 0.0  ;;  %v7330_v28 = vld [vmem:[%s9055_s13 + $0x8] sm:$0xff] }
 0x545   : > { %v3108_v6 = vsel %vm1769_vm8, %v3091_v36, %v7055_v29  ;;  %v5262_v29 = vld [vmem:[%s9661_s9] sm:$0xff]   ;;  %v7260_v45 = vpop.permute.xlu0 %3656 }
 0x546   : > { %v3224_v32 = vadd.f32 %v9658_v3, %v3176_v56  ;;  %v3158_v1 = vmul.f32 %v9651_v61, %v3108_v6  ;;  %v5263_v61 = vld [vmem:[%s9661_s9 + $0x8] sm:$0xff]   ;;  %9673 = vst [vmem:[#allocation37_spill] sm:$0xff] %v7260_v45 }
 0x548   : > { %v3236_v48 = vmax.f32 %v3224_v32, 0.0  ;;  %v3170_v4 = vadd.f32 %v3158_v1, %v3074_v15  ;;  %v7222_v35 = vpop.permute.xlu1 %3459 }
 0x54a   : > { %v3218_v41 = vadd.f32 %v3197_v54, %v3170_v4  ;;  %v3244_v63 = vpack.c.bf16 %v3236_v48, %v3234_v8  ;;  %v7270_v55 = vpop.permute.xlu0 %3748  ;;  %v9683_v4 = vld [vmem:[#allocation57_spill] sm:$0xff] }
 0x54b   : > { %9674 = vst [vmem:[#allocation28_spill] sm:$0xff] %v7270_v55 }
 0x54c   : > { %v3230_v10 = vmax.f32 %v3218_v41, 0.0  ;;  %3275 = vmatpush1.bf16.msra.mxu1 %v3244_v63 }
 0x54d   : > { %3276 = vmatprep.subr.bf16.mxu1 %v3243_v34  ;;  %v7228_v21 = vpop.permute.xlu1 %3516 }
 0x54e   : > { %v3242_v50 = vpack.c.bf16 %v3232_v53, %v3230_v10 }
 0x54f   : > { %v7289_v44 = vpop.permute.xlu0 %3816 }
 0x550   : > { %3277 = vmatpush1.bf16.msra.mxu1 %v3242_v50  ;;  %9675 = vst [vmem:[#allocation83_spill] sm:$0xff] %v7289_v44  ;;  %v9684_v50 = vld [vmem:[#allocation59_spill] sm:$0xff] }
 0x552   : > { %v7236_v17 = vpop.permute.xlu1 %3588 }
 0x553   : > { %5062 = vmatmul.mubr.msk.bf16.vlgmr.msra.gmra.mxu1 %vm745_vm0, %v5262_v29 }
 0x554   : > { %3304 = vmatprep.mubr.bf16.mxu1 %v9493_v24  ;;  %v7299_v9 = vpop.permute.xlu0 %3876 }
 0x555   : > { %9677 = vst [vmem:[#allocation85_spill] sm:$0xff] %v7299_v9 }
 0x556   : > { %v7244_v20 = vpop.permute.xlu1 %3592 }
 0x559   : > { %v7310_v42 = vpop.permute.xlu0 %3464 }
 0x55b   : > { %5063 = vmatmul.mubr.msk.bf16.gmra.mxu1 %vm745_vm0, %v5263_v61  ;;  %v7254_v5 = vpop.permute.xlu1 %3624 }
 0x55d   : > { %v7321_v18 = vpop.permute.xlu0 %3920 }
 0x55e   : > { %9680 = vst [vmem:[#allocation80_spill] sm:$0xff] %v7321_v18 }
 0x560   : > { %v7264_v26 = vpop.permute.xlu1 %3652 }
 0x562   : > { %v7332_v39 = vpop.permute.xlu0 %3520 }
 0x565   : > { %v7279_v46 = vpop.permute.xlu1 %3684 }
 0x566   : > { %v7340_v13 = vpop.permute.xlu0 %979 }
 0x569   : > { %v7291_v47 = vpop.permute.xlu1 %3688 }
 0x56a   : > { %9676 = vst [vmem:[#allocation13_spill] sm:$0xff] %v7291_v47  ;;  %v7344_v56 = vpop.permute.xlu0 %2324 }
 0x56e   : > { %v7307_v14 = vpop.permute.xlu1 %3752  ;;  %v7348_v6 = vpop.permute.xlu0 %975 }
 0x56f   : > { %9678 = vst [vmem:[#allocation33_spill] sm:$0xff] %v7307_v14 }
 0x573   : > { %v7317_v34 = vpop.permute.xlu1 %3812 }
 0x574   : > { %9679 = vst [vmem:[#allocation24_spill] sm:$0xff] %v7317_v34 }
 0x578   : > { %v7324_v30 = vpop.permute.xlu1 %3880 }
 0x579   : > { %9681 = vst [vmem:[#allocation56_spill] sm:$0xff] %v7324_v30 }
 0x57d   : > { %v7336_v40 = vpop.permute.xlu1 %3915 }
 0x57e   : > { %9682 = vst [vmem:[#allocation64_spill] sm:$0xff] %v7336_v40 }
 0x581   : > { %v7342_v51 = vpop.permute.xlu1 %981 }
 0x582   : > { %v1009_v45 = vsel %vm1007_vm3, %v7340_v13, %v7342_v51 }
 0x585   : > { %v7346_v36 = vpop.permute.xlu1 %2326 }
 0x589   : > { %v7350_v32 = vpop.permute.xlu1 %977 }
 0x613   : > { %v7176_v54 = vpop.f32.mrf.mxu1 }
 0x615   : > { %v7178_v3 = vpop.f32.mrf.mxu1 }
 0x616   : > { %9662 = vst [vmem:[#allocation81_spill] sm:$0xff] %v7178_v3 }
 0x617   : > { %v7180_v57 = vpop.f32.mrf.mxu1 }
 0x618   : > { %9663 = vst [vmem:[#allocation82_spill] sm:$0xff] %v7180_v57  ;;  %3331 = vrot.lane.b32.xlu0 %v7180_v57, %s9619_s28 }
 0x619   : > { %v7184_v0 = vpop.f32.mrf.mxu1 }
 0x61a   : > { %9664 = vst [vmem:[#allocation16_spill] sm:$0xff] %v7184_v0  ;;  %3333 = vrot.lane.b32.xlu1 %v7184_v0, %s9619_s28 }
 0x61b   : > { %v7188_v25 = vpop.f32.mrf.mxu1 }
 0x61c   : > { %3483 = vrot.lane.b32.xlu0 %v7188_v25, %s9665_s2 }
 0x61d   : > { %v7194_v58 = vpop.f32.mrf.mxu1 }
 0x61e   : > { %3335 = vrot.lane.b32.xlu1 %v7188_v25, %s9619_s28 }
 0x61f   : > { %v7204_v33 = vpop.f32.mrf.mxu1 }
 0x620   : > { %3337 = vrot.lane.b32.xlu0 %v7194_v58, %s9619_s28  ;;  %9666 = vst [vmem:[#allocation63_spill] sm:$0xff] %v7204_v33 }
 0x621   : > { %v7214_v60 = vpop.f32.mrf.mxu1 }
 0x622   : > { %3375 = vrot.lane.b32.xlu1 %v7188_v25, %s9580_s4  ;;  %9667 = vst [vmem:[#allocation29_spill] sm:$0xff] %v7214_v60 }
 0x624   : > { %3377 = vrot.lane.b32.xlu0 %v7194_v58, %s9580_s4 }
 0x626   : > { %3779 = vrot.lane.b32.xlu1 %v7188_v25, %s9583_s30 }
 0x628   : > { %3487 = vrot.lane.b32.xlu0 %v7204_v33, %s9665_s2 }
 0x62a   : > { %3485 = vrot.lane.b32.xlu1 %v7194_v58, %s9665_s2 }
 0x62c   : > { %3783 = vrot.lane.b32.xlu0 %v7204_v33, %s9583_s30 }
 0x62e   : > { %3781 = vrot.lane.b32.xlu1 %v7194_v58, %s9583_s30 }
 0x630   : > { %3341 = vrot.lane.b32.xlu0 %v7214_v60, %s9619_s28 }
 0x632   : > { %3339 = vrot.lane.b32.xlu1 %v7204_v33, %s9619_s28 }
 0x634   : > { %3381 = vrot.lane.b32.xlu0 %v7214_v60, %s9580_s4 }
 0x636   : > { %3379 = vrot.lane.b32.xlu1 %v7204_v33, %s9580_s4 }
 0x638   : > { %1060 = vrot.lane.b32.xlu0 %v9668_v12, %s9580_s4 }
 0x63a   : > { %1062 = vrot.lane.b32.xlu1 %v9624_v43, %s9580_s4 }
 0x63c   : > { %2320 = vrot.lane.b32.xlu0 %v9669_v16, %s9619_s28 }
 0x63e   : > { %2322 = vrot.lane.b32.xlu1 %v9670_v11, %s9619_s28 }
 0x640   : > { %2384 = vrot.lane.b32.xlu0 %v9671_v38, %s9580_s4 }
 0x642   : > { %2386 = vrot.lane.b32.xlu1 %v6566_v31, %s9580_s4 }
 0x644   : > { %3327 = vrot.lane.b32.xlu0 %v7176_v54, %s9619_s28 }
 0x646   : > { %3329 = vrot.lane.b32.xlu1 %v7178_v3, %s9619_s28 }
 0x648   : > { %3371 = vrot.lane.b32.xlu0 %v7180_v57, %s9580_s4 }
 0x64a   : > { %3373 = vrot.lane.b32.xlu1 %v7184_v0, %s9580_s4 }
 0x64c   : > { %1056 = vrot.lane.b32.xlu0 %v9672_v37, %s9580_s4 }
 0x64e   : > { %1058 = vrot.lane.b32.xlu1 %v9625_v49, %s9580_s4 }
 0x650   : > { %2380 = vrot.lane.b32.xlu0 %v9669_v16, %s9580_s4 }
 0x652   : > { %2382 = vrot.lane.b32.xlu1 %v9670_v11, %s9580_s4 }
 0x654   : > { %3367 = vrot.lane.b32.xlu0 %v7176_v54, %s9580_s4 }
 0x656   : > { %3369 = vrot.lane.b32.xlu1 %v7178_v3, %s9580_s4 }
 0x658   : > { %3785 = vrot.lane.b32.xlu0 %v7214_v60, %s9583_s30 }
 0x65a   : > { %1342 = vperm.xlu1 %5213, %v7277_v2  }
 0x65e   : > { %2595 = vperm.xlu1 %5213, %v7287_v27  }
 0x662   : > { %3512 = vperm.xlu1 %5213, %v7297_v19  }
 0x666   : > { %1338 = vperm.xlu1 %5213, %v7305_v52  }
 0x66a   : > { %5214 = vset.pattern.permute.xlu1 %v9493_v24 }
 0x66b   : > { %2502 = vperm.xlu1 %5214, %v7315_v62  }
 0x66f   : > { %5215 = vset.pattern.permute.xlu1 %v9485_v23 }
 0x670   : > { %2591 = vperm.xlu1 %5215, %v7315_v62  }
 0x674   : > { %5216 = vset.pattern.permute.xlu1 %v9493_v24 }
 0x675   : > { %4067 = vperm.xlu1 %5216, %v7330_v28  }
 0x679   : > { %3489 = vrot.lane.b32.xlu1 %v7214_v60, %s9665_s2 }
 0x68a   : > { %v7352_v15 = vpop.permute.xlu0 %3331 }
 0x68c   : > { %v7354_v1 = vpop.permute.xlu1 %3333 }
 0x68e   : > { %v7356_v8 = vpop.permute.xlu0 %3483 }
 0x690   : > { %v3336_v59 = vpop.permute.xlu1 %3335 }
 0x691   : > { %v3357_v48 = vsel %vm1007_vm3, 0.0, %v3336_v59 }
 0x692   : > { %v7360_v41 = vmul.f32 %v9683_v4, %v3357_v48  ;;  %v3338_v63 = vpop.permute.xlu0 %3337  ;;  %v9685_v48 = vld [vmem:[#allocation61_spill] sm:$0xff] }
 0x693   : > { %v3345_v53 = vsel %vm1007_vm3, %v3336_v59, %v3338_v63  ;;  %v9687_v59 = vld [vmem:[#allocation60_spill] sm:$0xff] }
 0x694   : > { %v3376_v10 = vpop.permute.xlu1 %3375  ;;  %3715 = vrot.lane.b32.xlu1 %v7360_v41, %s9583_s30  ;;  %3423 = vrot.lane.b32.xlu0 %v7360_v41, %s9665_s2  ;;  %v7368_v29 = vmul.f32 %v9684_v50, %v3345_v53 }
 0x696   : > { %v3378_v61 = vpop.permute.xlu0 %3377 }
 0x697   : > { %v3385_v24 = vsel %vm1088_vm7, %v3376_v10, %v3378_v61  ;;  %v3397_v7 = vsel %vm1088_vm7, %v3378_v61, 0.0 }
 0x698   : > { %v7373_v18 = vmul.f32 %v9685_v48, %v3397_v7  ;;  %v7375_v40 = vpop.permute.xlu1 %3779  ;;  %3425 = vrot.lane.b32.xlu1 %v7368_v29, %s9665_s2  ;;  %v7380_v63 = vmul.f32 %v9687_v59, %v3385_v24 }
 0x699   : > { %9686 = vst [vmem:[#allocation65_spill] sm:$0xff] %v7375_v40 }
 0x69a   : > { %v7382_v30 = vpop.permute.xlu0 %3487  ;;  %3557 = vrot.lane.b32.xlu0 %v7373_v18, %s9665_s2 }
 0x69c   : > { %v7386_v53 = vpop.permute.xlu1 %3485  ;;  %3555 = vrot.lane.b32.xlu1 %v7380_v63, %s9665_s2 }
 0x69e   : > { %v7390_v7 = vpop.permute.xlu0 %3783 }
 0x69f   : > { %9688 = vst [vmem:[#allocation19_spill] sm:$0xff] %v7390_v7 }
 0x6a0   : > { %v7392_v10 = vpop.permute.xlu1 %3781  ;;  %3717 = vrot.lane.b32.xlu1 %v7368_v29, %s9583_s30 }
 0x6a1   : > { %9689 = vst [vmem:[#allocation86_spill] sm:$0xff] %v7392_v10 }
 0x6a2   : > { %v3342_v61 = vpop.permute.xlu0 %3341 }
 0x6a4   : > { %v3340_v24 = vpop.permute.xlu1 %3339  ;;  %3845 = vrot.lane.b32.xlu1 %v7373_v18, %s9583_s30 }
 0x6a5   : > { %v3358_v40 = vsel %vm1007_vm3, 0.0, %v3340_v24  ;;  %v3346_v9 = vsel %vm1007_vm3, %v3340_v24, %v3342_v61 }
 0x6a6   : > { %v7400_v44 = vmul.f32 %v9683_v4, %v3358_v40  ;;  %v3382_v14 = vpop.permute.xlu0 %3381  ;;  %v7408_v7 = vmul.f32 %v9684_v50, %v3346_v9 }
 0x6a7   : > { %v3398_v10 = vsel %vm1088_vm7, %v3382_v14, 0.0 }
 0x6a8   : > { %v3380_v34 = vpop.permute.xlu1 %3379  ;;  %3843 = vrot.lane.b32.xlu1 %v7380_v63, %s9583_s30  ;;  %3427 = vrot.lane.b32.xlu0 %v7400_v44, %s9665_s2  ;;  %9690 = vst [vmem:[#allocation46_spill] sm:$0xff] %v7408_v7  ;;  %v7419_v40 = vmul.f32 %v9685_v48, %v3398_v10  ;;  %v1033_v10 = vsel %vm1007_vm3, 0.0, %v7340_v13  ;;  %v2363_v13 = vsel %vm1007_vm3, 0.0, %v7344_v56 }
 0x6a9   : > { %v3386_v55 = vsel %vm1088_vm7, %v3380_v34, %v3382_v14  ;;  %v7436_v14 = vld [vmem:[%s9052_s10] sm:$0xff]  ;;  %v9692_v34 = vmov 2   ;;  %v7452_v60 = vmul.f32 %v9683_v4, %v1033_v10 }
 0x6aa   : > { %9691 = vst [vmem:[#allocation66_spill] sm:$0xff] %v7419_v40  ;;  %v7422_v61 = vmul.f32 %v9687_v59, %v3386_v55 }
 0x6ab   : > { %9693 = vst [vmem:[#allocation35_spill] sm:$0xff] %v7452_v60 }
 0x6ac   : > { %v7412_v47 = vpop.permute.xlu1 %1062  ;;  %3719 = vrot.lane.b32.xlu0 %v7400_v44, %s9583_s30  ;;  %3429 = vrot.lane.b32.xlu1 %v7408_v7, %s9665_s2 }
 0x6b0   : > { %v7424_v9 = vpop.permute.xlu1 %2322  ;;  %3561 = vrot.lane.b32.xlu0 %v7419_v40, %s9665_s2  ;;  %3559 = vrot.lane.b32.xlu1 %v7422_v61, %s9665_s2 }
 0x6b4   : > { %4095 = vperm.xlu0 %5212, %v7330_v28   ;;  %3721 = vrot.lane.b32.xlu1 %v7408_v7, %s9583_s30  ;;  %v7438_v55 = vpop.permute.xlu1 %2386  ;;  %v9694_v7 = vmov 3  }
 0x6b8   : > { %5217 = vset.pattern.permute.xlu0 %v9692_v34  ;;  %3449 = vperm.xlu1 %5216, %v7436_v14   ;;  %v7445_v24 = vpop.permute.xlu1 %3329 }
 0x6b9   : > { %1486 = vperm.xlu0 %5217, %v7277_v2  }
 0x6bc   : > { %5218 = vset.pattern.permute.xlu1 %v9485_v23  ;;  %v7460_v33 = vpop.permute.xlu1 %3373 }
 0x6bd   : > { %3849 = vrot.lane.b32.xlu0 %v7419_v40, %s9583_s30  ;;  %3508 = vperm.xlu1 %5218, %v7436_v14   ;;  %v7464_v40 = vmul.f32 %v9684_v50, %v1009_v45  ;;  %v2345_v45 = vsel %vm1007_vm3, %v7344_v56, %v7346_v36  ;;  %v3356_v36 = vsel %vm1007_vm3, 0.0, %v7352_v15 }
 0x6bf   : > { %9695 = vst [vmem:[#allocation87_spill] sm:$0xff] %v7464_v40 }
 0x6c0   : > { %v7469_v10 = vpop.permute.xlu1 %1058 }
 0x6c1   : > { %2703 = vperm.xlu0 %5217, %v7287_v27   ;;  %1157 = vrot.lane.b32.xlu1 %v7452_v60, %s9665_s2  ;;  %v7488_v60 = vmul.f32 %v9684_v50, %v2345_v45 }
 0x6c2   : > { %5219 = vset.pattern.permute.xlu1 %v9694_v7 }
 0x6c3   : > { %9697 = vst [vmem:[#allocation34_spill] sm:$0xff] %v7488_v60 }
 0x6c4   : > { %v7482_v51 = vpop.permute.xlu1 %2382 }
 0x6c5   : > { %3584 = vperm.xlu0 %5217, %v7297_v19   ;;  %1159 = vrot.lane.b32.xlu1 %v7464_v40, %s9665_s2  ;;  %v7485_v40 = vmul.f32 %v9683_v4, %v2363_v13 }
 0x6c7   : > { %9696 = vst [vmem:[#allocation47_spill] sm:$0xff] %v7485_v40 }
 0x6c8   : > { %v7494_v56 = vpop.permute.xlu1 %3369 }
 0x6c9   : > { %1277 = vrot.lane.b32.xlu0 %v9668_v12, %s9665_s2  ;;  %1279 = vrot.lane.b32.xlu1 %v9624_v43, %s9665_s2  ;;  %v1061_v43 = vpop.permute.xlu0 %1060 }
 0x6cd   : > { %1482 = vperm.xlu0 %5217, %v7305_v52   ;;  %1550 = vperm.xlu1 %5219, %v7277_v2   ;;  %v2321_v13 = vpop.permute.xlu0 %2320 }
 0x6d1   : > { %2456 = vrot.lane.b32.xlu0 %v7485_v40, %s9665_s2  ;;  %2458 = vrot.lane.b32.xlu1 %v7488_v60, %s9665_s2  ;;  %v7508_v60 = vmul.f32 %v9683_v4, %v3356_v36  ;;  %v1008_v36 = vsel %vm1007_vm3, %v7348_v6, %v7350_v32 }
 0x6d3   : > { %9699 = vst [vmem:[#allocation89_spill] sm:$0xff] %v7508_v60 }
 0x6d5   : > { %2546 = vrot.lane.b32.xlu0 %v9671_v38, %s9665_s2  ;;  %3847 = vrot.lane.b32.xlu1 %v7422_v61, %s9583_s30  ;;  %v7502_v45 = vpop.permute.xlu1 %1342  ;;  %v2385_v38 = vpop.permute.xlu0 %2384 }
 0x6d6   : > { %9698 = vst [vmem:[#allocation49_spill] sm:$0xff] %v7502_v45  ;;  %v7518_v45 = vld [vmem:[%s9055_s13] sm:$0xff] }
 0x6d9   : > { %2699 = vperm.xlu0 %5217, %v7315_v62   ;;  %2548 = vrot.lane.b32.xlu1 %v6566_v31, %s9665_s2  ;;  %v7513_v12 = vpop.permute.xlu1 %2595 }
 0x6da   : > { %9700 = vst [vmem:[#allocation67_spill] sm:$0xff] %v7513_v12  ;;  %v3344_v12 = vsel %vm1007_vm3, %v7352_v15, %v7354_v1  ;;  %v1114_v15 = vsel %vm1088_vm7, %v7412_v47, 0.0 }
 0x6dd   : > { %3419 = vrot.lane.b32.xlu0 %v7508_v60, %s9665_s2  ;;  %2751 = vperm.xlu1 %5219, %v7287_v27   ;;  %v7527_v60 = vpop.permute.xlu0 %3327  ;;  %v7529_v31 = vpop.permute.xlu1 %3512 }
 0x6de   : > { %9701 = vst [vmem:[#allocation42_spill] sm:$0xff] %v7529_v31 }
 0x6e1   : > { %3479 = vrot.lane.b32.xlu0 %v7180_v57, %s9665_s2  ;;  %5220 = vset.pattern.permute.xlu1 %v9485_v23  ;;  %v7537_v23 = vmul.f32 %v9684_v50, %v1008_v36  ;;  %v7541_v57 = vmul.f32 %v9684_v50, %v3344_v12  ;;  %v7545_v32 = vpop.permute.xlu0 %3371  ;;  %v7547_v31 = vpop.permute.xlu1 %1338  ;;  %v7558_v12 = vmul.f32 %v9685_v48, %v1114_v15 }
 0x6e2   : > { %4091 = vperm.xlu1 %5220, %v7518_v45   ;;  %9704 = vst [vmem:[#allocation68_spill] sm:$0xff] %v7547_v31  ;;  %v1032_v31 = vsel %vm1007_vm3, 0.0, %v7348_v6 }
 0x6e3   : > { %9702 = vst [vmem:[#allocation43_spill] sm:$0xff] %v7537_v23  ;;  %9703 = vst [vmem:[#allocation52_spill] sm:$0xff] %v7541_v57  ;;  %v7574_v15 = vmul.f32 %v9683_v4, %v1032_v31 }
 0x6e4   : > { %9705 = vst [vmem:[#allocation51_spill] sm:$0xff] %v7558_v12 }
 0x6e5   : > { %3580 = vperm.xlu0 %5217, %v7436_v14   ;;  %v7562_v1 = vpop.permute.xlu0 %1056  ;;  %9707 = vst [vmem:[#allocation50_spill] sm:$0xff] %v7574_v15 }
 0x6e6   : > { %5221 = vset.pattern.permute.xlu1 %v9692_v34  ;;  %v7564_v36 = vpop.permute.xlu1 %2502 }
 0x6e7   : > { %4131 = vperm.xlu1 %5221, %v7330_v28   ;;  %9706 = vst [vmem:[#allocation88_spill] sm:$0xff] %v7564_v36 }
 0x6e9   : > { %1155 = vrot.lane.b32.xlu0 %v7537_v23, %s9665_s2  ;;  %v2381_v23 = vpop.permute.xlu0 %2380 }
 0x6ea   : > { %5223 = vset.pattern.permute.xlu0 %v9694_v7 }
 0x6eb   : > { %3421 = vrot.lane.b32.xlu1 %v7541_v57, %s9665_s2 }
 0x6ec   : > { %5222 = vset.pattern.permute.xlu1 %v9694_v7 }
 0x6ed   : > { %1275 = vrot.lane.b32.xlu0 %v9625_v49, %s9665_s2  ;;  %v2405_v49 = vsel %vm1088_vm7, %v2385_v38, %v7438_v55  ;;  %v1090_v38 = vsel %vm1088_vm7, %v1061_v43, %v7412_v47  ;;  %v7591_v31 = vpop.permute.xlu0 %3367  ;;  %v2362_v43 = vsel %vm1007_vm3, 0.0, %v2321_v13 }
 0x6ee   : > { %v7581_v36 = vmul.f32 %v9687_v59, %v2405_v49  ;;  %v3343_v49 = vsel %vm1007_vm3, %v7527_v60, %v7445_v24  ;;  %v2344_v24 = vsel %vm1007_vm3, %v2321_v13, %v7424_v9  ;;  %v3505_v13 = vsel %vm865_vm1, 0.0, %v7356_v8 }
 0x6ef   : > { %3481 = vrot.lane.b32.xlu1 %v7184_v0, %s9665_s2  ;;  %v7578_v0 = vpop.permute.xlu1 %2591 }
 0x6f0   : > { %9708 = vst [vmem:[#allocation62_spill] sm:$0xff] %v7578_v0  ;;  %9709 = vst [vmem:[#allocation84_spill] sm:$0xff] %v7581_v36  ;;  %v7596_v0 = vmul.f32 %v9687_v59, %v1090_v38  ;;  %v7611_v38 = vmul.f32 %v9684_v50, %v3343_v49  ;;  %v3396_v49 = vsel %vm1088_vm7, %v7460_v33, 0.0 }
 0x6f1   : > { %1423 = vrot.lane.b32.xlu0 %v7558_v12, %s9665_s2  ;;  %v7606_v47 = vpop.permute.xlu0 %3785 }
 0x6f2   : > { %9711 = vst [vmem:[#allocation12_spill] sm:$0xff] %v7596_v0  ;;  %9712 = vst [vmem:[#allocation26_spill] sm:$0xff] %v7611_v38 }
 0x6f3   : > { %3616 = vperm.xlu1 %5222, %v7297_v19   ;;  %v7593_v6 = vpop.permute.xlu1 %4067 }
 0x6f4   : > { %9710 = vst [vmem:[#allocation72_spill] sm:$0xff] %v7593_v6  ;;  %v7615_v6 = vmul.f32 %v9683_v4, %v2362_v43  ;;  %v7629_v43 = vmul.f32 %v9684_v50, %v2344_v24  ;;  %v2404_v24 = vsel %vm1088_vm7, %v2381_v23, %v7482_v51 }
 0x6f5   : > { %2542 = vrot.lane.b32.xlu0 %v9669_v16, %s9665_s2 }
 0x6f6   : > { %9713 = vst [vmem:[#allocation70_spill] sm:$0xff] %v7615_v6  ;;  %9715 = vst [vmem:[#allocation39_spill] sm:$0xff] %v7629_v43 }
 0x6f7   : > { %1153 = vrot.lane.b32.xlu1 %v7574_v15, %s9665_s2  ;;  %v7608_v16 = vpop.permute.xlu1 %3489  ;;  %v9714_v15 = vmov 4  }
 0x6f9   : > { %2654 = vrot.lane.b32.xlu0 %v7581_v36, %s9665_s2 }
 0x6fb   : > { %1273 = vrot.lane.b32.xlu1 %v9672_v37, %s9665_s2  ;;  %v7640_v37 = vmul.f32 %v9685_v48, %v3396_v49 }
 0x6fd   : > { %2747 = vperm.xlu0 %5223, %v7315_v62   ;;  %9716 = vst [vmem:[#allocation73_spill] sm:$0xff] %v7640_v37 }
 0x6ff   : > { %1421 = vrot.lane.b32.xlu1 %v7596_v0, %s9665_s2 }
 0x701   : > { %4147 = vperm.xlu0 %5223, %v7330_v28  }
 0x703   : > { %1546 = vperm.xlu1 %5222, %v7305_v52  }
 0x705   : > { %3417 = vrot.lane.b32.xlu0 %v7611_v38, %s9665_s2 }
 0x706   : > { %v7621_v12 = vpop.permute.xlu1 %3715  ;;  %v3424_v36 = vpop.permute.xlu0 %3423 }
 0x707   : > { %2452 = vrot.lane.b32.xlu1 %v7615_v6, %s9665_s2  ;;  %v3445_v0 = vsel %vm865_vm1, 0.0, %v3424_v36  ;;  %v3493_v6 = vsel %vm865_vm1, %v7356_v8, %v7386_v53  ;;  %v3527_v8 = vmul.f32 %v7228_v21, %v3505_v13 }
 0x708   : > { %5224 = vset.pattern.permute.xlu1 %v9714_v15  ;;  %v3471_v50 = vmul.f32 %v7222_v35, %v3445_v0  ;;  %v3528_v53 = vmul.f32 %v7228_v21, %v3493_v6  ;;  %v3631_v6 = vmul.f32 %v7250_v22, %v7360_v41  ;;  %v3696_v41 = vmul.f32 %v7279_v46, %v7373_v18 }
 0x709   : > { %3477 = vrot.lane.b32.xlu0 %v7178_v3, %s9665_s2 }
 0x70a   : > { %v3426_v9 = vpop.permute.xlu1 %3425 }
 0x70b   : > { %v3433_v38 = vsel %vm865_vm1, %v3424_v36, %v3426_v9  ;;  %2454 = vrot.lane.b32.xlu1 %v7629_v43, %s9665_s2  ;;  %v2423_v36 = vsel %vm1088_vm7, %v7438_v55, 0.0  ;;  %v7656_v43 = vmul.f32 %v9687_v59, %v2404_v24  ;;  %v3632_v24 = vmul.f32 %v7250_v22, %v7368_v29 }
 0x70c   : > { %v3472_v3 = vmul.f32 %v7222_v35, %v3433_v38  ;;  %v3558_v49 = vpop.permute.xlu0 %3557  ;;  %v3535_v35 = vadd.f32 %v3527_v8, %v3471_v50  ;;  %v7665_v55 = vmul.f32 %v9685_v48, %v2423_v36  ;;  %v3695_v22 = vmul.f32 %v7279_v46, %v7380_v63 }
 0x70d   : > { %3553 = vrot.lane.b32.xlu0 %v7640_v37, %s9665_s2  ;;  %9717 = vst [vmem:[#allocation31_spill] sm:$0xff] %v7656_v43  ;;  %v3355_v46 = vsel %vm1007_vm3, 0.0, %v7527_v60  ;;  %v3494_v60 = vsel %vm865_vm1, %v7382_v30, %v7608_v16  ;;  %v3384_v16 = vsel %vm1088_vm7, %v7545_v32, %v7460_v33 }
 0x70e   : > { %v3556_v9 = vpop.permute.xlu1 %3555  ;;  %v3536_v38 = vadd.f32 %v3528_v53, %v3472_v3  ;;  %9718 = vst [vmem:[#allocation8_spill] sm:$0xff] %v7665_v55  ;;  %v3663_v3 = vmul.f32 %v7264_v26, %v7188_v25  ;;  %v7703_v63 = vmul.f32 %v9683_v4, %v3355_v46  ;;  %v7736_v33 = vmul.f32 %v9687_v59, %v3384_v16 }
 0x70f   : > { %v3565_v23 = vsel %vm865_vm1, %v3556_v9, %v3558_v49  ;;  %v3577_v0 = vsel %vm865_vm1, 0.0, %v3556_v9  ;;  %2544 = vrot.lane.b32.xlu1 %v9670_v11, %s9665_s2  ;;  %v1089_v16 = vsel %vm1088_vm7, %v7562_v1, %v7469_v10 }
 0x710   : > { %v3599_v13 = vmul.f32 %v7236_v17, %v3577_v0  ;;  %v3600_v21 = vmul.f32 %v7236_v17, %v3565_v23  ;;  %v3664_v17 = vmul.f32 %v7264_v26, %v7194_v58  ;;  %9719 = vst [vmem:[#allocation71_spill] sm:$0xff] %v7703_v63 }
 0x711   : > { %2650 = vrot.lane.b32.xlu0 %v7656_v43, %s9665_s2 }
 0x712   : > { %v3607_v49 = vadd.f32 %v3599_v13, %v3535_v35  ;;  %v3608_v9 = vadd.f32 %v3600_v21, %v3536_v38  ;;  %v7673_v50 = vpop.permute.xlu1 %3717  ;;  %v3506_v13 = vsel %vm865_vm1, 0.0, %v7382_v30 }
 0x713   : > { %2656 = vrot.lane.b32.xlu1 %v7665_v55, %s9665_s2 }
 0x714   : > { %v3639_v8 = vadd.f32 %v3631_v6, %v3607_v49  ;;  %v3640_v53 = vadd.f32 %v3632_v24, %v3608_v9  ;;  %v3529_v49 = vmul.f32 %v7332_v39, %v3506_v13  ;;  %v3530_v9 = vmul.f32 %v7332_v39, %v3494_v60  ;;  %v9723_v13 = vld [vmem:[#allocation29_spill] sm:$0xff] }
 0x715   : > { %4143 = vperm.xlu0 %5223, %v7518_v45   ;;  %v3633_v39 = vmul.f32 %v7254_v5, %v7400_v44 }
 0x716   : > { %v3671_v29 = vadd.f32 %v3663_v3, %v3639_v8  ;;  %v3672_v36 = vadd.f32 %v3664_v17, %v3640_v53  ;;  %v7686_v23 = vpop.permute.xlu1 %3845 }
 0x717   : > { %2799 = vperm.xlu1 %5224, %v7287_v27  }
 0x718   : > { %v7689_v25 = vadd.f32 %v3695_v22, %v3671_v29  ;;  %v7691_v0 = vadd.f32 %v3696_v41, %v3672_v36  ;;  %v3395_v29 = vsel %vm1088_vm7, %v7494_v56, 0.0  ;;  %v9720_v36 = vld [vmem:[#allocation46_spill] sm:$0xff] }
 0x719   : > { %5228 = vset.pattern.permute.xlu0 %v9714_v15  ;;  %v7746_v44 = vmul.f32 %v9685_v48, %v3395_v29  ;;  %v1113_v29 = vsel %vm1088_vm7, %v7469_v10, 0.0  ;;  %v3865_v10 = vsel %vm1769_vm8, %v7686_v23, 0.0 }
 0x71a   : > { %v7694_v58 = vpop.permute.xlu1 %3843  ;;  %1614 = vperm.xlu0 %5228, %v7277_v2   ;;  %v3428_v26 = vpop.permute.xlu0 %3427 }
 0x71b   : > { %5225 = vset.pattern.permute.xlu1 %v9692_v34  ;;  %v3446_v18 = vsel %vm865_vm1, 0.0, %v3428_v26  ;;  %9724 = vst [vmem:[#allocation45_spill] sm:$0xff] %v7746_v44  ;;  %v9741_v34 = vmov 6  }
 0x71c   : > { %4127 = vperm.xlu1 %5225, %v7518_v45   ;;  %v3473_v6 = vmul.f32 %v7310_v42, %v3446_v18  ;;  %v9722_v18 = vld [vmem:[#allocation37_spill] sm:$0xff] }
 0x71d   : > { %v3666_v60 = vmul.f32 %v9722_v18, %v9723_v13 }
 0x71e   : > { %v3430_v35 = vpop.permute.xlu1 %3429  ;;  %3648 = vperm.xlu0 %5228, %v7297_v19   ;;  %v7706_v38 = vpop.permute.xlu0 %3719  ;;  %v3537_v8 = vadd.f32 %v3529_v49, %v3473_v6  ;;  %v9726_v49 = vld [vmem:[#allocation13_spill] sm:$0xff] }
 0x71f   : > { %v3434_v21 = vsel %vm865_vm1, %v3428_v26, %v3430_v35  ;;  %v3634_v26 = vmul.f32 %v7254_v5, %v9720_v36 }
 0x720   : > { %v3474_v24 = vmul.f32 %v7310_v42, %v3434_v21  ;;  %3415 = vrot.lane.b32.xlu1 %v7703_v63, %s9665_s2 }
 0x721   : > { %5226 = vset.pattern.permute.xlu1 %v9694_v7 }
 0x722   : > { %v3560_v3 = vpop.permute.xlu1 %3559  ;;  %1610 = vperm.xlu0 %5228, %v7305_v52   ;;  %v3562_v17 = vpop.permute.xlu0 %3561  ;;  %v3538_v53 = vadd.f32 %v3530_v9, %v3474_v24  ;;  %v9725_v24 = vld [vmem:[#allocation66_spill] sm:$0xff]  ;;  %v3697_v9 = vmul.f32 %v9726_v49, %v7422_v61  ;;  %v9727_v61 = vld [vmem:[#allocation28_spill] sm:$0xff] }
 0x723   : > { %v3578_v30 = vsel %vm865_vm1, 0.0, %v3560_v3  ;;  %v3566_v42 = vsel %vm865_vm1, %v3560_v3, %v3562_v17  ;;  %v3698_v5 = vmul.f32 %v9726_v49, %v9725_v24  ;;  %v3802_v24 = vsel %vm1769_vm8, %v7606_v47, 0.0  ;;  %v9734_v49 = vld [vmem:[#allocation85_spill] sm:$0xff] }
 0x724   : > { %v3601_v22 = vmul.f32 %v7244_v20, %v3578_v30  ;;  %v3602_v41 = vmul.f32 %v7244_v20, %v3566_v42  ;;  %3475 = vrot.lane.b32.xlu1 %v7176_v54, %s9665_s2  ;;  %v9721_v20 = vld [vmem:[#allocation63_spill] sm:$0xff]  ;;  %v3737_v30 = vsel %vm1769_vm8, %v7673_v50, 0.0 }
 0x725   : > { %v3665_v35 = vmul.f32 %v9722_v18, %v9721_v20  ;;  %v9731_v20 = vld [vmem:[#allocation24_spill] sm:$0xff] }
 0x726   : > { %v3609_v32 = vadd.f32 %v3601_v22, %v3537_v8  ;;  %v3610_v46 = vadd.f32 %v3602_v41, %v3538_v53  ;;  %2795 = vperm.xlu0 %5228, %v7315_v62   ;;  %v7765_v53 = vmul.f32 %v9687_v59, %v1089_v16  ;;  %v3760_v22 = vmul.f32 %v9727_v61, %v3737_v30  ;;  %v7768_v41 = vpop.permute.xlu1 %3721 }
 0x728   : > { %v3641_v21 = vadd.f32 %v3633_v39, %v3609_v32  ;;  %v3642_v6 = vadd.f32 %v3634_v26, %v3610_v46  ;;  %3551 = vrot.lane.b32.xlu1 %v7736_v33, %s9665_s2  ;;  %v9728_v39 = vld [vmem:[#allocation86_spill] sm:$0xff]  ;;  %v3768_v36 = vadd.f32 %v3760_v22, %v7691_v0  ;;  %v3738_v26 = vsel %vm1769_vm8, %v7768_v41, 0.0 }
 0x729   : > { %v3801_v1 = vsel %vm1769_vm8, %v9728_v39, 0.0  ;;  %v9730_v46 = vmov 5  }
 0x72a   : > { %v3674_v3 = vadd.f32 %v3666_v60, %v3642_v6  ;;  %v3673_v17 = vadd.f32 %v3665_v35, %v3641_v21  ;;  %3549 = vrot.lane.b32.xlu0 %v7746_v44, %s9665_s2  ;;  %v3824_v18 = vmul.f32 %v9731_v20, %v3801_v1  ;;  %v7785_v35 = vmul.f32 %v9685_v48, %v1113_v29  ;;  %v9733_v60 = vld [vmem:[#allocation33_spill] sm:$0xff] }
 0x72b   : > { %v3762_v21 = vmul.f32 %v9733_v60, %v3738_v26  ;;  %v9797_v44 = vld [vmem:[#allocation69_spill] sm:$0xff] }
 0x72c   : > { %v7761_v42 = vadd.f32 %v3697_v9, %v3673_v17  ;;  %v3706_v8 = vadd.f32 %v3698_v5, %v3674_v3  ;;  %3612 = vperm.xlu1 %5226, %v7436_v14   ;;  %v3832_v0 = vadd.f32 %v3824_v18, %v3768_v36  ;;  %v3888_v5 = vmul.f32 %v9734_v49, %v3865_v10  ;;  %v9735_v17 = vld [vmem:[#allocation83_spill] sm:$0xff] }
 0x72d   : > { %v2422_v3 = vsel %vm1088_vm7, %v7482_v51, 0.0  ;;  %v3826_v16 = vmul.f32 %v9735_v17, %v3802_v24 }
 0x72e   : > { %4159 = vperm.xlu0 %5228, %v7518_v45   ;;  %v3770_v9 = vadd.f32 %v3762_v21, %v3706_v8  ;;  %v3896_v30 = vadd.f32 %v3888_v5, %v3832_v0  ;;  %v7810_v36 = vmul.f32 %v9685_v48, %v2422_v3  ;;  %v9738_v8 = vld [vmem:[#allocation56_spill] sm:$0xff]  ;;  %v9803_v48 = vld [vmem:[#allocation82_spill] sm:$0xff] }
 0x72f   : > { %v7775_v32 = vpop.permute.xlu0 %4095  ;;  %v9739_v21 = vld [vmem:[#allocation64_spill] sm:$0xff] }
 0x730   : > { %9729 = vst [vmem:[#allocation79_spill] sm:$0xff] %v7775_v32  ;;  %1417 = vrot.lane.b32.xlu1 %v7765_v53, %s9665_s2  ;;  %9737 = vst [vmem:[#allocation74_spill] sm:$0xff] %v7810_v36  ;;  %v3834_v26 = vadd.f32 %v3826_v16, %v3770_v9  ;;  %v3928_v24 = vadd.f32 %v9739_v21, %v3896_v30  ;;  %v9740_v5 = vld [vmem:[#allocation80_spill] sm:$0xff]  ;;  %v3383_v30 = vsel %vm1088_vm7, %v7591_v31, %v7494_v56 }
 0x731   : > { %5227 = vset.pattern.permute.xlu1 %v9730_v46 }
 0x732   : > { %5232 = vset.pattern.permute.xlu0 %v9730_v46  ;;  %v3936_v16 = vmax.f32 %v3928_v24, 0.0  ;;  %v9743_v24 = vld [vmem:[#allocation65_spill] sm:$0xff] }
 0x733   : > { %v7790_v13 = vpop.permute.xlu1 %3449  ;;  %3680 = vperm.xlu0 %5232, %v7297_v19  }
 0x734   : > { %9732 = vst [vmem:[#allocation40_spill] sm:$0xff] %v7790_v13  ;;  %1419 = vrot.lane.b32.xlu1 %v7785_v35, %s9665_s2  ;;  %v7796_v6 = vpop.permute.xlu0 %1486  ;;  %v3179_v13 = vld [vmem:[%s9050_s8 + $0x8] sm:$0xff] }
 0x737   : > { %2843 = vperm.xlu0 %5232, %v7315_v62  }
 0x738   : > { %v7805_v22 = vpop.permute.xlu1 %3508  ;;  %1678 = vperm.xlu1 %5227, %v7277_v2   ;;  %v3850_v1 = vpop.permute.xlu0 %3849 }
 0x739   : > { %9736 = vst [vmem:[#allocation53_spill] sm:$0xff] %v7805_v22  ;;  %v3866_v29 = vsel %vm1769_vm8, %v3850_v1, 0.0 }
 0x73a   : > { %v3890_v18 = vmul.f32 %v9738_v8, %v3866_v29 }
 0x73b   : > { %4175 = vperm.xlu0 %5232, %v7518_v45  }
 0x73c   : > { %v3898_v51 = vadd.f32 %v3890_v18, %v3834_v26  ;;  %v7814_v10 = vpop.permute.xlu1 %1157  ;;  %2652 = vrot.lane.b32.xlu1 %v7810_v36, %s9665_s2  ;;  %v7818_v0 = vpop.permute.xlu0 %2703  ;;  %v3725_v18 = vsel %vm1769_vm8, %v7621_v12, %v7673_v50  ;;  %v3789_v12 = vsel %vm1769_vm8, %v9743_v24, %v9728_v39  ;;  %v7847_v50 = vmul.f32 %v9687_v59, %v3383_v30 }
 0x73d   : > { %v3726_v39 = vsel %vm1769_vm8, %v7706_v38, %v7768_v41  ;;  %v9746_v24 = vmov 8  }
 0x73e   : > { %v3930_v7 = vadd.f32 %v9740_v5, %v3898_v51  ;;  %9744 = vst [vmem:[#allocation78_spill] sm:$0xff] %v7847_v50 }
 0x73f   : > { %5236 = vset.pattern.permute.xlu0 %v9741_v34 }
 0x740   : > { %v7823_v3 = vpop.permute.xlu1 %1159  ;;  %2847 = vperm.xlu1 %5227, %v7287_v27   ;;  %3744 = vperm.xlu0 %5236, %v7297_v19   ;;  %v7827_v9 = vpop.permute.xlu0 %3584  ;;  %v3938_v29 = vmax.f32 %v3930_v7, 0.0  ;;  %v3759_v7 = vmul.f32 %v9727_v61, %v3725_v18  ;;  %v3853_v61 = vsel %vm1769_vm8, %v7694_v58, %v7686_v23  ;;  %v9745_v23 = vld [vmem:[#allocation19_spill] sm:$0xff] }
 0x741   : > { %9742 = vst [vmem:[#allocation25_spill] sm:$0xff] %v7827_v9  ;;  %v3790_v58 = vsel %vm1769_vm8, %v9745_v23, %v7606_v47 }
 0x742   : > { %v3942_v26 = vpack.c.bf16 %v3938_v29, %v3936_v16  ;;  %v3767_v56 = vadd.f32 %v3759_v7, %v7689_v25  ;;  %v3823_v25 = vmul.f32 %v9731_v20, %v3789_v12  ;;  %v3887_v29 = vmul.f32 %v9734_v49, %v3853_v61 }
 0x743   : > { %v3825_v41 = vmul.f32 %v9735_v17, %v3790_v58  ;;  %v9752_v58 = vmov 0.0  }
 0x744   : > { %v7835_v51 = vpop.permute.xlu1 %1279  ;;  %5229 = vset.pattern.permute.xlu1 %v9714_v15  ;;  %2939 = vperm.xlu0 %5236, %v7315_v62   ;;  %v7839_v32 = vpop.permute.xlu0 %1277  ;;  %v3831_v16 = vadd.f32 %v3823_v25, %v3767_v56 }
 0x745   : > { %3965 = vmatprep.subr.bf16.mxu0 %v3942_v26  ;;  %4163 = vperm.xlu1 %5229, %v7330_v28   ;;  %v3761_v26 = vmul.f32 %v9733_v60, %v3726_v39 }
 0x746   : > { %v3895_v20 = vadd.f32 %v3887_v29, %v3831_v16 }
 0x747   : > { %v3769_v38 = vadd.f32 %v3761_v26, %v7761_v42 }
 0x748   : > { %v7850_v31 = vpop.permute.xlu1 %1550  ;;  %2894 = vrot.lane.b32.xlu0 %v7485_v40, %s9583_s30  ;;  %v7854_v15 = vpop.permute.xlu0 %1482  ;;  %v3927_v42 = vadd.f32 %v9739_v21, %v3895_v20 }
 0x749   : > { %3547 = vrot.lane.b32.xlu1 %v7847_v50, %s9665_s2  ;;  %v3833_v47 = vadd.f32 %v3825_v41, %v3769_v38  ;;  %v9753_v38 = vmov 7   ;;  %v9788_v50 = vld [vmem:[#allocation84_spill] sm:$0xff] }
 0x74a   : > { %v3935_v39 = vmax.f32 %v3927_v42, 0.0  ;;  %v9758_v42 = vld [vmem:[#allocation39_spill] sm:$0xff] }
 0x74c   : > { %v7867_v18 = vpop.permute.xlu1 %2458  ;;  %4207 = vperm.xlu0 %5236, %v7518_v45   ;;  %v7870_v30 = vpop.permute.xlu0 %2456 }
 0x74d   : > { %3644 = vperm.xlu1 %5229, %v7436_v14  }
 0x750   : > { %v3848_v49 = vpop.permute.xlu1 %3847  ;;  %3713 = vrot.lane.b32.xlu0 %v7541_v57, %s9583_s30  ;;  %v7880_v60 = vpop.permute.xlu0 %2546 }
 0x751   : > { %v3854_v7 = vsel %vm1769_vm8, %v3848_v49, %v3850_v1  ;;  %5230 = vset.pattern.permute.xlu1 %v9730_v46  ;;  %5240 = vset.pattern.permute.xlu0 %v9746_v24 }
 0x752   : > { %v3889_v12 = vmul.f32 %v9738_v8, %v3854_v7  ;;  %1674 = vperm.xlu1 %5230, %v7305_v52   ;;  %v9748_v8 = vld [vmem:[#allocation20_spill] sm:$0xff] }
 0x754   : > { %v3897_v17 = vadd.f32 %v3889_v12, %v3833_v47  ;;  %v7888_v56 = vpop.permute.xlu1 %2548  ;;  %3872 = vperm.xlu0 %5240, %v7297_v19   ;;  %v7891_v61 = vpop.permute.xlu0 %2699 }
 0x755   : > { %9747 = vst [vmem:[#allocation11_spill] sm:$0xff] %v7891_v61 }
 0x756   : > { %v3929_v1 = vadd.f32 %v9740_v5, %v3897_v17  ;;  %5231 = vset.pattern.permute.xlu1 %v9741_v34  ;;  %v5264_v5 = vld [vmem:[%s9054_s12] sm:$0xff]  }
 0x757   : > { %1807 = vperm.xlu1 %5231, %v7277_v2  }
 0x758   : > { %v3937_v25 = vmax.f32 %v3929_v1, 0.0  ;;  %1870 = vrot.lane.b32.xlu0 %v9748_v8, %s9583_s30  ;;  %v7898_v16 = vpop.permute.xlu0 %3419  ;;  %v7900_v21 = vpop.permute.xlu1 %2751 }
 0x759   : > { %9749 = vst [vmem:[#allocation55_spill] sm:$0xff] %v7898_v16 }
 0x75a   : > { %v3941_v29 = vpack.c.bf16 %v3937_v25, %v3935_v39  ;;  %v9761_v39 = vld [vmem:[#allocation15_spill] sm:$0xff] }
 0x75b   : > { %2943 = vperm.xlu1 %5231, %v7287_v27  }
 0x75c   : > { %2059 = vperm.xlu0 %5240, %v7305_v52   ;;  %v7907_v26 = vpop.permute.xlu0 %3479  ;;  %3966 = vmatpush1.bf16.msra.mxu0 %v3941_v29 }
 0x75d   : > { %9750 = vst [vmem:[#allocation58_spill] sm:$0xff] %v7907_v26  ;;  %v7909_v23 = vpop.permute.xlu1 %4091  ;;  %5096 = vmatprep.subr.mxu0 %v9752_v58 }
 0x75e   : > { %9751 = vst [vmem:[#allocation54_spill] sm:$0xff] %v7909_v23 }
 0x75f   : > { %5233 = vset.pattern.permute.xlu1 %v9730_v46  ;;  %5065 = vmatmul.mubr.msk.bf16.vlgmr.msra.gmra.mxu0 %vm865_vm1, %v5264_v5 }
 0x760   : > { %5241 = vset.pattern.permute.xlu0 %v9753_v38  ;;  %4179 = vperm.xlu1 %5233, %v7330_v28   ;;  %v7916_v41 = vpop.permute.xlu0 %3580 }
 0x761   : > { %9754 = vst [vmem:[#allocation41_spill] sm:$0xff] %v7916_v41  ;;  %3808 = vperm.xlu0 %5241, %v7297_v19  }
 0x762   : > { %v7919_v20 = vpop.permute.xlu1 %4131 }
 0x763   : > { %9755 = vst [vmem:[#allocation48_spill] sm:$0xff] %v7919_v20  ;;  %v9763_v20 = vmov 0  }
 0x764   : > { %3676 = vperm.xlu1 %5233, %v7436_v14   ;;  %v7922_v49 = vpop.permute.xlu0 %1155 }
 0x765   : > { %1931 = vperm.xlu0 %5241, %v7305_v52  }
 0x766   : > { %v7925_v7 = vpop.permute.xlu1 %3421 }
 0x767   : > { %9756 = vst [vmem:[#allocation75_spill] sm:$0xff] %v7925_v7 }
 0x768   : > { %5234 = vset.pattern.permute.xlu1 %v9741_v34  ;;  %v7928_v46 = vpop.permute.xlu0 %1275 }
 0x769   : > { %1803 = vperm.xlu1 %5234, %v7305_v52   ;;  %3035 = vperm.xlu0 %5241, %v7315_v62  }
 0x76a   : > { %v7932_v47 = vpop.permute.xlu1 %3481 }
 0x76b   : > { %9757 = vst [vmem:[#allocation38_spill] sm:$0xff] %v7932_v47  ;;  %v9775_v47 = vld [vmem:[#allocation26_spill] sm:$0xff] }
 0x76c   : > { %v7934_v12 = vpop.permute.xlu0 %1423 }
 0x76d   : > { %5235 = vset.pattern.permute.xlu1 %v9753_v38  ;;  %2892 = vrot.lane.b32.xlu0 %v9758_v42, %s9583_s30 }
 0x76e   : > { %v7939_v17 = vpop.permute.xlu1 %3616  ;;  %1935 = vperm.xlu1 %5235, %v7277_v2  }
 0x76f   : > { %9759 = vst [vmem:[#allocation14_spill] sm:$0xff] %v7939_v17  ;;  %v9768_v17 = vld [vmem:[#allocation87_spill] sm:$0xff] }
 0x770   : > { %v7942_v1 = vpop.permute.xlu0 %2542 }
 0x771   : > { %9760 = vst [vmem:[#allocation77_spill] sm:$0xff] %v7942_v1  ;;  %2992 = vrot.lane.b32.xlu0 %v9761_v39, %s9583_s30 }
 0x772   : > { %v7946_v25 = vpop.permute.xlu1 %1153  ;;  %3039 = vperm.xlu1 %5235, %v7287_v27  }
 0x774   : > { %v7949_v29 = vpop.permute.xlu0 %2654 }
 0x775   : > { %4239 = vperm.xlu0 %5241, %v7518_v45  }
 0x776   : > { %v7952_v5 = vpop.permute.xlu1 %1273  ;;  %5237 = vset.pattern.permute.xlu1 %v9741_v34  ;;  %v9765_v34 = vld [vmem:[#allocation35_spill] sm:$0xff] }
 0x777   : > { %4211 = vperm.xlu1 %5237, %v7330_v28  }
 0x778   : > { %v7956_v58 = vpop.permute.xlu0 %2747 }
 0x779   : > { %9762 = vst [vmem:[#allocation9_spill] sm:$0xff] %v7956_v58  ;;  %5243 = vset.pattern.permute.xlu0 %v9763_v20 }
 0x77a   : > { %v7959_v23 = vpop.permute.xlu1 %1421  ;;  %1224 = vperm.xlu0 %5243, %v7277_v2  }
 0x77b   : > { %3740 = vperm.xlu1 %5237, %v7436_v14  }
 0x77c   : > { %v7963_v42 = vpop.permute.xlu0 %4147 }
 0x77d   : > { %9764 = vst [vmem:[#allocation36_spill] sm:$0xff] %v7963_v42 }
 0x77e   : > { %v7965_v61 = vpop.permute.xlu1 %1546  ;;  %2507 = vperm.xlu0 %5243, %v7287_v27  }
 0x77f   : > { %1741 = vrot.lane.b32.xlu1 %v9765_v34, %s9583_s30 }
 0x780   : > { %v7970_v9 = vpop.permute.xlu0 %3417  ;;  %5238 = vset.pattern.permute.xlu1 %v9746_v24 }
 0x781   : > { %9766 = vst [vmem:[#allocation22_spill] sm:$0xff] %v7970_v9 }
 0x782   : > { %v7973_v58 = vpop.permute.xlu1 %2452  ;;  %3454 = vperm.xlu0 %5243, %v7297_v19  }
 0x783   : > { %9767 = vst [vmem:[#allocation10_spill] sm:$0xff] %v7973_v58  ;;  %1743 = vrot.lane.b32.xlu1 %v9768_v17, %s9583_s30  ;;  %v9773_v58 = vld [vmem:[#allocation34_spill] sm:$0xff] }
 0x784   : > { %v7978_v57 = vpop.permute.xlu0 %3477 }
 0x785   : > { %9769 = vst [vmem:[#allocation27_spill] sm:$0xff] %v7978_v57 }
 0x786   : > { %v7980_v42 = vpop.permute.xlu1 %2454  ;;  %1219 = vperm.xlu0 %5243, %v7305_v52  }
 0x787   : > { %9770 = vst [vmem:[#allocation30_spill] sm:$0xff] %v7980_v42  ;;  %2063 = vperm.xlu1 %5238, %v7277_v2   ;;  %v9778_v42 = vld [vmem:[#allocation16_spill] sm:$0xff] }
 0x788   : > { %v7984_v1 = vpop.permute.xlu0 %3553 }
 0x789   : > { %9771 = vst [vmem:[#allocation44_spill] sm:$0xff] %v7984_v1 }
 0x78a   : > { %v7986_v16 = vpop.permute.xlu1 %2544  ;;  %4062 = vperm.xlu0 %5243, %v7518_v45  }
 0x78b   : > { %9772 = vst [vmem:[#allocation7_spill] sm:$0xff] %v7986_v16  ;;  %2896 = vrot.lane.b32.xlu1 %v9773_v58, %s9583_s30 }
 0x78c   : > { %v7991_v19 = vpop.permute.xlu0 %2650 }
 0x78d   : > { %9774 = vst [vmem:[#allocation76_spill] sm:$0xff] %v7991_v19  ;;  %v9779_v19 = vld [vmem:[#allocation17_spill] sm:$0xff] }
 0x78e   : > { %v7993_v7 = vpop.permute.xlu1 %2656  ;;  %3709 = vrot.lane.b32.xlu0 %v9775_v47, %s9583_s30  ;;  %v9783_v47 = vld [vmem:[#allocation12_spill] sm:$0xff] }
 0x78f   : > { %3135 = vperm.xlu1 %5238, %v7287_v27   ;;  %v9781_v27 = vld [vmem:[#allocation89_spill] sm:$0xff] }
 0x790   : > { %v7998_v52 = vpop.permute.xlu0 %4143 }
 0x791   : > { %9776 = vst [vmem:[#allocation46_spill] sm:$0xff] %v7998_v52 }
 0x792   : > { %v8000_v2 = vpop.permute.xlu1 %2799  ;;  %3777 = vrot.lane.b32.xlu0 %v9778_v42, %s9583_s30 }
 0x793   : > { %9777 = vst [vmem:[#allocation63_spill] sm:$0xff] %v8000_v2  ;;  %5239 = vset.pattern.permute.xlu1 %v9753_v38  ;;  %v2123_v38 = vld [vmem:[%s9405_s26 + $0x8] sm:$0xff] }
 0x794   : > { %4243 = vperm.xlu1 %5239, %v7330_v28  }
 0x795   : > { %v8006_v16 = vpop.permute.xlu0 %1614 }
 0x796   : > { %1866 = vrot.lane.b32.xlu0 %v9779_v19, %s9583_s30 }
 0x797   : > { %v8010_v1 = vpop.permute.xlu1 %4127 }
 0x798   : > { %9780 = vst [vmem:[#allocation37_spill] sm:$0xff] %v8010_v1  ;;  %3711 = vrot.lane.b32.xlu1 %v9781_v27, %s9583_s30  ;;  %v9786_v27 = vld [vmem:[#allocation50_spill] sm:$0xff] }
 0x799   : > { %v8014_v52 = vpop.permute.xlu0 %3648 }
 0x79a   : > { %9782 = vst [vmem:[#allocation29_spill] sm:$0xff] %v8014_v52  ;;  %1998 = vrot.lane.b32.xlu0 %v9783_v47, %s9583_s30 }
 0x79b   : > { %v8018_v42 = vpop.permute.xlu1 %3415 }
 0x79c   : > { %9784 = vst [vmem:[#allocation66_spill] sm:$0xff] %v8018_v42  ;;  %3804 = vperm.xlu1 %5239, %v7436_v14  }
 0x79d   : > { %v8024_v26 = vpop.permute.xlu0 %1610 }
 0x79e   : > { %2137 = vperm.xlu0 %5243, %v2123_v38   ;;  %v9790_v38 = vld [vmem:[#allocation43_spill] sm:$0xff] }
 0x79f   : > { %v8026_v1 = vpop.permute.xlu1 %3475 }
 0x7a0   : > { %9785 = vst [vmem:[#allocation13_spill] sm:$0xff] %v8026_v1  ;;  %1737 = vrot.lane.b32.xlu1 %v9786_v27, %s9583_s30 }
 0x7a1   : > { %v8030_v52 = vpop.permute.xlu0 %2795  ;;  %5242 = vset.pattern.permute.xlu1 %v9746_v24 }
 0x7a2   : > { %9787 = vst [vmem:[#allocation28_spill] sm:$0xff] %v8030_v52  ;;  %3086 = vrot.lane.b32.xlu0 %v9788_v50, %s9583_s30  ;;  %v9793_v52 = vld [vmem:[#allocation21_spill] sm:$0xff] }
 0x7a3   : > { %v8035_v41 = vpop.permute.xlu1 %3551 }
 0x7a4   : > { %9789 = vst [vmem:[#allocation86_spill] sm:$0xff] %v8035_v41  ;;  %1739 = vrot.lane.b32.xlu1 %v9790_v38, %s9583_s30  ;;  %v9795_v41 = vld [vmem:[#allocation70_spill] sm:$0xff] }
 0x7a5   : > { %v8042_v22 = vpop.permute.xlu0 %3549 }
 0x7a6   : > { %9791 = vst [vmem:[#allocation24_spill] sm:$0xff] %v8042_v22  ;;  %3191 = vperm.xlu0 %5243, %v3179_v13  }
 0x7a7   : > { %v8044_v42 = vpop.permute.xlu1 %3612 }
 0x7a8   : > { %9792 = vst [vmem:[#allocation33_spill] sm:$0xff] %v8044_v42  ;;  %1872 = vrot.lane.b32.xlu1 %v9793_v52, %s9583_s30 }
 0x7a9   : > { %v8048_v24 = vpop.permute.xlu0 %4159 }
 0x7aa   : > { %9794 = vst [vmem:[#allocation85_spill] sm:$0xff] %v8048_v24 }
 0x7ab   : > { %v8050_v9 = vpop.permute.xlu1 %1417 }
 0x7ac   : > { %2890 = vrot.lane.b32.xlu1 %v9795_v41, %s9583_s30 }
 0x7ae   : > { %v8056_v57 = vpop.permute.xlu0 %3680 }
 0x7af   : > { %v8054_v1 = vpop.permute.xlu1 %1419  ;;  %9796 = vst [vmem:[#allocation83_spill] sm:$0xff] %v8056_v57 }
 0x7b0   : > { %2990 = vrot.lane.b32.xlu1 %v9797_v44, %s9583_s30 }
 0x7b2   : > { %v8063_v42 = vpop.permute.xlu0 %2843 }
 0x7b3   : > { %v8060_v13 = vpop.permute.xlu1 %1678  ;;  %9798 = vst [vmem:[#allocation56_spill] sm:$0xff] %v8063_v42 }
 0x7b4   : > { %3131 = vperm.xlu1 %5242, %v7315_v62  }
 0x7b6   : > { %v8070_v41 = vpop.permute.xlu0 %4175 }
 0x7b7   : > { %v8065_v22 = vpop.permute.xlu1 %2652  ;;  %9801 = vst [vmem:[#allocation65_spill] sm:$0xff] %v8070_v41 }
 0x7b8   : > { %9799 = vst [vmem:[#allocation64_spill] sm:$0xff] %v8065_v22  ;;  %4275 = vperm.xlu1 %5242, %v7330_v28   ;;  %v9807_v28 = vld [vmem:[#allocation18_spill] sm:$0xff]  ;;  %v9809_v22 = vld [vmem:[#allocation51_spill] sm:$0xff] }
 0x7bb   : > { %v8068_v24 = vpop.permute.xlu1 %2847  ;;  %v8078_v59 = vpop.permute.xlu0 %3744 }
 0x7bc   : > { %9800 = vst [vmem:[#allocation80_spill] sm:$0xff] %v8068_v24  ;;  %3707 = vrot.lane.b32.xlu1 %v7703_v63, %s9583_s30  ;;  %9804 = vst [vmem:[#allocation20_spill] sm:$0xff] %v8078_v59  ;;  %v9811_v59 = vld [vmem:[#allocation23_spill] sm:$0xff] }
 0x7bf   : > { %v8083_v42 = vpop.permute.xlu0 %2939 }
 0x7c0   : > { %v8074_v57 = vpop.permute.xlu1 %4163  ;;  %3775 = vrot.lane.b32.xlu1 %v9803_v48, %s9583_s30  ;;  %9806 = vst [vmem:[#allocation87_spill] sm:$0xff] %v8083_v42 }
 0x7c1   : > { %9802 = vst [vmem:[#allocation19_spill] sm:$0xff] %v8074_v57 }
 0x7c3   : > { %v8091_v57 = vpop.permute.xlu0 %2894 }
 0x7c4   : > { %3868 = vperm.xlu1 %5242, %v7436_v14   ;;  %v8081_v62 = vpop.permute.xlu1 %3547  ;;  %9810 = vst [vmem:[#allocation17_spill] sm:$0xff] %v8091_v57 }
 0x7c5   : > { %9805 = vst [vmem:[#allocation35_spill] sm:$0xff] %v8081_v62 }
 0x7c7   : > { %v8099_v48 = vpop.permute.xlu0 %4207 }
 0x7c8   : > { %1868 = vrot.lane.b32.xlu1 %v9807_v28, %s9583_s30  ;;  %v8087_v41 = vpop.permute.xlu1 %3644  ;;  %9813 = vst [vmem:[#allocation50_spill] sm:$0xff] %v8099_v48 }
 0x7c9   : > { %9808 = vst [vmem:[#allocation34_spill] sm:$0xff] %v8087_v41 }
 0x7cb   : > { %v8107_v41 = vpop.permute.xlu0 %3713 }
 0x7cc   : > { %2000 = vrot.lane.b32.xlu1 %v9809_v22, %s9583_s30  ;;  %9815 = vst [vmem:[#allocation21_spill] sm:$0xff] %v8107_v41 }
 0x7cd   : > { %v8093_v63 = vpop.permute.xlu1 %1674 }
 0x7cf   : > { %v8111_v4 = vpop.permute.xlu0 %3872 }
 0x7d0   : > { %2986 = vrot.lane.b32.xlu1 %v9811_v59, %s9583_s30  ;;  %9817 = vst [vmem:[#allocation51_spill] sm:$0xff] %v8111_v4 }
 0x7d2   : > { %v8097_v14 = vpop.permute.xlu1 %1807 }
 0x7d3   : > { %9812 = vst [vmem:[#allocation12_spill] sm:$0xff] %v8097_v14  ;;  %v8117_v50 = vpop.permute.xlu0 %1870 }
 0x7d4   : > { %2988 = vrot.lane.b32.xlu1 %v9670_v11, %s9583_s30  ;;  %9819 = vst [vmem:[#allocation91_spill] sm:$0xff] %v8117_v50  ;;  %v9844_v50 = vld [vmem:[#allocation68_spill] sm:$0xff] }
 0x7d6   : > { %v8103_v42 = vpop.permute.xlu1 %2943 }
 0x7d7   : > { %9814 = vst [vmem:[#allocation43_spill] sm:$0xff] %v8103_v42  ;;  %v8121_v11 = vpop.permute.xlu0 %2059 }
 0x7d8   : > { %3088 = vrot.lane.b32.xlu1 %v7665_v55, %s9583_s30  ;;  %9821 = vst [vmem:[#allocation93_spill] sm:$0xff] %v8121_v11 }
 0x7db   : > { %v8109_v62 = vpop.permute.xlu1 %4179 }
 0x7dc   : > { %9816 = vst [vmem:[#allocation18_spill] sm:$0xff] %v8109_v62  ;;  %v8125_v57 = vpop.permute.xlu0 %3808 }
 0x7dd   : > { %9823 = vst [vmem:[#allocation95_spill] sm:$0xff] %v8125_v57 }
 0x7df   : > { %v8113_v36 = vpop.permute.xlu1 %3676 }
 0x7e0   : > { %9818 = vst [vmem:[#allocation90_spill] sm:$0xff] %v8113_v36  ;;  %v8131_v62 = vpop.permute.xlu0 %1931 }
 0x7e1   : > { %9826 = vst [vmem:[#allocation98_spill] sm:$0xff] %v8131_v62  ;;  %v1210_v62 = vsel %vm865_vm1, 0.0, %v7814_v10 }
 0x7e4   : > { %v8115_v59 = vpop.permute.xlu1 %1803  ;;  %v8135_v36 = vpop.permute.xlu0 %3035 }
 0x7e5   : > { %9827 = vst [vmem:[#allocation99_spill] sm:$0xff] %v8135_v36 }
 0x7e8   : > { %v8141_v2 = vpop.permute.xlu0 %2892 }
 0x7e9   : > { %v8119_v48 = vpop.permute.xlu1 %1935  ;;  %9829 = vst [vmem:[#allocation101_spill] sm:$0xff] %v8141_v2 }
 0x7ea   : > { %9820 = vst [vmem:[#allocation92_spill] sm:$0xff] %v8119_v48  ;;  %v1186_v48 = vsel %vm865_vm1, %v7814_v10, %v7823_v3  ;;  %v1306_v10 = vsel %vm865_vm1, %v7839_v32, %v7835_v51  ;;  %v1330_v3 = vsel %vm865_vm1, 0.0, %v7839_v32  ;;  %v9845_v51 = vld [vmem:[#allocation49_spill] sm:$0xff] }
 0x7eb   : > { %v1371_v32 = vmul.f32 %v9845_v51, %v1330_v3 }
 0x7ed   : > { %v8123_v42 = vpop.permute.xlu1 %3039 }
 0x7ee   : > { %9822 = vst [vmem:[#allocation94_spill] sm:$0xff] %v8123_v42  ;;  %v8145_v42 = vpop.permute.xlu0 %2992 }
 0x7ef   : > { %9831 = vst [vmem:[#allocation103_spill] sm:$0xff] %v8145_v42 }
 0x7f2   : > { %v8127_v24 = vpop.permute.xlu1 %4211 }
 0x7f3   : > { %9824 = vst [vmem:[#allocation96_spill] sm:$0xff] %v8127_v24 }
 0x7f6   : > { %v8129_v41 = vpop.permute.xlu1 %3740 }
 0x7f7   : > { %9825 = vst [vmem:[#allocation97_spill] sm:$0xff] %v8129_v41  ;;  %v8151_v41 = vpop.permute.xlu0 %4239 }
 0x7f8   : > { %9834 = vst [vmem:[#allocation106_spill] sm:$0xff] %v8151_v41 }
 0x7fa   : > { %v8133_v4 = vpop.permute.xlu1 %1741 }
 0x7fb   : > { %v1225_v37 = vpop.permute.xlu0 %1224 }
 0x7fc   : > { %v1260_v14 = vmul.f32 %v1225_v37, %v1186_v48 }
 0x7fe   : > { %v8137_v55 = vpop.permute.xlu1 %1743 }
 0x802   : > { %v8139_v44 = vpop.permute.xlu1 %2063 }
 0x803   : > { %9828 = vst [vmem:[#allocation100_spill] sm:$0xff] %v8139_v44  ;;  %v8159_v44 = vpop.permute.xlu0 %2507 }
 0x806   : > { %v8143_v11 = vpop.permute.xlu1 %2896 }
 0x807   : > { %9830 = vst [vmem:[#allocation102_spill] sm:$0xff] %v8143_v11 }
 0x80a   : > { %v8147_v57 = vpop.permute.xlu1 %3135 }
 0x80b   : > { %9832 = vst [vmem:[#allocation104_spill] sm:$0xff] %v8147_v57 }
 0x80f   : > { %v8149_v24 = vpop.permute.xlu1 %4243 }
 0x810   : > { %9833 = vst [vmem:[#allocation105_spill] sm:$0xff] %v8149_v24  ;;  %v8169_v24 = vpop.permute.xlu0 %3454 }
 0x811   : > { %9839 = vst [vmem:[#allocation111_spill] sm:$0xff] %v8169_v24 }
 0x813   : > { %v8153_v39 = vpop.permute.xlu1 %3711 }
 0x814   : > { %9835 = vst [vmem:[#allocation107_spill] sm:$0xff] %v8153_v39 }
 0x817   : > { %v8155_v36 = vpop.permute.xlu1 %3804 }
 0x818   : > { %9836 = vst [vmem:[#allocation108_spill] sm:$0xff] %v8155_v36  ;;  %v1220_v36 = vpop.permute.xlu0 %1219 }
 0x81b   : > { %v8157_v40 = vpop.permute.xlu1 %1737 }
 0x81f   : > { %v8161_v2 = vpop.permute.xlu1 %1739  ;;  %v8163_v11 = vpop.f32.mrf.mxu0 }
 0x820   : > { %9837 = vst [vmem:[#allocation109_spill] sm:$0xff] %v8163_v11  ;;  %4000 = vrot.lane.b32.xlu0 %v8163_v11, %s9619_s28 }
 0x821   : > { %v8167_v57 = vpop.f32.mrf.mxu0 }
 0x822   : > { %9838 = vst [vmem:[#allocation110_spill] sm:$0xff] %v8167_v57  ;;  %4002 = vrot.lane.b32.xlu1 %v8167_v57, %s9619_s28 }
 0x823   : > { %v8173_v41 = vpop.permute.xlu1 %1872  ;;  %v8185_v24 = vpop.f32.mrf.mxu0 }
 0x824   : > { %9840 = vst [vmem:[#allocation112_spill] sm:$0xff] %v8173_v41  ;;  %4020 = vrot.lane.b32.xlu0 %v8163_v11, %s9580_s4  ;;  %9842 = vst [vmem:[#allocation114_spill] sm:$0xff] %v8185_v24 }
 0x825   : > { %v8228_v48 = vpop.f32.mrf.mxu0 }
 0x826   : > { %4022 = vrot.lane.b32.xlu1 %v8167_v57, %s9580_s4  ;;  %9846 = vst [vmem:[#allocation68_spill] sm:$0xff] %v8228_v48 }
 0x827   : > { %v8179_v39 = vpop.permute.xlu1 %2890 }
 0x828   : > { %9841 = vst [vmem:[#allocation113_spill] sm:$0xff] %v8179_v39  ;;  %4074 = vrot.lane.b32.xlu0 %v8163_v11, %s9665_s2  ;;  %v1305_v39 = vsel %vm865_vm1, %v7952_v5, %v7928_v46  ;;  %v1329_v11 = vsel %vm865_vm1, 0.0, %v7952_v5  ;;  %v8211_v46 = vpop.permute.xlu0 %4062  ;;  %v1259_v5 = vmul.f32 %v1225_v37, %v1210_v62  ;;  %v1449_v37 = vsel %vm865_vm1, %v8050_v9, %v8054_v1 }
 0x829   : > { %v1370_v41 = vmul.f32 %v9844_v50, %v1305_v39  ;;  %v1514_v1 = vmul.f32 %v7854_v15, %v1449_v37 }
 0x82a   : > { %4076 = vrot.lane.b32.xlu1 %v8167_v57, %s9665_s2  ;;  %v1209_v57 = vsel %vm865_vm1, 0.0, %v7946_v25  ;;  %v1387_v62 = vadd.f32 %v1371_v32, %v1259_v5 }
 0x82b   : > { %v8187_v42 = vpop.permute.xlu1 %2990  ;;  %v1257_v43 = vmul.f32 %v1220_v36, %v1209_v57  ;;  %v1372_v57 = vmul.f32 %v9845_v51, %v1306_v10 }
 0x82c   : > { %9843 = vst [vmem:[#allocation115_spill] sm:$0xff] %v8187_v42  ;;  %4004 = vrot.lane.b32.xlu0 %v8185_v24, %s9619_s28  ;;  %v1185_v42 = vsel %vm865_vm1, %v7946_v25, %v7922_v49  ;;  %v1369_v25 = vmul.f32 %v9844_v50, %v1329_v11  ;;  %v1450_v11 = vsel %vm865_vm1, %v7959_v23, %v7934_v12  ;;  %v1474_v50 = vsel %vm865_vm1, 0.0, %v7959_v23  ;;  %v8241_v51 = vpop.permute.xlu0 %3709 }
 0x82d   : > { %v1258_v20 = vmul.f32 %v1220_v36, %v1185_v42  ;;  %v1473_v36 = vsel %vm865_vm1, 0.0, %v8050_v9  ;;  %v1388_v10 = vadd.f32 %v1372_v57, %v1260_v14  ;;  %v1515_v23 = vmul.f32 %v7796_v6, %v1474_v50 }
 0x82e   : > { %4078 = vrot.lane.b32.xlu1 %v8185_v24, %s9665_s2  ;;  %v1385_v42 = vadd.f32 %v1369_v25, %v1257_v43  ;;  %v1513_v9 = vmul.f32 %v7854_v15, %v1473_v36  ;;  %v1516_v43 = vmul.f32 %v7796_v6, %v1450_v11  ;;  %v1579_v15 = vmul.f32 %v7850_v31, %v9765_v34 }
 0x82f   : > { %v8215_v49 = vpop.permute.xlu1 %3131  ;;  %v1386_v39 = vadd.f32 %v1370_v41, %v1258_v20  ;;  %v2585_v41 = vsel %vm865_vm1, 0.0, %v7880_v60  ;;  %v2567_v14 = vsel %vm865_vm1, %v7880_v60, %v7888_v56  ;;  %v1531_v5 = vadd.f32 %v1515_v23, %v1387_v62  ;;  %v9848_v56 = vld [vmem:[#allocation67_spill] sm:$0xff] }
 0x830   : > { %4024 = vrot.lane.b32.xlu0 %v8185_v24, %s9580_s4  ;;  %v1529_v20 = vadd.f32 %v1513_v9, %v1385_v42  ;;  %v1532_v25 = vadd.f32 %v1516_v43, %v1388_v10  ;;  %v2477_v6 = vsel %vm865_vm1, %v7870_v30, %v7867_v18  ;;  %v2495_v57 = vsel %vm865_vm1, 0.0, %v7870_v30  ;;  %v3900_v30 = vld [vmem:[%s9053_s11 + $0x8] sm:$0xff]  ;;  %v8280_v42 = vpop.permute.xlu0 %3777 }
 0x831   : > { %v1530_v12 = vadd.f32 %v1514_v1, %v1386_v39  ;;  %v1577_v36 = vmul.f32 %v7965_v61, %v9786_v27  ;;  %v1578_v34 = vmul.f32 %v7965_v61, %v9790_v38  ;;  %v1580_v60 = vmul.f32 %v7850_v31, %v9768_v17 }
 0x832   : > { %4006 = vrot.lane.b32.xlu1 %v8228_v48, %s9619_s28  ;;  %v2616_v37 = vmul.f32 %v9848_v56, %v2585_v41  ;;  %v2532_v11 = vmul.f32 %v8159_v44, %v2495_v57  ;;  %v2533_v18 = vmul.f32 %v8159_v44, %v2477_v6  ;;  %v2617_v27 = vmul.f32 %v9848_v56, %v2567_v14  ;;  %v9850_v57 = vld [vmem:[#allocation112_spill] sm:$0xff]  ;;  %s5089_s28 = sshll.u32 %s9983_s25, 7 }
 0x833   : > { %v8237_v3 = vpop.permute.xlu1 %4275  ;;  %v2773_v61 = vmul.f32 %v7900_v21, %v9773_v58  ;;  %v1593_v38 = vadd.f32 %v1577_v36, %v1529_v20  ;;  %v1594_v50 = vadd.f32 %v1578_v34, %v1530_v12  ;;  %v2693_v31 = vsel %vm865_vm1, 0.0, %v7949_v29  ;;  %v9852_v34 = vld [vmem:[#allocation81_spill] sm:$0xff]  ;;  %s9013_s1 = scalar_lea.vmem %s9065_s23, %s5089_s28 }
 0x834   : > { %9847 = vst [vmem:[#allocation49_spill] sm:$0xff] %v8237_v3  ;;  %3771 = vrot.lane.b32.xlu0 %v7176_v54, %s9583_s30  ;;  %v2675_v44 = vsel %vm865_vm1, %v7949_v29, %v7993_v7  ;;  %v1595_v17 = vadd.f32 %v1579_v15, %v1531_v5  ;;  %v1596_v39 = vadd.f32 %v1580_v60, %v1532_v25  ;;  %v1794_v29 = vsel %vm1769_vm8, %v8161_v2, 0.0  ;;  %v1867_v12 = vpop.permute.xlu0 %1866 }
 0x835   : > { %v1643_v58 = vmul.f32 %v8006_v16, %v9748_v8  ;;  %v1644_v10 = vmul.f32 %v8006_v16, %v9793_v52  ;;  %v1641_v9 = vmul.f32 %v8024_v26, %v9779_v19  ;;  %v1642_v1 = vmul.f32 %v8024_v26, %v9807_v28 }
 0x836   : > { %4026 = vrot.lane.b32.xlu1 %v8228_v48, %s9580_s4  ;;  %v2628_v23 = vadd.f32 %v2616_v37, %v2532_v11  ;;  %v2629_v43 = vadd.f32 %v2617_v27, %v2533_v18  ;;  %v1770_v7 = vsel %vm1769_vm8, %v8157_v40, %v8161_v2  ;;  %v2724_v8 = vmul.f32 %v7818_v0, %v2693_v31 }
 0x837   : > { %v8256_v32 = vpop.permute.xlu1 %3707  ;;  %v2725_v16 = vmul.f32 %v7818_v0, %v2675_v44  ;;  %v1657_v52 = vadd.f32 %v1641_v9, %v1593_v38  ;;  %v1658_v41 = vadd.f32 %v1642_v1, %v1594_v50  ;;  %v1705_v26 = vmul.f32 %v8093_v63, %v7765_v53  ;;  %v9855_v38 = vld [vmem:[#allocation31_spill] sm:$0xff]  ;;  %v9856_v50 = vld [vmem:[#allocation92_spill] sm:$0xff] }
 0x838   : > { %3839 = vrot.lane.b32.xlu0 %v7736_v33, %s9583_s30  ;;  %v1706_v19 = vmul.f32 %v8093_v63, %v7785_v35  ;;  %v1659_v28 = vadd.f32 %v1643_v58, %v1595_v17  ;;  %v1660_v20 = vadd.f32 %v1644_v10, %v1596_v39  ;;  %v1771_v2 = vsel %vm1769_vm8, %v8133_v4, %v8137_v55  ;;  %v9857_v17 = vld [vmem:[#allocation98_spill] sm:$0xff]  ;;  %v9858_v9 = vld [vmem:[#allocation47_spill] sm:$0xff] }
 0x839   : > { %v1795_v0 = vsel %vm1769_vm8, %v8137_v55, 0.0  ;;  %v1835_v15 = vmul.f32 %v8115_v59, %v1794_v29  ;;  %v1707_v63 = vmul.f32 %v8060_v13, %v9783_v47  ;;  %v1708_v14 = vmul.f32 %v8060_v13, %v9809_v22  ;;  %v9851_v55 = vld [vmem:[#allocation91_spill] sm:$0xff]  ;;  %v9853_v47 = vld [vmem:[#allocation12_spill] sm:$0xff] }
 0x83a   : > { %4226 = vrot.lane.b32.xlu1 %v8185_v24, %s9583_s30  ;;  %v2736_v5 = vadd.f32 %v2724_v8, %v2628_v23  ;;  %v2737_v25 = vadd.f32 %v2725_v16, %v2629_v43  ;;  %v1721_v4 = vadd.f32 %v1705_v26, %v1657_v52  ;;  %v1722_v6 = vadd.f32 %v1706_v19, %v1658_v41  ;;  %v3178_v10 = vld [vmem:[%s9050_s8] sm:$0xff]  ;;  %v1999_v43 = vpop.permute.xlu0 %1998 }
 0x83b   : > { %v8289_v62 = vpop.permute.xlu1 %3775  ;;  %v1899_v36 = vsel %vm1769_vm8, %v9851_v55, %v9850_v57  ;;  %v1724_v60 = vadd.f32 %v1708_v14, %v1660_v20  ;;  %v1836_v56 = vmul.f32 %v9853_v47, %v1771_v2  ;;  %v1837_v22 = vmul.f32 %v9853_v47, %v1795_v0  ;;  %v9860_v26 = vld [vmem:[#allocation15_spill] sm:$0xff]  ;;  %v9867_v47 = vld [vmem:[#allocation17_spill] sm:$0xff] }
 0x83c   : > { %3910 = vperm.xlu0 %5243, %v3900_v30   ;;  %v9854_v37 = vmov 0   ;;  %v1851_v18 = vadd.f32 %v1835_v15, %v1722_v6  ;;  %v1964_v31 = vmul.f32 %v9856_v50, %v1899_v36  ;;  %v2772_v1 = vmul.f32 %v7900_v21, %v9858_v9  ;;  %v9861_v19 = vld [vmem:[#allocation63_spill] sm:$0xff] }
 0x83d   : > { %v2785_v23 = vadd.f32 %v2773_v61, %v2737_v25  ;;  %v1853_v8 = vadd.f32 %v1837_v22, %v1724_v60  ;;  %v9864_v25 = vld [vmem:[#allocation69_spill] sm:$0xff]  ;;  %v2122_v36 = vld [vmem:[%s9405_s26] sm:$0xff] }
 0x83e   : > { %4271 = vperm.xlu1 %5242, %v7518_v45   ;;  %v1834_v45 = vmul.f32 %v8115_v59, %v1770_v7  ;;  %v1923_v59 = vsel %vm1769_vm8, %v9850_v57, 0.0  ;;  %v9859_v7 = vld [vmem:[#allocation73_spill] sm:$0xff]  ;;  %v2784_v20 = vadd.f32 %v2772_v1, %v2736_v5  ;;  %v2820_v5 = vmul.f32 %v9861_v19, %v9864_v25  ;;  %v2138_v22 = vpop.permute.xlu0 %2137 }
 0x83f   : > { %v8311_v40 = vpop.permute.xlu1 %3868  ;;  %v1965_v44 = vmul.f32 %v9856_v50, %v1923_v59  ;;  %v9865_v59 = vld [vmem:[#allocation8_spill] sm:$0xff]  ;;  %v9870_v50 = vld [vmem:[#allocation103_spill] sm:$0xff] }
 0x840   : > { %9849 = vst [vmem:[#allocation67_spill] sm:$0xff] %v8311_v40  ;;  %1996 = vrot.lane.b32.xlu0 %v7785_v35, %s9583_s30  ;;  %v1723_v35 = vadd.f32 %v1707_v63, %v1659_v28  ;;  %v1850_v11 = vadd.f32 %v1834_v45, %v1721_v4  ;;  %v2821_v28 = vmul.f32 %v9861_v19, %v9860_v26  ;;  %v9863_v63 = vld [vmem:[#allocation102_spill] sm:$0xff]  ;;  %v3029_v1 = vsel %vm1769_vm8, %v9870_v50, 0.0 }
 0x841   : > { %v1981_v0 = vadd.f32 %v1965_v44, %v1853_v8  ;;  %v2933_v14 = vsel %vm1769_vm8, %v9863_v63, 0.0  ;;  %v9873_v8 = vld [vmem:[#allocation94_spill] sm:$0xff] }
 0x842   : > { %3773 = vrot.lane.b32.xlu1 %v9852_v34, %s9583_s30  ;;  %v1852_v29 = vadd.f32 %v1836_v56, %v1723_v35  ;;  %v2833_v4 = vadd.f32 %v2821_v28, %v2785_v23  ;;  %v9866_v35 = vld [vmem:[#allocation80_spill] sm:$0xff]  ;;  %v2915_v56 = vsel %vm1769_vm8, %v9867_v47, %v9863_v63  ;;  %v3087_v26 = vpop.permute.xlu0 %3086  ;;  %v9874_v19 = vld [vmem:[#allocation74_spill] sm:$0xff]  ;;  %v3061_v28 = vmul.f32 %v9873_v8, %v3029_v1 }
 0x843   : > { %v1869_v13 = vpop.permute.xlu1 %1868  ;;  %5244 = vset.pattern.permute.xlu1 %v9854_v37  ;;  %v2869_v60 = vmul.f32 %v9866_v35, %v9865_v59 }
 0x844   : > { %v1898_v30 = vsel %vm1769_vm8, %v1867_v12, %v1869_v13  ;;  %v1922_v27 = vsel %vm1769_vm8, %v1869_v13, 0.0  ;;  %3082 = vrot.lane.b32.xlu0 %v9855_v38, %s9583_s30  ;;  %v1980_v61 = vadd.f32 %v1964_v31, %v1852_v29  ;;  %v9862_v12 = vld [vmem:[#allocation100_spill] sm:$0xff]  ;;  %v2832_v13 = vadd.f32 %v2820_v5, %v2784_v20  ;;  %v9871_v31 = vld [vmem:[#allocation115_spill] sm:$0xff] }
 0x845   : > { %v1962_v39 = vmul.f32 %v9857_v17, %v1898_v30  ;;  %v1963_v58 = vmul.f32 %v9857_v17, %v1922_v27  ;;  %v3011_v44 = vsel %vm1769_vm8, %v9871_v31, %v9870_v50  ;;  %v9872_v17 = vld [vmem:[#allocation84_spill] sm:$0xff] }
 0x846   : > { %3841 = vrot.lane.b32.xlu1 %v9859_v7, %s9583_s30  ;;  %v3192_v25 = vpop.permute.xlu0 %3191 }
 0x847   : > { %v8351_v16 = vadd.f32 %v1962_v39, %v1850_v11  ;;  %v8353_v52 = vadd.f32 %v1963_v58, %v1851_v18  ;;  %v2001_v41 = vpop.permute.xlu1 %2000  ;;  %v9869_v11 = vld [vmem:[#allocation43_spill] sm:$0xff]  ;;  %v2868_v39 = vmul.f32 %v9866_v35, %v9872_v17  ;;  %v2881_v58 = vadd.f32 %v2869_v60, %v2833_v4  ;;  %v9877_v35 = vld [vmem:[#allocation57_spill] sm:$0xff] }
 0x848   : > { %v2027_v2 = vsel %vm1769_vm8, %v1999_v43, %v2001_v41  ;;  %v2051_v21 = vsel %vm1769_vm8, %v2001_v41, 0.0  ;;  %3186 = vperm.xlu0 %5243, %v3178_v10   ;;  %v2965_v18 = vmul.f32 %v9869_v11, %v2933_v14  ;;  %v2964_v10 = vmul.f32 %v9869_v11, %v2915_v56  ;;  %v9876_v14 = vld [vmem:[#allocation109_spill] sm:$0xff] }
 0x849   : > { %v2092_v45 = vmul.f32 %v9862_v12, %v2027_v2  ;;  %v2093_v15 = vmul.f32 %v9862_v12, %v2051_v21  ;;  %v2880_v43 = vadd.f32 %v2868_v39, %v2832_v13  ;;  %v3060_v41 = vmul.f32 %v9873_v8, %v3011_v44  ;;  %v9875_v12 = vld [vmem:[#allocation104_spill] sm:$0xff]  ;;  %v9878_v13 = vld [vmem:[#allocation59_spill] sm:$0xff] }
 0x84a   : > { %1994 = vrot.lane.b32.xlu1 %v7765_v53, %s9583_s30  ;;  %v9868_v53 = vld [vmem:[#allocation110_spill] sm:$0xff]  ;;  %v2977_v29 = vadd.f32 %v2965_v18, %v2881_v58  ;;  %v9879_v44 = vld [vmem:[#allocation60_spill] sm:$0xff]  ;;  %v9880_v58 = vld [vmem:[#allocation61_spill] sm:$0xff] }
 0x84b   : > { %v2108_v6 = vadd.f32 %v2092_v45, %v1980_v61  ;;  %v2109_v57 = vadd.f32 %v2093_v15, %v1981_v0  ;;  %v2987_v55 = vpop.permute.xlu1 %2986  ;;  %v2976_v20 = vadd.f32 %v2964_v10, %v2880_v43 }
 0x84c   : > { %4224 = vrot.lane.b32.xlu0 %v9868_v53, %s9583_s30  ;;  %v3073_v63 = vadd.f32 %v3061_v28, %v2977_v29 }
 0x84d   : > { %v8378_v30 = vadd.f32 %v2138_v22, %v2108_v6  ;;  %v8380_v27 = vadd.f32 %v2138_v22, %v2109_v57  ;;  %v3072_v0 = vadd.f32 %v3060_v41, %v2976_v20  ;;  %v4287_v6 = vld [vmem:[%s9056_s14 + $0x8] sm:$0xff] }
 0x84e   : > { %2132 = vperm.xlu1 %5244, %v2122_v36  }
 0x84f   : > { %v8388_v9 = vpop.permute.xlu1 %2988 }
 0x850   : > { %v8394_v23 = vsel %vm1769_vm8, %v2987_v55, %v8388_v9  ;;  %4080 = vrot.lane.b32.xlu0 %v8228_v48, %s9665_s2 }
 0x852   : > { %3084 = vrot.lane.b32.xlu1 %v9874_v19, %s9583_s30 }
 0x853   : > { %v3089_v2 = vpop.permute.xlu1 %3088 }
 0x854   : > { %v3107_v21 = vsel %vm1769_vm8, %v3087_v26, %v3089_v2  ;;  %v3125_v61 = vsel %vm1769_vm8, %v3089_v2, 0.0  ;;  %4228 = vrot.lane.b32.xlu0 %v8228_v48, %s9583_s30  ;;  %v3735_v48 = vsel %vm1769_vm8, %v8241_v51, 0.0 }
 0x855   : > { %v3156_v45 = vmul.f32 %v9875_v12, %v3107_v21  ;;  %v3157_v15 = vmul.f32 %v9875_v12, %v3125_v61  ;;  %v9883_v21 = vld [vmem:[#allocation45_spill] sm:$0xff] }
 0x856   : > { %4222 = vrot.lane.b32.xlu1 %v9876_v14, %s9583_s30 }
 0x857   : > { %v3168_v5 = vadd.f32 %v3156_v45, %v3072_v0  ;;  %v3169_v4 = vadd.f32 %v3157_v15, %v3073_v63  ;;  %v9884_v15 = vld [vmem:[#allocation27_spill] sm:$0xff]  ;;  %v9885_v63 = vld [vmem:[#allocation13_spill] sm:$0xff] }
 0x859   : > { %v8413_v57 = vadd.f32 %v3192_v25, %v3168_v5  ;;  %v8415_v55 = vadd.f32 %v3192_v25, %v3169_v4  ;;  %v3491_v25 = vsel %vm865_vm1, %v9885_v63, %v9884_v15  ;;  %v3503_v5 = vsel %vm865_vm1, 0.0, %v9885_v63  ;;  %v3899_v63 = vld [vmem:[%s9053_s11] sm:$0xff] }
 0x85a   : > { %4295 = vperm.xlu1 %5244, %v4287_v6  }
 0x892   : > { %v4001_v36 = vpop.permute.xlu0 %4000 }
 0x893   : > { %v4014_v59 = vsel %vm1007_vm3, 0.0, %v4001_v36 }
 0x894   : > { %v8419_v60 = vmul.f32 %v9877_v35, %v4014_v59  ;;  %v4003_v47 = vpop.permute.xlu1 %4002  ;;  %v9889_v59 = vld [vmem:[#allocation66_spill] sm:$0xff] }
 0x895   : > { %v4008_v56 = vsel %vm1007_vm3, %v4001_v36, %v4003_v47  ;;  %v9888_v36 = vld [vmem:[#allocation22_spill] sm:$0xff]  ;;  %v3443_v47 = vsel %vm865_vm1, 0.0, %v9889_v59 }
 0x896   : > { %v4021_v22 = vpop.permute.xlu0 %4020  ;;  %4044 = vrot.lane.b32.xlu0 %v8419_v60, %s9665_s2  ;;  %4190 = vrot.lane.b32.xlu1 %v8419_v60, %s9583_s30  ;;  %v8427_v11 = vmul.f32 %v9878_v13, %v4008_v56  ;;  %v9890_v56 = vld [vmem:[#allocation24_spill] sm:$0xff] }
 0x898   : > { %v4023_v18 = vpop.permute.xlu1 %4022 }
 0x899   : > { %v4028_v50 = vsel %vm1088_vm7, %v4021_v22, %v4023_v18  ;;  %v4034_v31 = vsel %vm1088_vm7, %v4023_v18, 0.0  ;;  %v9891_v22 = vld [vmem:[#allocation35_spill] sm:$0xff] }
 0x89a   : > { %v8432_v17 = vmul.f32 %v9879_v44, %v4028_v50  ;;  %v8434_v39 = vpop.permute.xlu0 %4074  ;;  %4046 = vrot.lane.b32.xlu1 %v8427_v11, %s9665_s2  ;;  %v8439_v10 = vmul.f32 %v9880_v58, %v4034_v31  ;;  %v3575_v18 = vsel %vm865_vm1, 0.0, %v9891_v22  ;;  %v9892_v50 = vld [vmem:[#allocation53_spill] sm:$0xff] }
 0x89b   : > { %v3523_v31 = vmul.f32 %v9892_v50, %v3503_v5 }
 0x89c   : > { %v4077_v1 = vpop.permute.xlu1 %4076  ;;  %4110 = vrot.lane.b32.xlu0 %v8432_v17, %s9665_s2 }
 0x89d   : > { %v8445_v43 = vsel %vm865_vm1, %v8434_v39, %v4077_v1 }
 0x89e   : > { %v4005_v29 = vpop.permute.xlu0 %4004  ;;  %4112 = vrot.lane.b32.xlu1 %v8439_v10, %s9665_s2 }
 0x89f   : > { %v4015_v8 = vsel %vm1007_vm3, 0.0, %v4005_v29 }
 0x8a0   : > { %v8451_v41 = vmul.f32 %v9877_v35, %v4015_v8  ;;  %v8453_v26 = vpop.permute.xlu1 %4078  ;;  %4192 = vrot.lane.b32.xlu0 %v8427_v11, %s9583_s30  ;;  %v3431_v35 = vsel %vm865_vm1, %v9889_v59, %v9888_v36  ;;  %v9894_v8 = vld [vmem:[#allocation41_spill] sm:$0xff]  ;;  %v9898_v36 = vld [vmem:[#allocation75_spill] sm:$0xff] }
 0x8a1   : > { %v9899_v59 = vld [vmem:[#allocation55_spill] sm:$0xff] }
 0x8a2   : > { %9881 = vst [vmem:[#allocation112_spill] sm:$0xff] %v8451_v41  ;;  %4048 = vrot.lane.b32.xlu1 %v8451_v41, %s9665_s2  ;;  %v4025_v61 = vpop.permute.xlu0 %4024 }
 0x8a4   : > { %4194 = vrot.lane.b32.xlu0 %v8451_v41, %s9583_s30  ;;  %v4007_v28 = vpop.permute.xlu1 %4006 }
 0x8a5   : > { %v4009_v20 = vsel %vm1007_vm3, %v4005_v29, %v4007_v28  ;;  %v3595_v28 = vmul.f32 %v9894_v8, %v3575_v18 }
 0x8a6   : > { %v8463_v2 = vmul.f32 %v9878_v13, %v4009_v20  ;;  %3837 = vrot.lane.b32.xlu1 %v9883_v21, %s9583_s30  ;;  %v3563_v13 = vsel %vm865_vm1, %v9891_v22, %v9890_v56  ;;  %v3444_v22 = vsel %vm865_vm1, 0.0, %v9899_v59  ;;  %v3772_v24 = vpop.permute.xlu0 %3771 }
 0x8a7   : > { %v3596_v20 = vmul.f32 %v9894_v8, %v3563_v13  ;;  %v9900_v13 = vld [vmem:[#allocation42_spill] sm:$0xff]  ;;  %v9904_v8 = vld [vmem:[#allocation33_spill] sm:$0xff] }
 0x8a8   : > { %9882 = vst [vmem:[#allocation91_spill] sm:$0xff] %v8463_v2  ;;  %4050 = vrot.lane.b32.xlu0 %v8463_v2, %s9665_s2  ;;  %v4027_v0 = vpop.permute.xlu1 %4026 }
 0x8a9   : > { %v4029_v12 = vsel %vm1088_vm7, %v4025_v61, %v4027_v0  ;;  %v4035_v45 = vsel %vm1088_vm7, %v4027_v0, 0.0  ;;  %v9895_v61 = vld [vmem:[#allocation78_spill] sm:$0xff] }
 0x8aa   : > { %v8477_v4 = vmul.f32 %v9879_v44, %v4029_v12  ;;  %v8480_v6 = vmul.f32 %v9880_v58, %v4035_v45  ;;  %v3524_v44 = vmul.f32 %v9892_v50, %v3491_v25  ;;  %v9893_v58 = vld [vmem:[#allocation40_spill] sm:$0xff]  ;;  %v9896_v0 = vld [vmem:[#allocation58_spill] sm:$0xff]  ;;  %v9901_v50 = vld [vmem:[#allocation111_spill] sm:$0xff] }
 0x8ab   : > { %v3467_v1 = vmul.f32 %v9893_v58, %v3443_v47  ;;  %v3468_v29 = vmul.f32 %v9893_v58, %v3431_v35  ;;  %v3504_v12 = vsel %vm865_vm1, 0.0, %v9896_v0  ;;  %v9897_v25 = vld [vmem:[#allocation38_spill] sm:$0xff]  ;;  %v3432_v35 = vsel %vm865_vm1, %v9899_v59, %v9898_v36  ;;  %v9902_v58 = vld [vmem:[#allocation77_spill] sm:$0xff] }
 0x8ac   : > { %9886 = vst [vmem:[#allocation81_spill] sm:$0xff] %v8477_v4  ;;  %9887 = vst [vmem:[#allocation12_spill] sm:$0xff] %v8480_v6  ;;  %4116 = vrot.lane.b32.xlu1 %v8480_v6, %s9665_s2  ;;  %4114 = vrot.lane.b32.xlu0 %v8477_v4, %s9665_s2  ;;  %v3492_v5 = vsel %vm865_vm1, %v9896_v0, %v9897_v25  ;;  %v3525_v18 = vmul.f32 %v9900_v13, %v3504_v12  ;;  %v9907_v12 = vld [vmem:[#allocation52_spill] sm:$0xff]  ;;  %v9909_v36 = vld [vmem:[#allocation10_spill] sm:$0xff] }
 0x8ad   : > { %v3531_v45 = vadd.f32 %v3523_v31, %v3467_v1  ;;  %v3532_v15 = vadd.f32 %v3524_v44, %v3468_v29  ;;  %v3470_v31 = vmul.f32 %v9901_v50, %v3432_v35  ;;  %v3526_v44 = vmul.f32 %v9900_v13, %v3492_v5  ;;  %v9903_v29 = vld [vmem:[#allocation71_spill] sm:$0xff]  ;;  %v9911_v35 = vld [vmem:[#allocation86_spill] sm:$0xff] }
 0x8ae   : > { %v2584_v1 = vsel %vm865_vm1, 0.0, %v9902_v58  ;;  %v2494_v59 = vsel %vm865_vm1, 0.0, %v9909_v36  ;;  %v3469_v13 = vmul.f32 %v9901_v50, %v3444_v22 }
 0x8af   : > { %v3603_v47 = vadd.f32 %v3595_v28, %v3531_v45  ;;  %v3604_v56 = vadd.f32 %v3596_v20, %v3532_v15  ;;  %v3627_v28 = vmul.f32 %v9904_v8, %v9903_v29  ;;  %v9905_v20 = vld [vmem:[#allocation26_spill] sm:$0xff]  ;;  %v8530_v45 = vpop.permute.xlu1 %4226 }
 0x8b0   : > { %4254 = vrot.lane.b32.xlu1 %v8432_v17, %s9583_s30  ;;  %3835 = vrot.lane.b32.xlu0 %v9895_v61, %s9583_s30  ;;  %v3628_v0 = vmul.f32 %v9904_v8, %v9905_v20  ;;  %9906 = vst [vmem:[#allocation31_spill] sm:$0xff] %v8530_v45  ;;  %v9908_v15 = vld [vmem:[#allocation14_spill] sm:$0xff] }
 0x8b1   : > { %v3630_v25 = vmul.f32 %v9908_v15, %v9907_v12  ;;  %v3635_v37 = vadd.f32 %v3627_v28, %v3603_v47  ;;  %v9912_v29 = vld [vmem:[#allocation34_spill] sm:$0xff]  ;;  %v3534_v12 = vadd.f32 %v3526_v44, %v3470_v31 }
 0x8b2   : > { %v3636_v3 = vadd.f32 %v3628_v0, %v3604_v56  ;;  %v3659_v40 = vmul.f32 %v9912_v29, %v7176_v54  ;;  %v3660_v8 = vmul.f32 %v9912_v29, %v9852_v34  ;;  %v9913_v20 = vld [vmem:[#allocation62_spill] sm:$0xff]  ;;  %v9914_v54 = vld [vmem:[#allocation88_spill] sm:$0xff]  ;;  %v3576_v34 = vsel %vm865_vm1, 0.0, %v9911_v35  ;;  %v9919_v0 = vld [vmem:[#allocation25_spill] sm:$0xff] }
 0x8b3   : > { %v2614_v45 = vmul.f32 %v9913_v20, %v2584_v1  ;;  %v2530_v47 = vmul.f32 %v9914_v54, %v2494_v59  ;;  %v9915_v56 = vld [vmem:[#allocation90_spill] sm:$0xff]  ;;  %v9918_v1 = vld [vmem:[#allocation76_spill] sm:$0xff] }
 0x8b4   : > { %4196 = vrot.lane.b32.xlu1 %v8463_v2, %s9583_s30  ;;  %3905 = vperm.xlu0 %5243, %v3899_v63   ;;  %v9910_v63 = vld [vmem:[#allocation44_spill] sm:$0xff]  ;;  %v3691_v22 = vmul.f32 %v9915_v56, %v9895_v61  ;;  %v3692_v50 = vmul.f32 %v9915_v56, %v9883_v21  ;;  %v2692_v28 = vsel %vm865_vm1, 0.0, %v9918_v1  ;;  %v3667_v61 = vadd.f32 %v3659_v40, %v3635_v37 }
 0x8b5   : > { %v3564_v5 = vsel %vm865_vm1, %v9911_v35, %v9910_v63  ;;  %v3723_v63 = vsel %vm1769_vm8, %v8256_v32, %v8241_v51  ;;  %v4286_v51 = vld [vmem:[%s9056_s14] sm:$0xff]  ;;  %v3533_v35 = vadd.f32 %v3525_v18, %v3469_v13  ;;  %v3668_v29 = vadd.f32 %v3660_v8, %v3636_v3  ;;  %v9922_v18 = vld [vmem:[#allocation64_spill] sm:$0xff] }
 0x8b6   : > { %v9917_v32 = vld [vmem:[#allocation7_spill] sm:$0xff]  ;;  %v3598_v59 = vmul.f32 %v9919_v0, %v3564_v5  ;;  %v3597_v2 = vmul.f32 %v9919_v0, %v3576_v34  ;;  %v2674_v3 = vsel %vm865_vm1, %v9918_v1, %v9922_v18 }
 0x8b7   : > { %v2566_v44 = vsel %vm865_vm1, %v9902_v58, %v9917_v32  ;;  %v3700_v40 = vadd.f32 %v3692_v50, %v3668_v29 }
 0x8b8   : > { %4258 = vrot.lane.b32.xlu1 %v8477_v4, %s9583_s30  ;;  %4260 = vrot.lane.b32.xlu0 %v8480_v6, %s9583_s30  ;;  %v9920_v6 = vld [vmem:[#allocation97_spill] sm:$0xff]  ;;  %v3606_v41 = vadd.f32 %v3598_v59, %v3534_v12  ;;  %v2615_v58 = vmul.f32 %v9913_v20, %v2566_v44  ;;  %v3605_v13 = vadd.f32 %v3597_v2, %v3533_v35  ;;  %v9926_v35 = vld [vmem:[#allocation16_spill] sm:$0xff] }
 0x8b9   : > { %v8561_v31 = vpop.permute.xlu1 %4271  ;;  %v3756_v21 = vmul.f32 %v9920_v6, %v3735_v48  ;;  %v3755_v56 = vmul.f32 %v9920_v6, %v3723_v63  ;;  %v3699_v48 = vadd.f32 %v3691_v22, %v3667_v61  ;;  %v9923_v6 = vld [vmem:[#allocation11_spill] sm:$0xff]  ;;  %v9925_v44 = vld [vmem:[#allocation89_spill] sm:$0xff]  ;;  %v2626_v2 = vadd.f32 %v2614_v45, %v2530_v47 }
 0x8ba   : > { %9916 = vst [vmem:[#allocation92_spill] sm:$0xff] %v8561_v31  ;;  %v9921_v31 = vld [vmem:[#allocation30_spill] sm:$0xff]  ;;  %v2722_v5 = vmul.f32 %v9923_v6, %v2692_v28  ;;  %v2723_v22 = vmul.f32 %v9923_v6, %v2674_v3  ;;  %v3638_v50 = vadd.f32 %v3630_v25, %v3606_v41  ;;  %v3629_v1 = vmul.f32 %v9908_v15, %v9925_v44  ;;  %v9927_v61 = vld [vmem:[#allocation29_spill] sm:$0xff]  ;;  %v9937_v44 = vld [vmem:[#allocation32_spill] sm:$0xff] }
 0x8bb   : > { %v2476_v4 = vsel %vm865_vm1, %v9909_v36, %v9921_v31  ;;  %v3840_v36 = vpop.permute.xlu0 %3839  ;;  %v3764_v63 = vadd.f32 %v3756_v21, %v3700_v40  ;;  %v3763_v34 = vadd.f32 %v3755_v56, %v3699_v48  ;;  %v9924_v31 = vld [vmem:[#allocation108_spill] sm:$0xff]  ;;  %v3662_v29 = vmul.f32 %v9927_v61, %v9926_v35  ;;  %v9928_v41 = vld [vmem:[#allocation70_spill] sm:$0xff]  ;;  %v9929_v25 = vld [vmem:[#allocation9_spill] sm:$0xff] }
 0x8bc   : > { %4290 = vperm.xlu1 %5244, %v4286_v51   ;;  %4256 = vrot.lane.b32.xlu0 %v8439_v10, %s9583_s30  ;;  %v2531_v32 = vmul.f32 %v9914_v54, %v2476_v4  ;;  %v2734_v56 = vadd.f32 %v2722_v5, %v2626_v2  ;;  %v3637_v4 = vadd.f32 %v3629_v1, %v3605_v13  ;;  %v9930_v15 = vld [vmem:[#allocation82_spill] sm:$0xff]  ;;  %v9931_v48 = vld [vmem:[#allocation39_spill] sm:$0xff]  ;;  %v9933_v6 = vld [vmem:[#allocation21_spill] sm:$0xff] }
 0x8bd   : > { %v3774_v37 = vpop.permute.xlu1 %3773  ;;  %v3670_v18 = vadd.f32 %v3662_v29, %v3638_v50  ;;  %v2770_v3 = vmul.f32 %v9929_v25, %v9928_v41  ;;  %v3661_v45 = vmul.f32 %v9927_v61, %v9930_v15  ;;  %v2771_v40 = vmul.f32 %v9929_v25, %v9931_v48  ;;  %v9939_v61 = vld [vmem:[#allocation20_spill] sm:$0xff]  ;;  %v9941_v41 = vld [vmem:[#allocation95_spill] sm:$0xff] }
 0x8be   : > { %v3787_v8 = vsel %vm1769_vm8, %v3772_v24, %v3774_v37  ;;  %v3799_v12 = vsel %vm1769_vm8, %v3774_v37, 0.0  ;;  %v2627_v59 = vadd.f32 %v2615_v58, %v2531_v32  ;;  %v9932_v58 = vld [vmem:[#allocation83_spill] sm:$0xff] }
 0x8bf   : > { %v3819_v51 = vmul.f32 %v9924_v31, %v3787_v8  ;;  %v3820_v20 = vmul.f32 %v9924_v31, %v3799_v12  ;;  %v8599_v21 = vpop.permute.xlu0 %3910  ;;  %v3694_v37 = vmul.f32 %v9932_v58, %v9859_v7  ;;  %v9934_v8 = vld [vmem:[#allocation107_spill] sm:$0xff]  ;;  %v2782_v13 = vadd.f32 %v2770_v3, %v2734_v56 }
 0x8c0   : > { %v2735_v54 = vadd.f32 %v2723_v22, %v2627_v59  ;;  %v3724_v5 = vsel %vm1769_vm8, %v9934_v8, %v9933_v6  ;;  %v9935_v12 = vld [vmem:[#allocation23_spill] sm:$0xff]  ;;  %v3736_v31 = vsel %vm1769_vm8, %v9933_v6, 0.0  ;;  %v3800_v22 = vsel %vm1769_vm8, %v8280_v42, 0.0  ;;  %v9938_v59 = vld [vmem:[#allocation56_spill] sm:$0xff] }
 0x8c1   : > { %v8593_v28 = vadd.f32 %v3819_v51, %v3763_v34  ;;  %v8595_v24 = vadd.f32 %v3820_v20, %v3764_v63  ;;  %v3842_v0 = vpop.permute.xlu1 %3841  ;;  %v9936_v63 = vld [vmem:[#allocation28_spill] sm:$0xff]  ;;  %v3669_v51 = vadd.f32 %v3661_v45, %v3637_v4  ;;  %v3702_v32 = vadd.f32 %v3694_v37, %v3670_v18 }
 0x8c2   : > { %v2818_v34 = vmul.f32 %v9936_v63, %v9935_v12  ;;  %v2783_v20 = vadd.f32 %v2771_v40, %v2735_v54  ;;  %v3788_v7 = vsel %vm1769_vm8, %v8289_v62, %v8280_v42  ;;  %v2819_v1 = vmul.f32 %v9936_v63, %v9937_v44  ;;  %v9940_v54 = vld [vmem:[#allocation101_spill] sm:$0xff]  ;;  %v9944_v63 = vld [vmem:[#allocation87_spill] sm:$0xff] }
 0x8c3   : > { %v1997_v50 = vpop.permute.xlu0 %1996  ;;  %v3693_v2 = vmul.f32 %v9932_v58, %v7736_v33  ;;  %v2866_v35 = vmul.f32 %v9938_v59, %v9855_v38  ;;  %v3757_v29 = vmul.f32 %v9939_v61, %v3724_v5  ;;  %v3758_v4 = vmul.f32 %v9939_v61, %v3736_v31  ;;  %v9942_v33 = vld [vmem:[#allocation113_spill] sm:$0xff] }
 0x8c4   : > { %v2932_v18 = vsel %vm1769_vm8, %v9940_v54, 0.0  ;;  %v3852_v42 = vsel %vm1769_vm8, %v3840_v36, %v3842_v0  ;;  %v3864_v62 = vsel %vm1769_vm8, %v3842_v0, 0.0  ;;  %v3822_v25 = vmul.f32 %v9941_v41, %v3800_v22  ;;  %v9943_v0 = vld [vmem:[#allocation51_spill] sm:$0xff]  ;;  %v9946_v61 = vld [vmem:[#allocation93_spill] sm:$0xff] }
 0x8c5   : > { %v1995_v47 = vpop.permute.xlu1 %1994  ;;  %v3701_v3 = vadd.f32 %v3693_v2, %v3669_v51  ;;  %v2914_v15 = vsel %vm1769_vm8, %v9942_v33, %v9940_v54  ;;  %v3821_v38 = vmul.f32 %v9941_v41, %v3788_v7  ;;  %v2830_v45 = vadd.f32 %v2818_v34, %v2782_v13  ;;  %v9945_v7 = vld [vmem:[#allocation99_spill] sm:$0xff] }
 0x8c6   : > { %v2867_v48 = vmul.f32 %v9938_v59, %v9874_v19  ;;  %v2831_v40 = vadd.f32 %v2819_v1, %v2783_v20  ;;  %v3766_v58 = vadd.f32 %v3758_v4, %v3702_v32  ;;  %v3028_v36 = vsel %vm1769_vm8, %v8388_v9, 0.0 }
 0x8c7   : > { %v3765_v37 = vadd.f32 %v3757_v29, %v3701_v3  ;;  %v3885_v6 = vmul.f32 %v9943_v0, %v3852_v42  ;;  %v3886_v8 = vmul.f32 %v9943_v0, %v3864_v62  ;;  %v2878_v12 = vadd.f32 %v2866_v35, %v2830_v45  ;;  %v3083_v13 = vpop.permute.xlu0 %3082 }
 0x8c8   : > { %v2963_v31 = vmul.f32 %v9944_v63, %v2932_v18  ;;  %v2962_v51 = vmul.f32 %v9944_v63, %v2914_v15  ;;  %v2026_v34 = vsel %vm1769_vm8, %v1995_v47, %v1997_v50  ;;  %v3830_v19 = vadd.f32 %v3822_v25, %v3766_v58 }
 0x8c9   : > { %v2133_v56 = vpop.permute.xlu1 %2132  ;;  %v3829_v20 = vadd.f32 %v3821_v38, %v3765_v37  ;;  %v2879_v9 = vadd.f32 %v2867_v48, %v2831_v40  ;;  %v3058_v44 = vmul.f32 %v9945_v7, %v8394_v23  ;;  %v3059_v1 = vmul.f32 %v9945_v7, %v3028_v36 }
 0x8ca   : > { %v2050_v2 = vsel %vm1769_vm8, %v1997_v50, 0.0  ;;  %v3894_v35 = vadd.f32 %v3886_v8, %v3830_v19  ;;  %v2090_v29 = vmul.f32 %v9946_v61, %v2026_v34  ;;  %v2974_v47 = vadd.f32 %v2962_v51, %v2878_v12 }
 0x8cb   : > { %v3893_v59 = vadd.f32 %v3885_v6, %v3829_v20  ;;  %v2975_v4 = vadd.f32 %v2963_v31, %v2879_v9  ;;  %v2091_v42 = vmul.f32 %v9946_v61, %v2050_v2  ;;  %v2188_v23 = vmax.f32 %v8378_v30, 0.0  ;;  %v3187_v48 = vpop.permute.xlu0 %3186 }
 0x8cc   : > { %v3070_v62 = vadd.f32 %v3058_v44, %v2974_v47  ;;  %v2189_v25 = vmax.f32 %v8380_v27, 0.0  ;;  %v2106_v50 = vadd.f32 %v2090_v29, %v8351_v16  ;;  %v8664_v33 = vadd.f32 %v8599_v21, %v3894_v35  ;;  %v9947_v35 = vld [vmem:[#allocation54_spill] sm:$0xff] }
 0x8cd   : > { %v3085_v5 = vpop.permute.xlu1 %3084  ;;  %v3071_v41 = vadd.f32 %v3059_v1, %v2975_v4  ;;  %v8661_v3 = vadd.f32 %v8599_v21, %v3893_v59  ;;  %v3228_v21 = vmax.f32 %v8413_v57, 0.0  ;;  %v3229_v36 = vmax.f32 %v8415_v55, 0.0 }
 0x8ce   : > { %v3106_v32 = vsel %vm1769_vm8, %v3083_v13, %v3085_v5  ;;  %v3124_v22 = vsel %vm1769_vm8, %v3085_v5, 0.0  ;;  %v4309_v45 = vadd.f32 %v2189_v25, %v2188_v23  ;;  %v8671_v40 = vadd.f32 %v2133_v56, %v2106_v50  ;;  %v9949_v50 = vld [vmem:[#allocation46_spill] sm:$0xff] }
 0x8cf   : > { %v3154_v54 = vmul.f32 %v8215_v49, %v3106_v32  ;;  %v3155_v18 = vmul.f32 %v8215_v49, %v3124_v22  ;;  %v2107_v49 = vadd.f32 %v2091_v42, %v8353_v52  ;;  %v3933_v16 = vmax.f32 %v8661_v3, 0.0  ;;  %v8703_v13 = vpop.permute.xlu0 %4224  ;;  %v9948_v42 = vld [vmem:[#allocation37_spill] sm:$0xff] }
 0x8d0   : > { %v3934_v37 = vmax.f32 %v8664_v33, 0.0  ;;  %v2186_v6 = vmax.f32 %v8671_v40, 0.0  ;;  %v4317_v5 = vadd.f32 %v3229_v36, %v3228_v21  ;;  %v4088_v44 = vsel %vm865_vm1, 0.0, %v8434_v39 }
 0x8d1   : > { %v3166_v15 = vadd.f32 %v3154_v54, %v3070_v62  ;;  %v3167_v38 = vadd.f32 %v3155_v18, %v3071_v41  ;;  %v8673_v58 = vadd.f32 %v2133_v56, %v2107_v49  ;;  %v8705_v19 = vpop.permute.xlu1 %4222  ;;  %v4098_v61 = vmul.f32 %v9947_v35, %v4088_v44 }
 0x8d2   : > { %v4325_v56 = vadd.f32 %v3934_v37, %v3933_v16  ;;  %v4099_v54 = vmul.f32 %v9947_v35, %v8445_v43  ;;  %v4151_v43 = vmul.f32 %v9949_v50, %v8427_v11 }
 0x8d3   : > { %v8679_v0 = vadd.f32 %v3187_v48, %v3166_v15  ;;  %v8681_v52 = vadd.f32 %v3187_v48, %v3167_v38  ;;  %v2187_v8 = vmax.f32 %v8673_v58, 0.0  ;;  %v4081_v34 = vpop.permute.xlu0 %4080  ;;  %v4150_v15 = vmul.f32 %v9949_v50, %v8419_v60  ;;  %v9950_v48 = vld [vmem:[#allocation85_spill] sm:$0xff] }
 0x8d4   : > { %v9951_v60 = vld [vmem:[#allocation65_spill] sm:$0xff] }
 0x8d5   : > { %v3226_v12 = vmax.f32 %v8679_v0, 0.0  ;;  %v3227_v63 = vmax.f32 %v8681_v52, 0.0  ;;  %v4306_v31 = vadd.f32 %v2187_v8, %v2186_v6  ;;  %v8707_v20 = vpop.permute.xlu1 %4295 }
 0x8d7   : > { %v4314_v51 = vadd.f32 %v3227_v63, %v3226_v12  ;;  %v8709_v32 = vpop.permute.xlu0 %4228 }
 0x8db   : > { %4310 = vadd.xlane.f32.xlu0 %v4309_v45 }
 0x8df   : > { %4326 = vadd.xlane.f32.xlu0 %v4325_v56  ;;  %v4166_v56 = vmul.f32 %v9950_v48, %v9876_v14 }
 0x8e0   : > { %4318 = vadd.xlane.f32.xlu1 %v4317_v5 }
 0x8e3   : > { %4307 = vadd.xlane.f32.xlu0 %v4306_v31 }
 0x8e4   : > { %4315 = vadd.xlane.f32.xlu1 %v4314_v51 }
 0x908   : > { %v4045_v22 = vpop.permute.xlu0 %4044  ;;  %v8711_v9 = vpop.permute.xlu1 %4190 }
 0x909   : > { %v4058_v7 = vsel %vm865_vm1, 0.0, %v4045_v22 }
 0x90a   : > { %v4070_v1 = vmul.f32 %v8211_v46, %v4058_v7  ;;  %v4182_v7 = vmul.f32 %v9951_v60, %v8432_v17  ;;  %v4083_v17 = vsel %vm865_vm1, %v8453_v26, %v4081_v34 }
 0x90c   : > { %v4047_v2 = vpop.permute.xlu1 %4046  ;;  %v4102_v18 = vadd.f32 %v4098_v61, %v4070_v1 }
 0x90d   : > { %v4052_v59 = vsel %vm865_vm1, %v4045_v22, %v4047_v2  ;;  %v4167_v22 = vmul.f32 %v9950_v48, %v9868_v53  ;;  %v4089_v53 = vsel %vm865_vm1, 0.0, %v8453_v26  ;;  %v9954_v48 = vld [vmem:[#allocation48_spill] sm:$0xff] }
 0x90e   : > { %v4071_v29 = vmul.f32 %v8211_v46, %v4052_v59  ;;  %v4111_v4 = vpop.permute.xlu0 %4110  ;;  %v4183_v59 = vmul.f32 %v9951_v60, %v8439_v10 }
 0x90f   : > { %v4124_v47 = vsel %vm865_vm1, 0.0, %v4111_v4 }
 0x910   : > { %v4134_v62 = vmul.f32 %v9948_v42, %v4124_v47  ;;  %v4113_v41 = vpop.permute.xlu1 %4112  ;;  %v4103_v38 = vadd.f32 %v4099_v54, %v4071_v29  ;;  %v9952_v54 = vld [vmem:[#allocation72_spill] sm:$0xff] }
 0x911   : > { %v4118_v39 = vsel %vm865_vm1, %v4111_v4, %v4113_v41 }
 0x912   : > { %v4138_v49 = vadd.f32 %v4134_v62, %v4102_v18  ;;  %v4135_v45 = vmul.f32 %v9948_v42, %v4118_v39  ;;  %v8728_v46 = vpop.permute.xlu0 %4192  ;;  %v9953_v42 = vld [vmem:[#allocation79_spill] sm:$0xff] }
 0x913   : > { %v4100_v62 = vmul.f32 %v9953_v42, %v4089_v53  ;;  %v4101_v41 = vmul.f32 %v9953_v42, %v4083_v17 }
 0x914   : > { %v4154_v5 = vadd.f32 %v4150_v15, %v4138_v49  ;;  %v4139_v31 = vadd.f32 %v4135_v45, %v4103_v38  ;;  %v4049_v51 = vpop.permute.xlu1 %4048 }
 0x915   : > { %v4059_v11 = vsel %vm865_vm1, 0.0, %v4049_v51 }
 0x916   : > { %v4155_v44 = vadd.f32 %v4151_v43, %v4139_v31  ;;  %v4170_v1 = vadd.f32 %v4166_v56, %v4154_v5  ;;  %v4195_v2 = vpop.permute.xlu0 %4194  ;;  %v4072_v18 = vmul.f32 %v9952_v54, %v4059_v11  ;;  %v9955_v56 = vld [vmem:[#allocation112_spill] sm:$0xff]  ;;  %v9957_v31 = vld [vmem:[#allocation91_spill] sm:$0xff] }
 0x917   : > { %v9956_v43 = vld [vmem:[#allocation36_spill] sm:$0xff] }
 0x918   : > { %v8740_v35 = vadd.f32 %v4182_v7, %v4170_v1  ;;  %v4171_v14 = vadd.f32 %v4167_v22, %v4155_v44  ;;  %v3838_v29 = vpop.permute.xlu1 %3837  ;;  %v4104_v49 = vadd.f32 %v4100_v62, %v4072_v18  ;;  %v4152_v5 = vmul.f32 %v9956_v43, %v9955_v56  ;;  %v9958_v44 = vld [vmem:[#allocation114_spill] sm:$0xff]  ;;  %v9959_v1 = vld [vmem:[#allocation19_spill] sm:$0xff] }
 0x919   : > { %v9964_v62 = vld [vmem:[#allocation31_spill] sm:$0xff] }
 0x91a   : > { %v8743_v61 = vadd.f32 %v4183_v59, %v4171_v14  ;;  %v4051_v4 = vpop.permute.xlu0 %4050  ;;  %v4168_v59 = vmul.f32 %v9959_v1, %v9958_v44  ;;  %v9960_v14 = vld [vmem:[#allocation68_spill] sm:$0xff] }
 0x91b   : > { %v4053_v47 = vsel %vm865_vm1, %v4049_v51, %v4051_v4  ;;  %v4153_v51 = vmul.f32 %v9956_v43, %v9957_v31  ;;  %v4169_v11 = vmul.f32 %v9959_v1, %v9960_v14  ;;  %v9966_v43 = vld [vmem:[#allocation105_spill] sm:$0xff]  ;;  %v9967_v31 = vld [vmem:[#allocation67_spill] sm:$0xff] }
 0x91c   : > { %v4073_v10 = vmul.f32 %v9952_v54, %v4053_v47  ;;  %v9961_v47 = vld [vmem:[#allocation81_spill] sm:$0xff]  ;;  %v9962_v54 = vld [vmem:[#allocation18_spill] sm:$0xff] }
 0x91d   : > { %v4184_v18 = vmul.f32 %v9962_v54, %v9961_v47 }
 0x91e   : > { %v4115_v39 = vpop.permute.xlu0 %4114  ;;  %v4117_v50 = vpop.permute.xlu1 %4116  ;;  %v4105_v45 = vadd.f32 %v4101_v41, %v4073_v10  ;;  %v9963_v10 = vld [vmem:[#allocation12_spill] sm:$0xff]  ;;  %v4231_v41 = vsel %vm1769_vm8, %v9964_v62, %v8709_v32 }
 0x91f   : > { %v4125_v15 = vsel %vm865_vm1, 0.0, %v4115_v39  ;;  %v4119_v38 = vsel %vm865_vm1, %v4115_v39, %v4117_v50  ;;  %v4185_v42 = vmul.f32 %v9962_v54, %v9963_v10  ;;  %v9968_v54 = vld [vmem:[#allocation50_spill] sm:$0xff] }
 0x920   : > { %v4136_v26 = vmul.f32 %v9954_v48, %v4125_v15  ;;  %v4137_v34 = vmul.f32 %v9954_v48, %v4119_v38  ;;  %v3863_v38 = vsel %vm1769_vm8, %v3838_v29, 0.0 }
 0x922   : > { %v4140_v22 = vadd.f32 %v4136_v26, %v4104_v49  ;;  %v4141_v60 = vadd.f32 %v4137_v34, %v4105_v45  ;;  %v4255_v7 = vpop.permute.xlu1 %4254  ;;  %v3836_v17 = vpop.permute.xlu0 %3835  ;;  %v9965_v34 = vld [vmem:[#allocation96_spill] sm:$0xff] }
 0x923   : > { %v3851_v49 = vsel %vm1769_vm8, %v3836_v17, %v3838_v29 }
 0x924   : > { %v4156_v4 = vadd.f32 %v4152_v5, %v4140_v22  ;;  %v4157_v53 = vadd.f32 %v4153_v51, %v4141_v60  ;;  %v4248_v5 = vmul.f32 %v9966_v43, %v4231_v41  ;;  %v3884_v51 = vmul.f32 %v9967_v31, %v3863_v38 }
 0x925   : > { %v3883_v22 = vmul.f32 %v9967_v31, %v3851_v49 }
 0x926   : > { %v4172_v39 = vadd.f32 %v4168_v59, %v4156_v4  ;;  %v4197_v50 = vpop.permute.xlu1 %4196  ;;  %v4173_v15 = vadd.f32 %v4169_v11, %v4157_v53  ;;  %v3892_v14 = vadd.f32 %v3884_v51, %v8595_v24  ;;  %v4204_v11 = vsel %vm1769_vm8, %v8728_v46, 0.0 }
 0x927   : > { %v4199_v45 = vsel %vm1769_vm8, %v4195_v2, %v4197_v50  ;;  %v4205_v60 = vsel %vm1769_vm8, %v4197_v50, 0.0  ;;  %v4198_v2 = vsel %vm1769_vm8, %v8711_v9, %v8728_v46  ;;  %v3891_v29 = vadd.f32 %v3883_v22, %v8593_v28 }
 0x928   : > { %v4188_v48 = vadd.f32 %v4184_v18, %v4172_v39  ;;  %v4189_v26 = vadd.f32 %v4185_v42, %v4173_v15  ;;  %v4216_v56 = vmul.f32 %v9965_v34, %v4199_v45  ;;  %v4217_v59 = vmul.f32 %v9965_v34, %v4205_v60  ;;  %v9971_v60 = vld [vmem:[#allocation92_spill] sm:$0xff] }
 0x929   : > { %v4237_v53 = vsel %vm1769_vm8, %v8709_v32, 0.0  ;;  %v4214_v18 = vmul.f32 %v9968_v54, %v4198_v2  ;;  %v4215_v9 = vmul.f32 %v9968_v54, %v4204_v11  ;;  %v4236_v46 = vsel %vm1769_vm8, %v8703_v13, 0.0 }
 0x92a   : > { %v4220_v44 = vadd.f32 %v4216_v56, %v4188_v48  ;;  %v4221_v10 = vadd.f32 %v4217_v59, %v4189_v26  ;;  %v4249_v42 = vmul.f32 %v9966_v43, %v4237_v53  ;;  %v4230_v32 = vsel %vm1769_vm8, %v8705_v19, %v8703_v13  ;;  %v4259_v41 = vpop.permute.xlu1 %4258  ;;  %v9969_v48 = vld [vmem:[#allocation49_spill] sm:$0xff]  ;;  %v9970_v19 = vld [vmem:[#allocation106_spill] sm:$0xff] }
 0x92b   : > { %v4218_v62 = vadd.f32 %v4214_v18, %v8740_v35  ;;  %v4219_v50 = vadd.f32 %v4215_v9, %v8743_v61  ;;  %v4247_v35 = vmul.f32 %v9970_v19, %v4236_v46  ;;  %v4246_v34 = vmul.f32 %v9970_v19, %v4230_v32  ;;  %v4347_v46 = vld [vmem:[#allocation2] sm:$0x1] }
 0x92c   : > { %v4252_v1 = vadd.f32 %v4248_v5, %v4220_v44  ;;  %v4253_v45 = vadd.f32 %v4249_v42, %v4221_v10  ;;  %v4434_v42 = vld [vmem:[%s9060_s18 + $0x8] sm:$0xff]  ;;  %v9972_v32 = vmov 2  }
 0x92d   : > { %v4250_v51 = vadd.f32 %v4246_v34, %v4218_v62  ;;  %v4251_v22 = vadd.f32 %v4247_v35, %v4219_v50  ;;  %v9973_v62 = vmov 0.0  }
 0x92e   : > { %5100 = vmatprep.mubr.msk.f32.mxu0 %vm5303_vm10, %v9973_v62 }
 0x92f   : > { %v3906_v4 = vpop.permute.xlu0 %3905 }
 0x930   : > { %v8791_v17 = vadd.f32 %v3906_v4, %v3891_v29  ;;  %v8793_v47 = vadd.f32 %v3906_v4, %v3892_v14 }
 0x932   : > { %v3931_v28 = vmax.f32 %v8791_v17, 0.0  ;;  %v3932_v24 = vmax.f32 %v8793_v47, 0.0 }
 0x933   : > { %v4261_v39 = vpop.permute.xlu0 %4260 }
 0x934   : > { %v4263_v15 = vsel %vm1769_vm8, %v4259_v41, %v4261_v39  ;;  %v4269_v38 = vsel %vm1769_vm8, %v4261_v39, 0.0  ;;  %v4322_v49 = vadd.f32 %v3932_v24, %v3931_v28  ;;  %v4433_v41 = vld [vmem:[%s9060_s18] sm:$0xff] }
 0x935   : > { %v4280_v26 = vmul.f32 %v9969_v48, %v4263_v15  ;;  %v4281_v13 = vmul.f32 %v9969_v48, %v4269_v38 }
 0x936   : > { %4323 = vadd.xlane.f32.xlu1 %v4322_v49 }
 0x937   : > { %v4284_v61 = vadd.f32 %v4280_v26, %v4252_v1  ;;  %v4285_v56 = vadd.f32 %v4281_v13, %v4253_v45  ;;  %v4257_v43 = vpop.permute.xlu0 %4256  ;;  %v4291_v4 = vpop.permute.xlu1 %4290 }
 0x938   : > { %v4262_v5 = vsel %vm1769_vm8, %v4255_v7, %v4257_v43  ;;  %v4268_v31 = vsel %vm1769_vm8, %v4257_v43, 0.0 }
 0x939   : > { %v4278_v44 = vmul.f32 %v9971_v60, %v4262_v5  ;;  %v4279_v59 = vmul.f32 %v9971_v60, %v4268_v31  ;;  %v8822_v2 = vadd.f32 %v8707_v20, %v4284_v61  ;;  %v8825_v29 = vadd.f32 %v8707_v20, %v4285_v56 }
 0x93b   : > { %v4282_v14 = vadd.f32 %v4278_v44, %v4250_v51  ;;  %v4283_v1 = vadd.f32 %v4279_v59, %v4251_v22  ;;  %v4304_v11 = vmax.f32 %v8822_v2, 0.0  ;;  %v4305_v7 = vmax.f32 %v8825_v29, 0.0  ;;  %v4346_v59 = vld [vmem:[%s9057_s15] sm:$0x1]  ;;  %v5268_v2 = vld [vmem:[%s9061_s19 + $0x8] sm:$0xff]   ;;  %v5270_v29 = vld [vmem:[%s9061_s19 + $0x10] sm:$0xff]  }
 0x93d   : > { %v8829_v53 = vadd.f32 %v4291_v4, %v4282_v14  ;;  %v8831_v54 = vadd.f32 %v4291_v4, %v4283_v1  ;;  %v4333_v18 = vadd.f32 %v4305_v7, %v4304_v11  ;;  %v9974_v1 = vmov 0   ;;  %v4431_v4 = vld [vmem:[%s9059_s17] sm:$0xff] }
 0x93e   : > { %5105 = vmatprep.mubr.msk.f32.mxu1 %vm1007_vm3, %v4431_v4 }
 0x93f   : > { %v4302_v10 = vmax.f32 %v8829_v53, 0.0  ;;  %v4303_v20 = vmax.f32 %v8831_v54, 0.0  ;;  %4334 = vadd.xlane.f32.xlu0 %v4333_v18  ;;  %v9975_v18 = vlaneseq  ;;  %v5266_v53 = vld [vmem:[%s9061_s19] sm:$0xff]  }
 0x941   : > { %v4330_v9 = vadd.f32 %v4303_v20, %v4302_v10 }
 0x943   : > { %4331 = vadd.xlane.f32.xlu0 %v4330_v9  ;;  %v4354_v9 = vshrl.u32 %v9975_v18, 7  ;;  %v5267_v18 = vld [vmem:[%s9063_s21 + $0x8] sm:$0xff]  }
 0x947   : > { %4350 = vperm.xlu1 %5244, %v4347_v46   ;;  %v4355_v46 = vsub.s32 0, %v4354_v9 }
 0x94b   : > { %4442 = vperm.xlu1 %5244, %v4434_v42  }
 0x94f   : > { %5246 = vset.pattern.permute.xlu1 %v9972_v32 }
 0x959   : > { %4437 = vperm.xlu0 %5243, %v4433_v41  }
 0x964   : > { %v4311_v39 = vpop.xlane.xlu0 %4310 }
 0x965   : > { %v4313_v48 = vmul.f32 0.00390625, %v4311_v39 }
 0x968   : > { %v4327_v15 = vpop.xlane.xlu0 %4326 }
 0x969   : > { %v4319_v50 = vpop.xlane.xlu1 %4318  ;;  %v4329_v19 = vmul.f32 0.00390625, %v4327_v15 }
 0x96a   : > { %v4321_v38 = vmul.f32 0.00390625, %v4319_v50 }
 0x96c   : > { %v4308_v45 = vpop.xlane.xlu0 %4307  ;;  %v4339_v26 = vsel %vm1007_vm3, %v4313_v48, %v4321_v38  ;;  %v4432_v38 = vld [vmem:[%s9059_s17 + $0x8] sm:$0xff]  ;;  %v9978_v48 = vld [vmem:[#allocation5_spill] sm:$0xff] }
 0x96d   : > { %v4316_v49 = vpop.xlane.xlu1 %4315  ;;  %v4312_v34 = vmul.f32 0.00390625, %v4308_v45  ;;  %v4342_v5 = vsel %vm4340_vm11, %v4339_v26, %v4329_v19  ;;  %v9977_v45 = vld [vmem:[#allocation4_spill] sm:$0xff]  ;;  %v9979_v26 = vld [vmem:[#allocation6_spill] sm:$0xff] }
 0x96e   : > { %v4320_v61 = vmul.f32 0.00390625, %v4316_v49  ;;  %v9976_v49 = vld [vmem:[#allocation3_spill] sm:$0xff] }
 0x970   : > { %v4338_v22 = vsel %vm1007_vm3, %v4312_v34, %v4320_v61 }
 0x9bf   : > { %v4324_v13 = vpop.xlane.xlu1 %4323 }
 0x9c0   : > { %v4328_v43 = vmul.f32 0.00390625, %v4324_v13 }
 0x9c2   : > { %v4341_v44 = vsel %vm4340_vm11, %v4338_v22, %v4328_v43 }
 0x9c3   : > { %v4351_v42 = vpop.permute.xlu1 %4350 }
 0x9c7   : > { %v4443_v13 = vpop.permute.xlu1 %4442 }
 0x9c8   : > { %v4335_v35 = vpop.xlane.xlu0 %4334 }
 0x9c9   : > { %v4337_v56 = vmul.f32 0.00390625, %v4335_v35 }
 0x9cb   : > { %v4345_v31 = vsel %vm4343_vm12, %v4342_v5, %v4337_v56 }
 0x9cc   : > { %5097 = vmatpush3.msra.mxu0 %v4345_v31  ;;  %v4332_v51 = vpop.xlane.xlu0 %4331 }
 0x9cd   : > { %v4336_v60 = vmul.f32 0.00390625, %v4332_v51  ;;  %5098 = vmatprep.subr.mxu0 %v9973_v62  ;;  %v4356_v62 = vrot.slane %v4351_v42, %v4355_v46  ;;  %v9980_v46 = vmov 1   ;;  %v9981_v42 = vmov 3  }
 0x9cf   : > { %v4344_v14 = vsel %vm4343_vm12, %v4341_v44, %v4336_v60 }
 0x9d0   : > { %5099 = vmatpush3.msra.mxu0 %v4344_v14  ;;  %v5265_v14 = vld [vmem:[%s9063_s21] sm:$0xff]  }
 0x9d1   : > { %5101 = vmatmul.mubr.msk.f32.vlgmr.msra.gmra.mxu0 %vm865_vm1, %v4346_v59 }
 0x9d2   : > { %4726 = vmatprep.mubr.bf16.mxu0 %v9974_v1 }
 0x9d4   : > { %v4438_v34 = vpop.permute.xlu0 %4437 }
 0xa91   : > { %v4426_v41 = vpop.f32.mrf.mxu0 }
 0xa92   : > { %v4427_v39 = vadd.f32 %v4426_v41, %v4356_v62  ;;  %v5269_v62 = vld [vmem:[%s9063_s21 + $0x10] sm:$0xff]   ;;  %v5271_v41 = vld [vmem:[%s9063_s21 + $0x18] sm:$0xff]  }
 0xa93   : > { %v5102_v50 = vpop.f32.mrf.mxu0 }
 0xa94   : > { %v4430_v15 = vmax.f32 %v4427_v39, 0.0  ;;  %v4614_v39 = vld [vmem:[%s9062_s20] sm:$0xff]  ;;  %v4616_v50 = vld [vmem:[%s9062_s20 + $0x10] sm:$0xff] }
 0xa96   : > { %5103 = vmatprep.subr.msk.mxu1 %vm4451_vm13, %v4430_v15 }
 0xa97   : > { %5104 = vmatpush3.msk.msra.mxu1 %vm4451_vm13, %v4430_v15  ;;  %v4618_v15 = vld [vmem:[%s9062_s20 + $0x20] sm:$0xff] }
 0xa98   : > { %5106 = vmatmul.mubr.msk.f32.vlgmr.msra.gmra.mxu1 %vm1007_vm3, %v4432_v38  ;;  %4867 = vmatprep.subr.bf16.mxu1 %v9976_v49  ;;  %v4617_v38 = vld [vmem:[%s9062_s20 + $0x18] sm:$0xff]  ;;  %v4620_v49 = vld [vmem:[%s9062_s20 + $0x30] sm:$0xff] }
 0xa99   : > { %4868 = vmatpush1.bf16.msra.mxu1 %v9977_v45  ;;  %4887 = vmatprep.mubr.bf16.mxu1 %v9974_v1  ;;  %v4619_v45 = vld [vmem:[%s9062_s20 + $0x28] sm:$0xff] }
 0xa9a   : > { %4869 = vmatprep.subr.bf16.mxu1 %v9978_v48  ;;  %v4775_v48 = vld [vmem:[%s9064_s22] sm:$0xff] }
 0xa9d   : > { %4870 = vmatpush1.bf16.msra.mxu1 %v9979_v26  ;;  %v4621_v26 = vld [vmem:[%s9062_s20 + $0x38] sm:$0xff] }
 0xaa0   : > { %5082 = vmatmul.mubr.msk.bf16.vlgmr.msra.gmra.mxu1 %vm745_vm0, %v5265_v14 }
 0xaa1   : > { %4897 = vmatprep.mubr.bf16.mxu1 %v9974_v1 }
 0xaa8   : > { %5083 = vmatmul.mubr.msk.bf16.gmra.mxu1 %vm745_vm0, %v5267_v18 }
 0xaa9   : > { %4907 = vmatprep.mubr.bf16.mxu1 %v9974_v1 }
 0xab0   : > { %5084 = vmatmul.mubr.msk.bf16.gmra.mxu1 %vm745_vm0, %v5269_v62 }
 0xab1   : > { %4917 = vmatprep.mubr.bf16.mxu1 %v9974_v1 }
 0xab8   : > { %5085 = vmatmul.mubr.msk.bf16.gmra.mxu1 %vm745_vm0, %v5271_v41 }
 0xb58   : > { %v5107_v19 = vpop.f32.mrf.mxu1 }
 0xb59   : > { %v4527_v35 = vadd.f32 %v5107_v19, %v4443_v13  ;;  %v4777_v13 = vld [vmem:[%s9064_s22 + $0x10] sm:$0xff]  ;;  %v4776_v19 = vld [vmem:[%s9064_s22 + $0x8] sm:$0xff] }
 0xb5a   : > { %v4521_v61 = vpop.f32.mrf.mxu1 }
 0xb5b   : > { %v4531_v56 = vsub.f32 0.0, %v4527_v35  ;;  %v4522_v43 = vadd.f32 %v4521_v61, %v4438_v34  ;;  %v4779_v35 = vld [vmem:[%s9064_s22 + $0x20] sm:$0xff]  ;;  %v4778_v34 = vld [vmem:[%s9064_s22 + $0x18] sm:$0xff]  ;;  %v4781_v61 = vld [vmem:[%s9064_s22 + $0x30] sm:$0xff] }
 0xb5d   : > { %v4534_v5 = vmul.f32 1.442695, %v4531_v56  ;;  %v4530_v31 = vsub.f32 0.0, %v4522_v43  ;;  %v4780_v56 = vld [vmem:[%s9064_s22 + $0x28] sm:$0xff]  ;;  %v4782_v43 = vld [vmem:[%s9064_s22 + $0x38] sm:$0xff] }
 0xb5f   : > { %5273 = vpow2.f32 %v4534_v5  ;;  %v4532_v51 = vmul.f32 1.442695, %v4530_v31 }
 0xb61   : > { %5275 = vpow2.f32 %v4532_v51 }
 0xb6c   : > { %v5274_v22 = vpop.eup %5273 }
 0xb6d   : > { %v4537_v60 = vadd.f32 1.0, %v5274_v22 }
 0xb6e   : > { %v5276_v44 = vpop.eup %5275 }
 0xb6f   : > { %5277 = vrcp.f32 %v4537_v60  ;;  %v4536_v59 = vadd.f32 1.0, %v5276_v44 }
 0xb71   : > { %5279 = vrcp.f32 %v4536_v59 }
 0xb7c   : > { %v5278_v4 = vpop.eup %5277 }
 0xb7d   : > { %4577 = vperm.xlu1 %5246, %v5278_v4   ;;  %4549 = vperm.xlu0 %5243, %v5278_v4  }
 0xb7e   : > { %v5280_v9 = vpop.eup %5279 }
 0xb81   : > { %5247 = vset.pattern.permute.xlu1 %v9974_v1  ;;  %5245 = vset.pattern.permute.xlu0 %v9980_v46 }
 0xb82   : > { %4561 = vperm.xlu0 %5245, %v5278_v4   ;;  %4544 = vperm.xlu1 %5247, %v5280_v9  }
 0xb86   : > { %5250 = vset.pattern.permute.xlu0 %v9981_v42  ;;  %5248 = vset.pattern.permute.xlu1 %v9980_v46 }
 0xb87   : > { %4589 = vperm.xlu0 %5250, %v5280_v9   ;;  %4557 = vperm.xlu1 %5248, %v5280_v9  }
 0xb8b   : > { %5249 = vset.pattern.permute.xlu1 %v9972_v32  ;;  %5253 = vset.pattern.permute.xlu0 %v9974_v1  ;;  %v4615_v32 = vld [vmem:[%s9062_s20 + $0x8] sm:$0xff] }
 0xb8c   : > { %4573 = vperm.xlu1 %5249, %v5280_v9   ;;  %4629 = vperm.xlu0 %5253, %v4615_v32  }
 0xb90   : > { %5251 = vset.pattern.permute.xlu1 %v9981_v42  ;;  %4644 = vperm.xlu0 %5253, %v4618_v15  }
 0xb91   : > { %4593 = vperm.xlu1 %5251, %v5278_v4  }
 0xb94   : > { %4654 = vperm.xlu0 %5253, %v4620_v49  }
 0xb95   : > { %5252 = vset.pattern.permute.xlu1 %v9974_v1 }
 0xb96   : > { %4624 = vperm.xlu1 %5252, %v4614_v39  }
 0xb98   : > { %4785 = vperm.xlu0 %5253, %v4775_v48  }
 0xb9a   : > { %4634 = vperm.xlu1 %5252, %v4616_v50  }
 0xb9c   : > { %4795 = vperm.xlu0 %5253, %v4777_v13  }
 0xb9e   : > { %4639 = vperm.xlu1 %5252, %v4617_v38  }
 0xba0   : > { %4805 = vperm.xlu0 %5253, %v4779_v35  }
 0xba2   : > { %4649 = vperm.xlu1 %5252, %v4619_v45  }
 0xba4   : > { %4815 = vperm.xlu0 %5253, %v4781_v61  }
 0xba6   : > { %4659 = vperm.xlu1 %5252, %v4621_v26  }
 0xbaa   : > { %4790 = vperm.xlu1 %5252, %v4776_v19  }
 0xbae   : > { %4800 = vperm.xlu1 %5252, %v4778_v34  }
 0xbb2   : > { %4810 = vperm.xlu1 %5252, %v4780_v56  }
 0xbb6   : > { %4820 = vperm.xlu1 %5252, %v4782_v43  }
 0xbf8   : > { %v4578_v5 = vpop.permute.xlu1 %4577  ;;  %v4550_v31 = vpop.permute.xlu0 %4549 }
 0xbf9   : > { %v4554_v18 = vmul.f32 %v4550_v31, %v2188_v23  ;;  %v4555_v9 = vmul.f32 %v4550_v31, %v2189_v25  ;;  %v4582_v27 = vmul.f32 %v4578_v5, %v3933_v16  ;;  %v4583_v25 = vmul.f32 %v4578_v5, %v3934_v37 }
 0xbfd   : > { %v4545_v51 = vpop.permute.xlu1 %4544  ;;  %v4562_v22 = vpop.permute.xlu0 %4561 }
 0xbfe   : > { %v4566_v44 = vmul.f32 %v4562_v22, %v3228_v21  ;;  %v4567_v59 = vmul.f32 %v4562_v22, %v3229_v36  ;;  %v4552_v46 = vmul.f32 %v4545_v51, %v2186_v6  ;;  %v4553_v57 = vmul.f32 %v4545_v51, %v2187_v8 }
 0xc00   : > { %v4570_v21 = vadd.f32 %v4566_v44, %v4554_v18  ;;  %v4571_v36 = vadd.f32 %v4567_v59, %v4555_v9 }
 0xc02   : > { %v4558_v60 = vpop.permute.xlu1 %4557  ;;  %v4590_v40 = vpop.permute.xlu0 %4589 }
 0xc03   : > { %v4564_v14 = vmul.f32 %v4558_v60, %v3226_v12  ;;  %v4565_v4 = vmul.f32 %v4558_v60, %v3227_v63  ;;  %v4586_v12 = vadd.f32 %v4582_v27, %v4570_v21  ;;  %v4587_v63 = vadd.f32 %v4583_v25, %v4571_v36 }
 0xc04   : > { %v4596_v17 = vmul.f32 %v4590_v40, %v4302_v10  ;;  %v4597_v47 = vmul.f32 %v4590_v40, %v4303_v20 }
 0xc05   : > { %v4568_v30 = vadd.f32 %v4564_v14, %v4552_v46  ;;  %v4569_v23 = vadd.f32 %v4565_v4, %v4553_v57 }
 0xc07   : > { %v4574_v55 = vpop.permute.xlu1 %4573  ;;  %v4630_v32 = vpop.permute.xlu0 %4629 }
 0xc08   : > { %v4580_v0 = vmul.f32 %v4574_v55, %v3931_v28  ;;  %v4581_v52 = vmul.f32 %v4574_v55, %v3932_v24 }
 0xc0a   : > { %v4584_v58 = vadd.f32 %v4580_v0, %v4568_v30  ;;  %v4585_v6 = vadd.f32 %v4581_v52, %v4569_v23 }
 0xc0b   : > { %v9001_v38 = vpop.permute.xlu0 %4644 }
 0xc0c   : > { %v4594_v8 = vpop.permute.xlu1 %4593  ;;  %v4600_v33 = vadd.f32 %v4596_v17, %v4584_v58  ;;  %v4601_v16 = vadd.f32 %v4597_v47, %v4585_v6 }
 0xc0d   : > { %v4598_v28 = vmul.f32 %v4594_v8, %v4304_v11  ;;  %v4599_v3 = vmul.f32 %v4594_v8, %v4305_v7  ;;  %v5272_v11 = vld [vmem:[%s9061_s19 + $0x18] sm:$0xff]   ;;  %v4889_v7 = vpop.f32.mrf.mxu1 }
 0xc0f   : > { %v4602_v37 = vadd.f32 %v4598_v28, %v4586_v12  ;;  %v4603_v24 = vadd.f32 %v4599_v3, %v4587_v63  ;;  %v4891_v54 = vpop.f32.mrf.mxu1  ;;  %v9005_v48 = vpop.permute.xlu0 %4654 }
 0xc11   : > { %v4612_v42 = vpack.c.bf16 %v4602_v37, %v4600_v33  ;;  %v4613_v62 = vpack.c.bf16 %v4603_v24, %v4601_v16  ;;  %v4625_v10 = vpop.permute.xlu1 %4624  ;;  %v4893_v20 = vpop.f32.mrf.mxu1 }
 0xc13   : > { %4708 = vmatprep.subr.bf16.mxu0 %v4613_v62  ;;  %v4895_v41 = vpop.f32.mrf.mxu1  ;;  %v4786_v19 = vpop.permute.xlu0 %4785 }
 0xc14   : > { %4709 = vmatpush1.bf16.msra.mxu0 %v4612_v42  ;;  %v4890_v34 = vadd.f32 %v4889_v7, %v4786_v19  ;;  %v4892_v51 = vadd.f32 %v4891_v54, %v4786_v19 }
 0xc15   : > { %v4635_v39 = vpop.permute.xlu1 %4634  ;;  %v4899_v50 = vpop.f32.mrf.mxu1 }
 0xc17   : > { %5074 = vmatmul.mubr.msk.bf16.vlgmr.msra.gmra.mxu0 %vm865_vm1, %v5266_v53  ;;  %v4901_v49 = vpop.f32.mrf.mxu1  ;;  %v4796_v52 = vpop.permute.xlu0 %4795 }
 0xc18   : > { %4736 = vmatprep.mubr.bf16.mxu0 %v9974_v1  ;;  %v4900_v25 = vadd.f32 %v4899_v50, %v4796_v52  ;;  %v4902_v12 = vadd.f32 %v4901_v49, %v4796_v52 }
 0xc19   : > { %v4640_v15 = vpop.permute.xlu1 %4639 }
 0xc1d   : > { %v9003_v45 = vpop.permute.xlu1 %4649 }
 0xc1f   : > { %5075 = vmatmul.mubr.msk.bf16.gmra.mxu0 %vm865_vm1, %v5268_v2 }
 0xc20   : > { %4746 = vmatprep.mubr.bf16.mxu0 %v9974_v1 }
 0xc21   : > { %v9007_v13 = vpop.permute.xlu1 %4659 }
 0xc25   : > { %v4791_v44 = vpop.permute.xlu1 %4790 }
 0xc26   : > { %v4894_v14 = vadd.f32 %v4893_v20, %v4791_v44  ;;  %v4896_v57 = vadd.f32 %v4895_v41, %v4791_v44 }
 0xc27   : > { %5076 = vmatmul.mubr.msk.bf16.gmra.mxu0 %vm865_vm1, %v5270_v29 }
 0xc28   : > { %4756 = vmatprep.mubr.bf16.mxu0 %v9974_v1  ;;  %v4903_v1 = vpop.f32.mrf.mxu1 }
 0xc29   : > { %v4801_v47 = vpop.permute.xlu1 %4800 }
 0xc2a   : > { %v4905_v26 = vpop.f32.mrf.mxu1  ;;  %v4904_v3 = vadd.f32 %v4903_v1, %v4801_v47 }
 0xc2b   : > { %v4906_v42 = vadd.f32 %v4905_v26, %v4801_v47 }
 0xc2c   : > { %v4909_v35 = vpop.f32.mrf.mxu1 }
 0xc2d   : > { %v4811_v1 = vpop.permute.xlu1 %4810 }
 0xc2e   : > { %v4911_v31 = vpop.f32.mrf.mxu1 }
 0xc2f   : > { %5077 = vmatmul.mubr.msk.bf16.gmra.mxu0 %vm865_vm1, %v5272_v11  ;;  %v4806_v11 = vpop.permute.xlu0 %4805 }
 0xc30   : > { %v4913_v21 = vpop.f32.mrf.mxu1  ;;  %v4910_v20 = vadd.f32 %v4909_v35, %v4806_v11 }
 0xc31   : > { %v4914_v19 = vadd.f32 %v4913_v21, %v4811_v1 }
 0xc32   : > { %v4915_v8 = vpop.f32.mrf.mxu1 }
 0xc33   : > { %v4816_v35 = vpop.permute.xlu0 %4815 }
 0xc34   : > { %v4919_v53 = vpop.f32.mrf.mxu1 }
 0xc36   : > { %v4921_v50 = vpop.f32.mrf.mxu1 }
 0xcd7   : > { %v4728_v61 = vpop.f32.mrf.mxu0 }
 0xcd8   : > { %v4729_v56 = vadd.f32 %v4728_v61, %v4625_v10 }
 0xcd9   : > { %v4730_v43 = vpop.f32.mrf.mxu0 }
 0xcda   : > { %v4731_v5 = vadd.f32 %v4730_v43, %v4625_v10  ;;  %v4928_v22 = vadd.f32 %v4890_v34, %v4729_v56 }
 0xcdb   : > { %v4732_v60 = vpop.f32.mrf.mxu0 }
 0xcdc   : > { %v4733_v59 = vadd.f32 %v4732_v60, %v4630_v32  ;;  %v4929_v4 = vadd.f32 %v4892_v51, %v4731_v5  ;;  %v4944_v18 = vmax.f32 %v4928_v22, 0.0  ;;  %v4916_v5 = vadd.f32 %v4915_v8, %v4811_v1 }
 0xcdd   : > { %v4734_v9 = vpop.f32.mrf.mxu0 }
 0xcde   : > { %v4735_v46 = vadd.f32 %v4734_v9, %v4630_v32  ;;  %v4930_v55 = vadd.f32 %v4894_v14, %v4733_v59  ;;  %v4945_v36 = vmax.f32 %v4929_v4, 0.0  ;;  %4960 = vst [vmem:[%s9013_s1] sm:$0xff] %v4944_v18  ;;  %v4920_v4 = vadd.f32 %v4919_v53, %v4816_v35  ;;  %v4821_v18 = vpop.permute.xlu1 %4820 }
 0xcdf   : > { %v4738_v0 = vpop.f32.mrf.mxu0 }
 0xce0   : > { %v4739_v30 = vadd.f32 %v4738_v0, %v4635_v39  ;;  %v4931_v23 = vadd.f32 %v4896_v57, %v4735_v46  ;;  %v4946_v27 = vmax.f32 %v4930_v55, 0.0  ;;  %4961 = vst [vmem:[%s9013_s1 + $0x8] sm:$0xff] %v4945_v36  ;;  %v4922_v55 = vadd.f32 %v4921_v50, %v4816_v35 }
 0xce1   : > { %v4740_v40 = vpop.f32.mrf.mxu0 }
 0xce2   : > { %v4741_v58 = vadd.f32 %v4740_v40, %v4635_v39  ;;  %v4947_v6 = vmax.f32 %v4931_v23, 0.0  ;;  %4962 = vst [vmem:[%s9013_s1 + $0x10] sm:$0xff] %v4946_v27  ;;  %v4932_v63 = vadd.f32 %v4900_v25, %v4739_v30 }
 0xce3   : > { %v4742_v17 = vpop.f32.mrf.mxu0 }
 0xce4   : > { %4963 = vst [vmem:[%s9013_s1 + $0x18] sm:$0xff] %v4947_v6  ;;  %v4743_v28 = vadd.f32 %v4742_v17, %v4640_v15  ;;  %v4933_v33 = vadd.f32 %v4902_v12, %v4741_v58  ;;  %v4948_v16 = vmax.f32 %v4932_v63, 0.0 }
 0xce5   : > { %v4744_v37 = vpop.f32.mrf.mxu0 }
 0xce6   : > { %v4745_v24 = vadd.f32 %v4744_v37, %v4640_v15  ;;  %v4934_v62 = vadd.f32 %v4904_v3, %v4743_v28  ;;  %v4949_v2 = vmax.f32 %v4933_v33, 0.0  ;;  %4964 = vst [vmem:[%s9013_s1 + $0x20] sm:$0xff] %v4948_v16  ;;  %v4912_v15 = vadd.f32 %v4911_v31, %v4806_v11  ;;  %v4923_v31 = vpop.f32.mrf.mxu1 }
 0xce7   : > { %v4748_v29 = vpop.f32.mrf.mxu0  ;;  %v4924_v0 = vadd.f32 %v4923_v31, %v4821_v18 }
 0xce8   : > { %v4935_v7 = vadd.f32 %v4906_v42, %v4745_v24  ;;  %v4950_v54 = vmax.f32 %v4934_v62, 0.0  ;;  %v4749_v10 = vadd.f32 %v4748_v29, %v9001_v38  ;;  %4965 = vst [vmem:[%s9013_s1 + $0x28] sm:$0xff] %v4949_v2  ;;  %v4925_v21 = vpop.f32.mrf.mxu1 }
 0xce9   : > { %v4750_v41 = vpop.f32.mrf.mxu0  ;;  %v4926_v25 = vadd.f32 %v4925_v21, %v4821_v18 }
 0xcea   : > { %v4951_v39 = vmax.f32 %v4935_v7, 0.0  ;;  %4966 = vst [vmem:[%s9013_s1 + $0x30] sm:$0xff] %v4950_v54  ;;  %v4751_v32 = vadd.f32 %v4750_v41, %v9001_v38  ;;  %v4936_v49 = vadd.f32 %v4910_v20, %v4749_v10 }
 0xceb   : > { %v4752_v26 = vpop.f32.mrf.mxu0 }
 0xcec   : > { %4967 = vst [vmem:[%s9013_s1 + $0x38] sm:$0xff] %v4951_v39  ;;  %v4753_v34 = vadd.f32 %v4752_v26, %v9003_v45  ;;  %v4937_v61 = vadd.f32 %v4912_v15, %v4751_v32  ;;  %v4952_v56 = vmax.f32 %v4936_v49, 0.0 }
 0xced   : > { %v4754_v43 = vpop.f32.mrf.mxu0 }
 0xcee   : > { %v4938_v51 = vadd.f32 %v4914_v19, %v4753_v34  ;;  %v4755_v38 = vadd.f32 %v4754_v43, %v9003_v45  ;;  %v4953_v22 = vmax.f32 %v4937_v61, 0.0  ;;  %4968 = vst [vmem:[%s9013_s1 + $0x40] sm:$0xff] %v4952_v56 }
 0xcef   : > { %v4758_v60 = vpop.f32.mrf.mxu0 }
 0xcf0   : > { %v4954_v44 = vmax.f32 %v4938_v51, 0.0  ;;  %v4939_v59 = vadd.f32 %v4916_v5, %v4755_v38  ;;  %v4759_v14 = vadd.f32 %v4758_v60, %v9005_v48  ;;  %4969 = vst [vmem:[%s9013_s1 + $0x48] sm:$0xff] %v4953_v22 }
 0xcf1   : > { %v4760_v9 = vpop.f32.mrf.mxu0 }
 0xcf2   : > { %4970 = vst [vmem:[%s9013_s1 + $0x50] sm:$0xff] %v4954_v44  ;;  %v4955_v46 = vmax.f32 %v4939_v59, 0.0  ;;  %v4761_v57 = vadd.f32 %v4760_v9, %v9005_v48  ;;  %v4940_v45 = vadd.f32 %v4920_v4, %v4759_v14 }
 0xcf3   : > { %v4762_v36 = vpop.f32.mrf.mxu0 }
 0xcf4   : > { %4971 = vst [vmem:[%s9013_s1 + $0x58] sm:$0xff] %v4955_v46  ;;  %v4763_v52 = vadd.f32 %v4762_v36, %v9007_v13  ;;  %v4941_v30 = vadd.f32 %v4922_v55, %v4761_v57  ;;  %v4956_v23 = vmax.f32 %v4940_v45, 0.0 }
 0xcf5   : > { %v4764_v27 = vpop.f32.mrf.mxu0 }
 0xcf6   : > { %v4942_v40 = vadd.f32 %v4924_v0, %v4763_v52  ;;  %v4765_v58 = vadd.f32 %v4764_v27, %v9007_v13  ;;  %v4957_v6 = vmax.f32 %v4941_v30, 0.0  ;;  %4972 = vst [vmem:[%s9013_s1 + $0x60] sm:$0xff] %v4956_v23 }
 0xcf8   : > { %v4958_v48 = vmax.f32 %v4942_v40, 0.0  ;;  %v4943_v8 = vadd.f32 %v4926_v25, %v4765_v58  ;;  %4973 = vst [vmem:[%s9013_s1 + $0x68] sm:$0xff] %v4957_v6 }
 0xcfa   : > { %4974 = vst [vmem:[%s9013_s1 + $0x70] sm:$0xff] %v4958_v48  ;;  %v4959_v12 = vmax.f32 %v4943_v8, 0.0 }
 0xcfc   : > { %4975 = vst [vmem:[%s9013_s1 + $0x78] sm:$0xff] %v4959_v12 }
 0xcfd PF: > { %s35_s24 = sadd.s32 1, %s5287_s24  }
 0xcfe   : > { %p32_p4 = scmp.ge.s32.totalorder %s35_s24, 4  }
 0xd00   :  { %34 = sbr.rel (!%p32_p4) target bundleno = 10 (0xa), region = 142 }

</bundles_post_ra>
